<compile_context>
chip_gen: v5e
topology: v5e:2x2
jax: 0.10.0
libtpu: 0.0.40
codegen_flags: <defaults>
</compile_context>

<pallas_src>
import math
import functools

import jax
import jax.numpy as jnp
from jax import lax
from jax.experimental import pallas as pl
from jax.experimental.pallas import tpu as pltpu


def _silu(x):
    return x * (1.0 / (1.0 + jnp.exp(-x)))


def _softplus(x):
    # matches F.softplus with threshold=20
    return jnp.where(x > 20.0, x, jnp.log1p(jnp.exp(jnp.minimum(x, 20.0))))


# ----------------------------------------------------------------------------
# Fused Block kernel: add + LayerNorm + Mamba mixer for one (batch, L-chunk)
# ----------------------------------------------------------------------------
def _block_kernel(*refs, eps, has_residual, vectorized_hoist):
    if has_residual:
        (hs_ref, res_ref, nw_ref, nb_ref, inw_ref, convw_ref, convb_ref,
         xdtw_ref, bcw_ref, dtw_ref, dtb_ref, negA_ref, dskip_ref, outw_ref,
         out_ref, resout_ref,
         h_ref, xpad_ref, dA_ref, dtx_ref, y_ref) = refs
    else:
        (hs_ref, nw_ref, nb_ref, inw_ref, convw_ref, convb_ref,
         xdtw_ref, bcw_ref, dtw_ref, dtb_ref, negA_ref, dskip_ref, outw_ref,
         out_ref, resout_ref,
         h_ref, xpad_ref, dA_ref, dtx_ref, y_ref) = refs
        res_ref = None

    Lc = hs_ref.shape[1]
    d_conv, d_inner = convw_ref.shape
    d_state = negA_ref.shape[0]
    cdt = inw_ref.dtype                      # matmul compute dtype (bf16 by default)
    chunk = pl.program_id(1)

    # ---- reset per-sequence carries at the first L-chunk --------------------
    @pl.when(chunk == 0)
    def _init():
        h_ref[...] = jnp.zeros_like(h_ref)
        xpad_ref[0:d_conv - 1, :] = jnp.zeros((d_conv - 1, d_inner), jnp.float32)

    # ---- fused residual add + LayerNorm (f32) -------------------------------
    hs = hs_ref[0].astype(jnp.float32)                      # (Lc, D)
    if has_residual:
        resid = hs + res_ref[0].astype(jnp.float32)
    else:
        resid = hs
    resout_ref[0] = resid.astype(resout_ref.dtype)

    mean = jnp.mean(resid, axis=-1, keepdims=True)
    xcen = resid - mean
    var = jnp.mean(xcen * xcen, axis=-1, keepdims=True)
    normed = xcen * lax.rsqrt(var + eps) * nw_ref[...] + nb_ref[...]   # (Lc, D)

    # ---- in_proj (bf16 MXU matmul, f32 accumulate): x | z -------------------
    xz = jnp.dot(normed.astype(cdt), inw_ref[...],
                 preferred_element_type=jnp.float32)        # (Lc, 2*d_inner)
    x_lin = xz[:, :d_inner]
    z = xz[:, d_inner:]

    # ---- causal depthwise conv over L (padded window read ONCE as a value) --
    xpad_ref[d_conv - 1:, :] = x_lin
    xw = xpad_ref[...]                                      # (Lc + d_conv - 1, d_inner)
    conv = xw[0:Lc, :] * convw_ref[0:1, :]
    for k in range(1, d_conv):
        conv = conv + xw[k:k + Lc, :] * convw_ref[k:k + 1, :]
    x_conv = _silu(conv + convb_ref[...])                   # (Lc, d_inner), f32
    # carry the last (d_conv - 1) pre-conv activations to the next chunk
    xpad_ref[0:d_conv - 1, :] = xw[Lc:, :]

    # ---- x_proj: B,C fused into one MXU pass in scan layout; dt path --------
    xconv_c = x_conv.astype(cdt)
    bc_t = lax.dot_general(bcw_ref[...], xconv_c, (((1,), (1,)), ((), ())),
                           preferred_element_type=jnp.float32)   # (2*d_state, Lc)
    dt_low = jnp.dot(xconv_c, xdtw_ref[...],
                     preferred_element_type=jnp.float32)    # (Lc, dt_rank)
    dt = jnp.dot(dt_low.astype(cdt), dtw_ref[...],
                 preferred_element_type=jnp.float32) + dtb_ref[...]
    dt = _softplus(dt)                                      # (Lc, d_inner)

    # ---- hoisted, vectorized dA = exp(dt*A) and dt*x ------------------------
    negA = negA_ref[...]                                    # (d_state, d_inner)
    if vectorized_hoist:
        dA_ref[...] = jnp.exp(dt[:, None, :] * negA[None, :, :]).astype(dA_ref.dtype)
        dtx_ref[...] = dt * x_conv
    else:
        # conservative fallback: rolled loop (no Python unroll, no 3-D broadcast)
        dtx_ref[...] = dt                                   # temporarily hold dt rows

        def hoist_step(l, carry):
            dA_ref[l] = jnp.exp(dtx_ref[pl.ds(l, 1), :] * negA).astype(dA_ref.dtype)
            return carry

        lax.fori_loop(0, Lc, hoist_step, 0, unroll=min(8, Lc))
        dtx_ref[...] = dtx_ref[...] * x_conv

    # ---- sequential selective scan (dB*x formed on the fly; readout on VPU/XLU)
    lane_idx = lax.broadcasted_iota(jnp.int32, (2 * d_state, Lc), 1)

    def scan_step(l, h):
        # extract column l of bc_t as a (2*d_state, 1) vector via masked lane-reduce
        col = jnp.sum(jnp.where(lane_idx == l, bc_t, 0.0), axis=1, keepdims=True)
        b_col = col[0:d_state, :]                           # (d_state, 1)
        c_col = col[d_state:2 * d_state, :]                 # (d_state, 1)
        h = dA_ref[l].astype(jnp.float32) * h + b_col * dtx_ref[pl.ds(l, 1), :]
        # C·h readout: VPU multiply + XLU sublane reduce (no f32 MXU on the chain)
        y_ref[pl.ds(l, 1), :] = jnp.sum(c_col * h, axis=0, keepdims=True)
        return h

    if Lc <= 16:
        unroll = True
    else:
        unroll = 2 if d_inner > 1024 else 4                 # limit vreg pressure of h
    h_ref[...] = lax.fori_loop(0, Lc, scan_step, h_ref[...], unroll=unroll)

    # ---- D skip, gate, out_proj ---------------------------------------------
    y = y_ref[...] + x_conv * dskip_ref[...]
    y = y * _silu(z)
    out = jnp.dot(y.astype(cdt), outw_ref[...],
                  preferred_element_type=jnp.float32)       # (Lc, D)
    out_ref[0] = out.astype(out_ref.dtype)


# ----------------------------------------------------------------------------
# Chunk / VMEM planning
# ----------------------------------------------------------------------------
def _plan_chunk(*, L, D, d_state, d_conv, d_inner, act_bytes, dA_bytes,
                w_nbytes, has_residual, l_chunk):
    cap = 64 * 1024 * 1024          # v7x per-TC floor; conservative everywhere
    try:
        info = pltpu.get_tpu_info()
        cap = int(getattr(info, "vmem_capacity_bytes", cap))
    except Exception:
        pass
    budget = int(cap * 0.8)

    def usage(lc):
        scratch = (d_state * d_inner * 4 +
                   (lc + d_conv - 1) * d_inner * 4 +
                   lc * d_state * d_inner * dA_bytes +     # dA (dominant scratch)
                   2 * lc * d_inner * 4)                   # dtx + y
        acts_in = (2 if has_residual else 1) * lc * D * act_bytes * 2
        acts_out = 2 * lc * D * act_bytes * 2
        live = 8 * lc * d_inner * 4                        # xz/z/x_conv value headroom
        return scratch + acts_in + acts_out + live + 2 * w_nbytes

    if l_chunk is not None:
        cands = [l_chunk]
    else:
        cands = [c for c in (256, 128, 64, 32, 16, 8) if L % c == 0 and c >= d_conv]
        if not cands:
            cands = [L]
    pick = None
    for c in sorted(cands, reverse=True):
        if usage(c) <= budget:
            pick = c
            break
    if pick is None:
        pick = min(cands)

    vmem_limit = max(32 << 20, int(usage(pick) * 1.3) + (4 << 20))
    vmem_limit = min(vmem_limit, int(cap * 0.92))
    return pick, vmem_limit


# ----------------------------------------------------------------------------
# Wrapper
# ----------------------------------------------------------------------------
def block_forward(params, hidden_states, residual=None, l_chunk=None,
                  dA_dtype=jnp.float32, eps=1e-5):
    """Matches Block.forward (fused_add_norm=False): returns (mixer_out, residual).

    dA_dtype=jnp.bfloat16 halves the largest scratch buffer (recommended on v6e/v7x,
    keep float32 on v5e or when exact-ish state precision is required)."""
    B, L, D = hidden_states.shape
    d_conv, d_inner = params["conv_w"].shape
    d_state = params["bc_w"].shape[0] // 2

    if l_chunk is not None:
        assert L % l_chunk == 0, "seqlen must be a multiple of l_chunk"
        assert l_chunk >= d_conv, "l_chunk must cover the conv receptive field"
    assert L >= d_conv

    # A = -exp(A_log) is input independent -> hoisted out of the kernel.
    negA = -jnp.exp(params["A_log_T"])                      # (d_state, d_inner)

    weights = [
        params["norm_w"], params["norm_b"], params["in_w"],
        params["conv_w"], params["conv_b"],
        params["xdt_w"], params["bc_w"],
        params["dt_w"], params["dt_b"],
        negA, params["D"], params["out_w"],
    ]
    w_nbytes = sum(int(w.size) * jnp.dtype(w.dtype).itemsize for w in weights)

    l_chunk, vmem_limit = _plan_chunk(
        L=L, D=D, d_state=d_state, d_conv=d_conv, d_inner=d_inner,
        act_bytes=jnp.dtype(hidden_states.dtype).itemsize,
        dA_bytes=jnp.dtype(dA_dtype).itemsize,
        w_nbytes=w_nbytes, has_residual=residual is not None, l_chunk=l_chunk)
    nc = L // l_chunk

    act_spec = pl.BlockSpec((1, l_chunk, D), lambda b, c: (b, c, 0))
    out_dtype = hidden_states.dtype
    inputs = [hidden_states]
    if residual is not None:
        inputs.append(residual)
    inputs += weights

    def build(fast):
        def w_spec(w):
            if fast:
                # constant index map -> one VMEM buffer is enough
                return pl.BlockSpec(w.shape, lambda b, c: (0, 0),
                                    pipeline_mode=pl.Buffered(1))
            return pl.BlockSpec(w.shape, lambda b, c: (0, 0))

        in_specs = [act_spec]
        if residual is not None:
            in_specs.append(act_spec)
        in_specs += [w_spec(w) for w in weights]

        kernel = functools.partial(_block_kernel, eps=eps,
                                   has_residual=residual is not None,
                                   vectorized_hoist=fast)

        grid_spec = pltpu.PrefetchScalarGridSpec(
            num_scalar_prefetch=0,
            grid=(B, nc),
            in_specs=in_specs,
            out_specs=(act_spec, act_spec),
            scratch_shapes=[
                pltpu.VMEM((d_state, d_inner), jnp.float32),               # h carry
                pltpu.VMEM((l_chunk + d_conv - 1, d_inner), jnp.float32),  # conv window
                pltpu.VMEM((l_chunk, d_state, d_inner), dA_dtype),         # dA
                pltpu.VMEM((l_chunk, d_inner), jnp.float32),               # dt*x
                pltpu.VMEM((l_chunk, d_inner), jnp.float32),               # y
            ],
        )
        return pl.pallas_call(
            kernel,
            grid_spec=grid_spec,
            out_shape=(jax.ShapeDtypeStruct((B, L, D), out_dtype),
                       jax.ShapeDtypeStruct((B, L, D), out_dtype)),
            compiler_params=pltpu.CompilerParams(
                dimension_semantics=("parallel", "arbitrary"),
                vmem_limit_bytes=vmem_limit),
        )

    try:
        return build(True)(*inputs)
    except Exception:
        # Conservative fallback (double-buffered weights, rolled dA hoist) if the
        # fast build fails to lower on this jax/libtpu version.
        return build(False)(*inputs)


# ----------------------------------------------------------------------------
# Parameters (weights pre-transposed to plain (K, N) layouts; matmul wts bf16)
# ----------------------------------------------------------------------------
def init_block_params(key, d_model, d_state=16, d_conv=4, expand=2,
                      matmul_dtype=jnp.bfloat16):
    d_inner = expand * d_model
    dt_rank = math.ceil(d_model / 16)
    ks = jax.random.split(key, 8)

    def uniform(k, shape, fan_in):
        bound = 1.0 / math.sqrt(fan_in)
        return jax.random.uniform(k, shape, jnp.float32, -bound, bound)

    in_proj_w = uniform(ks[0], (2 * d_inner, d_model), d_model)
    conv_w = uniform(ks[1], (d_inner, d_conv), d_conv)
    conv_b = uniform(ks[2], (d_inner,), d_conv)
    x_proj_w = uniform(ks[3], (dt_rank + 2 * d_state, d_inner), d_inner)
    dt_init_std = dt_rank ** -0.5
    dt_w = jax.random.uniform(ks[4], (d_inner, dt_rank), jnp.float32,
                              -dt_init_std, dt_init_std)
    dt_min, dt_max = 1e-3, 1e-1
    dt = jnp.exp(jax.random.uniform(ks[5], (d_inner,), jnp.float32)
                 * (math.log(dt_max) - math.log(dt_min)) + math.log(dt_min))
    dt = jnp.clip(dt, 1e-4, None)
    dt_b = dt + jnp.log(-jnp.expm1(-dt))                    # inverse softplus
    A_log = jnp.log(jnp.tile(jnp.arange(1, d_state + 1, dtype=jnp.float32)[None, :],
                             (d_inner, 1)))                 # (d_inner, d_state)
    D_param = jnp.ones((d_inner,), jnp.float32)
    out_proj_w = uniform(ks[6], (d_model, d_inner), d_inner)

    md = matmul_dtype
    return {
        "norm_w": jnp.ones((1, d_model), jnp.float32),
        "norm_b": jnp.zeros((1, d_model), jnp.float32),
        "in_w": in_proj_w.T.astype(md),                     # (D, 2*d_inner) [x|z]
        "conv_w": conv_w.T,                                 # (d_conv, d_inner)
        "conv_b": conv_b.reshape(1, d_inner),
        "xdt_w": x_proj_w[:dt_rank].T.astype(md),           # (d_inner, dt_rank)
        "bc_w": x_proj_w[dt_rank:dt_rank + 2 * d_state].astype(md),  # (2*d_state, d_inner) [B|C]
        "dt_w": dt_w.T.astype(md),                          # (dt_rank, d_inner)
        "dt_b": dt_b.reshape(1, d_inner),
        "A_log_T": A_log.T,                                 # (d_state, d_inner)
        "D": D_param.reshape(1, d_inner),
        "out_w": out_proj_w.T.astype(md),                   # (d_inner, D)
    }


# ----------------------------------------------------------------------------
# Pure-JAX reference (mirrors the PyTorch Block forward with the same dtypes)
# ----------------------------------------------------------------------------
def block_forward_ref(params, hidden, residual=None):
    f32 = jnp.float32
    cdt = params["in_w"].dtype
    d_conv, d_inner = params["conv_w"].shape
    d_state = params["bc_w"].shape[0] // 2

    res = hidden.astype(f32) + (residual.astype(f32) if residual is not None else 0.0)
    mean = jnp.mean(res, -1, keepdims=True)
    xc = res - mean
    var = jnp.mean(xc * xc, -1, keepdims=True)
    normed = xc * lax.rsqrt(var + 1e-5) * params["norm_w"][0] + params["norm_b"][0]

    xz = jnp.einsum("bld,de->ble", normed.astype(cdt), params["in_w"],
                    preferred_element_type=f32)
    x, z = xz[..., :d_inner], xz[..., d_inner:]

    Bsz, L, _ = x.shape
    xp = jnp.pad(x, ((0, 0), (d_conv - 1, 0), (0, 0)))
    conv = sum(xp[:, k:k + L, :] * params["conv_w"][k][None, None, :]
               for k in range(d_conv))
    x_conv = _silu(conv + params["conv_b"][0])

    dt_low = jnp.einsum("bld,dr->blr", x_conv.astype(cdt), params["xdt_w"],
                        preferred_element_type=f32)
    B_ssm = jnp.einsum("sd,bld->bls", params["bc_w"][:d_state], x_conv.astype(cdt),
                       preferred_element_type=f32)
    C_ssm = jnp.einsum("sd,bld->bls", params["bc_w"][d_state:], x_conv.astype(cdt),
                       preferred_element_type=f32)
    dt = _softplus(jnp.einsum("blr,rd->bld", dt_low.astype(cdt), params["dt_w"],
                              preferred_element_type=f32) + params["dt_b"][0])

    A = -jnp.exp(params["A_log_T"])                         # (d_state, d_inner)
    h = jnp.zeros((Bsz, d_state, d_inner), f32)
    ys = []
    for l in range(L):
        dA = jnp.exp(dt[:, l, None, :] * A[None])
        dBx = B_ssm[:, l, :, None] * (dt[:, l, :] * x_conv[:, l, :])[:, None, :]
        h = dA * h + dBx
        y_l = jnp.einsum("bsd,bs->bd", h, C_ssm[:, l, :]) + x_conv[:, l, :] * params["D"][0]
        ys.append(y_l)
    y = jnp.stack(ys, axis=1)
    y = y * _silu(z)
    out = jnp.einsum("bld,de->ble", y.astype(cdt), params["out_w"],
                     preferred_element_type=f32)
    return out.astype(hidden.dtype), res.astype(hidden.dtype)


if __name__ == "__main__":
    B, L, D = 2, 16, 128
    key = jax.random.PRNGKey(0)
    k_h, k_r, k_p = jax.random.split(key, 3)
    hidden = jax.random.normal(k_h, (B, L, D), jnp.float32)
    residual = jax.random.normal(k_r, (B, L, D), jnp.float32)
    params = init_block_params(k_p, D)

    # with residual (generic block); l_chunk=8 exercises multi-chunk state carry
    ref_out, ref_res = block_forward_ref(params, hidden, residual)
    hs_out, res_out = block_forward(params, hidden, residual, l_chunk=8)
    jax.block_until_ready((hs_out, res_out))
    assert hs_out.shape == (B, L, D) and res_out.shape == (B, L, D)
    assert jnp.allclose(res_out, ref_res, atol=1e-5, rtol=1e-5), "residual mismatch"
    err = float(jnp.max(jnp.abs(hs_out - ref_out)))
    assert jnp.allclose(hs_out, ref_out, atol=1e-2, rtol=1e-2), f"mixer mismatch {err}"

    # auto chunk selection (single chunk here)
    hs_auto, res_auto = block_forward(params, hidden, residual)
    jax.block_until_ready((hs_auto, res_auto))
    assert jnp.allclose(hs_auto, ref_out, atol=1e-2, rtol=1e-2), "mixer mismatch (auto)"
    assert jnp.allclose(res_auto, ref_res, atol=1e-5, rtol=1e-5), "residual mismatch (auto)"

    # without residual (first block)
    ref_out0, ref_res0 = block_forward_ref(params, hidden, None)
    hs0, res0 = block_forward(params, hidden, None, l_chunk=8)
    jax.block_until_ready((hs0, res0))
    assert jnp.allclose(res0, ref_res0, atol=1e-5, rtol=1e-5), "residual mismatch (None)"
    assert jnp.allclose(hs0, ref_out0, atol=1e-2, rtol=1e-2), "mixer mismatch (None)"

    print("KERNEL_OK")
</pallas_src>

<mosaic_0001>
module attributes {stable_mosaic.version = 11 : i64} {
  func.func @_block_kernel(%arg0: i32, %arg1: i32, %arg2: memref<1x8x128xf32, #tpu.memory_space<vmem>>, %arg3: memref<1x8x128xf32, #tpu.memory_space<vmem>>, %arg4: memref<1x128xf32, #tpu.memory_space<vmem>>, %arg5: memref<1x128xf32, #tpu.memory_space<vmem>>, %arg6: memref<128x512xbf16, #tpu.memory_space<vmem>>, %arg7: memref<4x256xf32, #tpu.memory_space<vmem>>, %arg8: memref<1x256xf32, #tpu.memory_space<vmem>>, %arg9: memref<256x8xbf16, #tpu.memory_space<vmem>>, %arg10: memref<32x256xbf16, #tpu.memory_space<vmem>>, %arg11: memref<8x256xbf16, #tpu.memory_space<vmem>>, %arg12: memref<1x256xf32, #tpu.memory_space<vmem>>, %arg13: memref<16x256xf32, #tpu.memory_space<vmem>>, %arg14: memref<1x256xf32, #tpu.memory_space<vmem>>, %arg15: memref<256x128xbf16, #tpu.memory_space<vmem>>, %arg16: memref<1x8x128xf32, #tpu.memory_space<vmem>>, %arg17: memref<1x8x128xf32, #tpu.memory_space<vmem>>, %arg18: memref<16x256xf32, #tpu.memory_space<vmem>>, %arg19: memref<11x256xf32, #tpu.memory_space<vmem>>, %arg20: memref<8x16x256xf32, #tpu.memory_space<vmem>>, %arg21: memref<8x256xf32, #tpu.memory_space<vmem>>, %arg22: memref<8x256xf32, #tpu.memory_space<vmem>>) attributes {dimension_semantics = [#tpu.dimension_semantics<parallel>, #tpu.dimension_semantics<arbitrary>], iteration_bounds = array<i64: 2, 2>, scalar_prefetch = 0 : i64, scratch_operands = 5 : i64, tpu.core_type = #tpu.core_type<tc>, window_params = [{transform_indices = @transform_0, window_bounds = array<i64: 1, 8, 128>}, {transform_indices = @transform_1, window_bounds = array<i64: 1, 8, 128>}, {pipeline_mode = #tpu.pipeline_mode<synchronous>, transform_indices = @transform_2, window_bounds = array<i64: 1, 128>}, {pipeline_mode = #tpu.pipeline_mode<synchronous>, transform_indices = @transform_3, window_bounds = array<i64: 1, 128>}, {pipeline_mode = #tpu.pipeline_mode<synchronous>, transform_indices = @transform_4, window_bounds = array<i64: 128, 512>}, {pipeline_mode = #tpu.pipeline_mode<synchronous>, transform_indices = @transform_5, window_bounds = array<i64: 4, 256>}, {pipeline_mode = #tpu.pipeline_mode<synchronous>, transform_indices = @transform_6, window_bounds = array<i64: 1, 256>}, {pipeline_mode = #tpu.pipeline_mode<synchronous>, transform_indices = @transform_7, window_bounds = array<i64: 256, 8>}, {pipeline_mode = #tpu.pipeline_mode<synchronous>, transform_indices = @transform_8, window_bounds = array<i64: 32, 256>}, {pipeline_mode = #tpu.pipeline_mode<synchronous>, transform_indices = @transform_9, window_bounds = array<i64: 8, 256>}, {pipeline_mode = #tpu.pipeline_mode<synchronous>, transform_indices = @transform_10, window_bounds = array<i64: 1, 256>}, {pipeline_mode = #tpu.pipeline_mode<synchronous>, transform_indices = @transform_11, window_bounds = array<i64: 16, 256>}, {pipeline_mode = #tpu.pipeline_mode<synchronous>, transform_indices = @transform_12, window_bounds = array<i64: 1, 256>}, {pipeline_mode = #tpu.pipeline_mode<synchronous>, transform_indices = @transform_13, window_bounds = array<i64: 256, 128>}, {transform_indices = @transform_14, window_bounds = array<i64: 1, 8, 128>}, {transform_indices = @transform_15, window_bounds = array<i64: 1, 8, 128>}]} {
    %c0_i32 = arith.constant 0 : i32
    %0 = arith.cmpi eq, %arg1, %c0_i32 : i32
    %1 = arith.extui %0 : i1 to i32
    %c0_i32_0 = arith.constant 0 : i32
    %2 = arith.cmpi ne, %1, %c0_i32_0 : i32
    scf.if %2 {
      %cst_130 = arith.constant 0.000000e+00 : f32
      %315 = vector.broadcast %cst_130 : f32 to vector<16x256xf32>
      %c0_131 = arith.constant 0 : index
      %c0_132 = arith.constant 0 : index
      %316 = vector.load %arg18[%c0_131, %c0_132] : memref<16x256xf32, #tpu.memory_space<vmem>>, vector<16x256xf32>
      tpu.vector_store %arg18[%c0_131, %c0_132], %315 {strides = array<i32>} : memref<16x256xf32, #tpu.memory_space<vmem>>, vector<16x256xf32>,
      %cst_133 = arith.constant 0.000000e+00 : f32
      %317 = vector.broadcast %cst_133 : f32 to vector<3x256xf32>
      %c0_134 = arith.constant 0 : index
      %c0_135 = arith.constant 0 : index
      %318 = vector.load %arg19[%c0_134, %c0_135] : memref<11x256xf32, #tpu.memory_space<vmem>>, vector<3x256xf32>
      tpu.vector_store %arg19[%c0_134, %c0_135], %317 {strides = array<i32>} : memref<11x256xf32, #tpu.memory_space<vmem>>, vector<3x256xf32>,
    } else {
    }
    %c0 = arith.constant 0 : index
    %c0_1 = arith.constant 0 : index
    %c0_2 = arith.constant 0 : index
    %3 = vector.load %arg2[%c0, %c0_1, %c0_2] : memref<1x8x128xf32, #tpu.memory_space<vmem>>, vector<1x8x128xf32>
    %4 = vector.shape_cast %3 : vector<1x8x128xf32> to vector<8x128xf32>
    %c0_3 = arith.constant 0 : index
    %c0_4 = arith.constant 0 : index
    %c0_5 = arith.constant 0 : index
    %5 = vector.load %arg3[%c0_3, %c0_4, %c0_5] : memref<1x8x128xf32, #tpu.memory_space<vmem>>, vector<1x8x128xf32>
    %6 = vector.shape_cast %5 : vector<1x8x128xf32> to vector<8x128xf32>
    %7 = arith.addf %4, %6 : vector<8x128xf32>
    %c0_6 = arith.constant 0 : index
    %c0_7 = arith.constant 0 : index
    %c0_8 = arith.constant 0 : index
    %8 = vector.load %arg17[%c0_6, %c0_7, %c0_8] : memref<1x8x128xf32, #tpu.memory_space<vmem>>, vector<1x8x128xf32>
    %9 = vector.shape_cast %8 : vector<1x8x128xf32> to vector<8x128xf32>
    %10 = vector.shape_cast %7 : vector<8x128xf32> to vector<1x8x128xf32>
    tpu.vector_store %arg17[%c0_6, %c0_7, %c0_8], %10 {strides = array<i32>} : memref<1x8x128xf32, #tpu.memory_space<vmem>>, vector<1x8x128xf32>,
    %cst = arith.constant dense<0.000000e+00> : vector<8xf32>
    %11 = vector.multi_reduction <add>, %7, %cst [1] : vector<8x128xf32> to vector<8xf32>
    %12 = vector.shape_cast %11 : vector<8xf32> to vector<8x1xf32>
    %cst_9 = arith.constant 1.280000e+02 : f32
    %13 = vector.broadcast %cst_9 : f32 to vector<8x1xf32>
    %14 = arith.divf %12, %13 : vector<8x1xf32>
    %15 = vector.broadcast %14 : vector<8x1xf32> to vector<8x128xf32>
    %16 = arith.subf %7, %15 : vector<8x128xf32>
    %17 = arith.mulf %16, %16 : vector<8x128xf32>
    %cst_10 = arith.constant dense<0.000000e+00> : vector<8xf32>
    %18 = vector.multi_reduction <add>, %17, %cst_10 [1] : vector<8x128xf32> to vector<8xf32>
    %19 = vector.shape_cast %18 : vector<8xf32> to vector<8x1xf32>
    %cst_11 = arith.constant 1.280000e+02 : f32
    %20 = vector.broadcast %cst_11 : f32 to vector<8x1xf32>
    %21 = arith.divf %19, %20 : vector<8x1xf32>
    %cst_12 = arith.constant 9.99999974E-6 : f32
    %22 = vector.broadcast %cst_12 : f32 to vector<8x1xf32>
    %23 = arith.addf %21, %22 : vector<8x1xf32>
    %24 = math.rsqrt %23 : vector<8x1xf32>
    %25 = vector.broadcast %24 : vector<8x1xf32> to vector<8x128xf32>
    %26 = arith.mulf %16, %25 : vector<8x128xf32>
    %c0_13 = arith.constant 0 : index
    %c0_14 = arith.constant 0 : index
    %27 = vector.load %arg4[%c0_13, %c0_14] : memref<1x128xf32, #tpu.memory_space<vmem>>, vector<1x128xf32>
    %28 = vector.broadcast %27 : vector<1x128xf32> to vector<8x128xf32>
    %29 = arith.mulf %26, %28 : vector<8x128xf32>
    %c0_15 = arith.constant 0 : index
    %c0_16 = arith.constant 0 : index
    %30 = vector.load %arg5[%c0_15, %c0_16] : memref<1x128xf32, #tpu.memory_space<vmem>>, vector<1x128xf32>
    %31 = vector.broadcast %30 : vector<1x128xf32> to vector<8x128xf32>
    %32 = arith.addf %29, %31 : vector<8x128xf32>
    %33 = arith.truncf %32 : vector<8x128xf32> to vector<8x128xbf16>
    %c0_17 = arith.constant 0 : index
    %c0_18 = arith.constant 0 : index
    %34 = vector.load %arg6[%c0_17, %c0_18] : memref<128x512xbf16, #tpu.memory_space<vmem>>, vector<128x512xbf16>
    %cst_19 = arith.constant dense<0.000000e+00> : vector<8x512xf32>
    %35 = tpu.matmul %33, %34, %cst_19 {dimension_numbers = #tpu.dot_dimension_numbers<[1], [0], [0], [1], [0, 0, 1, 1], [], []>} : vector<8x128xbf16>, vector<128x512xbf16>, vector<8x512xf32> -> vector<8x512xf32>
    %36 = vector.extract_strided_slice %35 {offsets = [0, 0], sizes = [8, 256], strides = [1, 1]} : vector<8x512xf32> to vector<8x256xf32>
    %37 = vector.extract_strided_slice %35 {offsets = [0, 256], sizes = [8, 256], strides = [1, 1]} : vector<8x512xf32> to vector<8x256xf32>
    %c3 = arith.constant 3 : index
    %c0_20 = arith.constant 0 : index
    %38 = vector.load %arg19[%c3, %c0_20] : memref<11x256xf32, #tpu.memory_space<vmem>>, vector<8x256xf32>
    tpu.vector_store %arg19[%c3, %c0_20], %36 {strides = array<i32>} : memref<11x256xf32, #tpu.memory_space<vmem>>, vector<8x256xf32>,
    %c0_21 = arith.constant 0 : index
    %c0_22 = arith.constant 0 : index
    %39 = vector.load %arg19[%c0_21, %c0_22] : memref<11x256xf32, #tpu.memory_space<vmem>>, vector<11x256xf32>
    %40 = vector.extract_strided_slice %39 {offsets = [0, 0], sizes = [8, 256], strides = [1, 1]} : vector<11x256xf32> to vector<8x256xf32>
    %c0_23 = arith.constant 0 : index
    %c0_24 = arith.constant 0 : index
    %41 = vector.load %arg7[%c0_23, %c0_24] : memref<4x256xf32, #tpu.memory_space<vmem>>, vector<1x256xf32>
    %42 = vector.broadcast %41 : vector<1x256xf32> to vector<8x256xf32>
    %43 = arith.mulf %40, %42 : vector<8x256xf32>
    %44 = vector.extract_strided_slice %39 {offsets = [1, 0], sizes = [8, 256], strides = [1, 1]} : vector<11x256xf32> to vector<8x256xf32>
    %c1 = arith.constant 1 : index
    %c0_25 = arith.constant 0 : index
    %45 = vector.load %arg7[%c1, %c0_25] : memref<4x256xf32, #tpu.memory_space<vmem>>, vector<1x256xf32>
    %46 = vector.broadcast %45 : vector<1x256xf32> to vector<8x256xf32>
    %47 = arith.mulf %44, %46 : vector<8x256xf32>
    %48 = arith.addf %43, %47 : vector<8x256xf32>
    %49 = vector.extract_strided_slice %39 {offsets = [2, 0], sizes = [8, 256], strides = [1, 1]} : vector<11x256xf32> to vector<8x256xf32>
    %c2 = arith.constant 2 : index
    %c0_26 = arith.constant 0 : index
    %50 = vector.load %arg7[%c2, %c0_26] : memref<4x256xf32, #tpu.memory_space<vmem>>, vector<1x256xf32>
    %51 = vector.broadcast %50 : vector<1x256xf32> to vector<8x256xf32>
    %52 = arith.mulf %49, %51 : vector<8x256xf32>
    %53 = arith.addf %48, %52 : vector<8x256xf32>
    %54 = vector.extract_strided_slice %39 {offsets = [3, 0], sizes = [8, 256], strides = [1, 1]} : vector<11x256xf32> to vector<8x256xf32>
    %c3_27 = arith.constant 3 : index
    %c0_28 = arith.constant 0 : index
    %55 = vector.load %arg7[%c3_27, %c0_28] : memref<4x256xf32, #tpu.memory_space<vmem>>, vector<1x256xf32>
    %56 = vector.broadcast %55 : vector<1x256xf32> to vector<8x256xf32>
    %57 = arith.mulf %54, %56 : vector<8x256xf32>
    %58 = arith.addf %53, %57 : vector<8x256xf32>
    %c0_29 = arith.constant 0 : index
    %c0_30 = arith.constant 0 : index
    %59 = vector.load %arg8[%c0_29, %c0_30] : memref<1x256xf32, #tpu.memory_space<vmem>>, vector<1x256xf32>
    %60 = vector.broadcast %59 : vector<1x256xf32> to vector<8x256xf32>
    %61 = arith.addf %58, %60 : vector<8x256xf32>
    %cst_31 = arith.constant 0.000000e+00 : f32
    %62 = vector.broadcast %cst_31 : f32 to vector<8x256xf32>
    %63 = arith.subf %62, %61 : vector<8x256xf32>
    %64 = math.exp %63 : vector<8x256xf32>
    %cst_32 = arith.constant 1.000000e+00 : f32
    %65 = vector.broadcast %cst_32 : f32 to vector<8x256xf32>
    %66 = arith.addf %65, %64 : vector<8x256xf32>
    %cst_33 = arith.constant 1.000000e+00 : f32
    %67 = vector.broadcast %cst_33 : f32 to vector<8x256xf32>
    %68 = arith.divf %67, %66 : vector<8x256xf32>
    %69 = arith.mulf %61, %68 : vector<8x256xf32>
    %70 = vector.extract_strided_slice %39 {offsets = [8, 0], sizes = [3, 256], strides = [1, 1]} : vector<11x256xf32> to vector<3x256xf32>
    %c0_34 = arith.constant 0 : index
    %c0_35 = arith.constant 0 : index
    %71 = vector.load %arg19[%c0_34, %c0_35] : memref<11x256xf32, #tpu.memory_space<vmem>>, vector<3x256xf32>
    tpu.vector_store %arg19[%c0_34, %c0_35], %70 {strides = array<i32>} : memref<11x256xf32, #tpu.memory_space<vmem>>, vector<3x256xf32>,
    %72 = arith.truncf %69 : vector<8x256xf32> to vector<8x256xbf16>
    %c0_36 = arith.constant 0 : index
    %c0_37 = arith.constant 0 : index
    %73 = vector.load %arg10[%c0_36, %c0_37] : memref<32x256xbf16, #tpu.memory_space<vmem>>, vector<32x256xbf16>
    %cst_38 = arith.constant dense<0.000000e+00> : vector<32x8xf32>
    %74 = tpu.matmul %73, %72, %cst_38 {dimension_numbers = #tpu.dot_dimension_numbers<[1], [1], [0], [0], [0, 0, 1, 0], [], []>} : vector<32x256xbf16>, vector<8x256xbf16>, vector<32x8xf32> -> vector<32x8xf32>
    %c0_39 = arith.constant 0 : index
    %c0_40 = arith.constant 0 : index
    %75 = vector.load %arg9[%c0_39, %c0_40] : memref<256x8xbf16, #tpu.memory_space<vmem>>, vector<256x8xbf16>
    %cst_41 = arith.constant dense<0.000000e+00> : vector<8x8xf32>
    %76 = tpu.matmul %72, %75, %cst_41 {dimension_numbers = #tpu.dot_dimension_numbers<[1], [0], [0], [1], [0, 0, 1, 1], [], []>} : vector<8x256xbf16>, vector<256x8xbf16>, vector<8x8xf32> -> vector<8x8xf32>
    %77 = arith.truncf %76 : vector<8x8xf32> to vector<8x8xbf16>
    %c0_42 = arith.constant 0 : index
    %c0_43 = arith.constant 0 : index
    %78 = vector.load %arg11[%c0_42, %c0_43] : memref<8x256xbf16, #tpu.memory_space<vmem>>, vector<8x256xbf16>
    %cst_44 = arith.constant dense<0.000000e+00> : vector<8x256xf32>
    %79 = tpu.matmul %77, %78, %cst_44 {dimension_numbers = #tpu.dot_dimension_numbers<[1], [0], [0], [1], [0, 0, 1, 1], [], []>} : vector<8x8xbf16>, vector<8x256xbf16>, vector<8x256xf32> -> vector<8x256xf32>
    %c0_45 = arith.constant 0 : index
    %c0_46 = arith.constant 0 : index
    %80 = vector.load %arg12[%c0_45, %c0_46] : memref<1x256xf32, #tpu.memory_space<vmem>>, vector<1x256xf32>
    %81 = vector.broadcast %80 : vector<1x256xf32> to vector<8x256xf32>
    %82 = arith.addf %79, %81 : vector<8x256xf32>
    %cst_47 = arith.constant 2.000000e+01 : f32
    %83 = vector.broadcast %cst_47 : f32 to vector<8x256xf32>
    %84 = arith.cmpf ogt, %82, %83 : vector<8x256xf32>
    %cst_48 = arith.constant 2.000000e+01 : f32
    %85 = vector.broadcast %cst_48 : f32 to vector<8x256xf32>
    %86 = arith.minimumf %82, %85 : vector<8x256xf32>
    %87 = math.exp %86 : vector<8x256xf32>
    %88 = math.log1p %87 : vector<8x256xf32>
    %89 = arith.select %84, %82, %88 : vector<8x256xi1>, vector<8x256xf32>
    %c0_49 = arith.constant 0 : index
    %c0_50 = arith.constant 0 : index
    %90 = vector.load %arg13[%c0_49, %c0_50] : memref<16x256xf32, #tpu.memory_space<vmem>>, vector<16x256xf32>
    %91 = vector.shape_cast %89 : vector<8x256xf32> to vector<8x1x256xf32>
    %92 = vector.shape_cast %90 : vector<16x256xf32> to vector<1x16x256xf32>
    %93 = vector.broadcast %91 : vector<8x1x256xf32> to vector<8x16x256xf32>
    %94 = vector.broadcast %92 : vector<1x16x256xf32> to vector<8x16x256xf32>
    %95 = arith.mulf %93, %94 : vector<8x16x256xf32>
    %96 = math.exp %95 : vector<8x16x256xf32>
    %c0_51 = arith.constant 0 : index
    %c0_52 = arith.constant 0 : index
    %c0_53 = arith.constant 0 : index
    %97 = vector.load %arg20[%c0_51, %c0_52, %c0_53] : memref<8x16x256xf32, #tpu.memory_space<vmem>>, vector<8x16x256xf32>
    tpu.vector_store %arg20[%c0_51, %c0_52, %c0_53], %96 {strides = array<i32>} : memref<8x16x256xf32, #tpu.memory_space<vmem>>, vector<8x16x256xf32>,
    %98 = arith.mulf %89, %69 : vector<8x256xf32>
    %c0_54 = arith.constant 0 : index
    %c0_55 = arith.constant 0 : index
    %99 = vector.load %arg21[%c0_54, %c0_55] : memref<8x256xf32, #tpu.memory_space<vmem>>, vector<8x256xf32>
    tpu.vector_store %arg21[%c0_54, %c0_55], %98 {strides = array<i32>} : memref<8x256xf32, #tpu.memory_space<vmem>>, vector<8x256xf32>,
    %100 = tpu.iota {dimensions = array<i32: 1>} : vector<32x8xi32>
    %c0_56 = arith.constant 0 : index
    %c0_57 = arith.constant 0 : index
    %101 = vector.load %arg18[%c0_56, %c0_57] : memref<16x256xf32, #tpu.memory_space<vmem>>, vector<16x256xf32>
    %c0_i32_58 = arith.constant 0 : i32
    %102 = vector.broadcast %c0_i32_58 : i32 to vector<32x8xi32>
    %103 = arith.cmpi eq, %100, %102 : vector<32x8xi32>
    %cst_59 = arith.constant 0.000000e+00 : f32
    %104 = vector.broadcast %cst_59 : f32 to vector<32x8xf32>
    %105 = arith.select %103, %74, %104 : vector<32x8xi1>, vector<32x8xf32>
    %cst_60 = arith.constant dense<0.000000e+00> : vector<32xf32>
    %106 = vector.multi_reduction <add>, %105, %cst_60 [1] : vector<32x8xf32> to vector<32xf32>
    %107 = vector.shape_cast %106 : vector<32xf32> to vector<32x1xf32>
    %108 = vector.extract_strided_slice %107 {offsets = [0, 0], sizes = [16, 1], strides = [1, 1]} : vector<32x1xf32> to vector<16x1xf32>
    %109 = vector.extract_strided_slice %107 {offsets = [16, 0], sizes = [16, 1], strides = [1, 1]} : vector<32x1xf32> to vector<16x1xf32>
    %110 = arith.index_cast %c0_i32_58 : i32 to index
    %c0_61 = arith.constant 0 : index
    %c0_62 = arith.constant 0 : index
    %111 = vector.load %arg20[%110, %c0_61, %c0_62] : memref<8x16x256xf32, #tpu.memory_space<vmem>>, vector<1x16x256xf32>
    %112 = vector.shape_cast %111 : vector<1x16x256xf32> to vector<16x256xf32>
    %113 = arith.mulf %112, %101 : vector<16x256xf32>
    %114 = arith.index_cast %c0_i32_58 : i32 to index
    %c0_63 = arith.constant 0 : index
    %115 = vector.load %arg21[%114, %c0_63] : memref<8x256xf32, #tpu.memory_space<vmem>>, vector<1x256xf32>
    %116 = vector.broadcast %108 : vector<16x1xf32> to vector<16x256xf32>
    %117 = vector.broadcast %115 : vector<1x256xf32> to vector<16x256xf32>
    %118 = arith.mulf %116, %117 : vector<16x256xf32>
    %119 = arith.addf %113, %118 : vector<16x256xf32>
    %120 = vector.broadcast %109 : vector<16x1xf32> to vector<16x256xf32>
    %121 = arith.mulf %120, %119 : vector<16x256xf32>
    %cst_64 = arith.constant dense<0.000000e+00> : vector<256xf32>
    %122 = vector.multi_reduction <add>, %121, %cst_64 [0] : vector<16x256xf32> to vector<256xf32>
    %123 = vector.shape_cast %122 : vector<256xf32> to vector<1x256xf32>
    %124 = arith.index_cast %c0_i32_58 : i32 to index
    %c0_65 = arith.constant 0 : index
    %125 = vector.load %arg22[%124, %c0_65] : memref<8x256xf32, #tpu.memory_space<vmem>>, vector<1x256xf32>
    tpu.vector_store %arg22[%124, %c0_65], %123 {strides = array<i32>} : memref<8x256xf32, #tpu.memory_space<vmem>>, vector<1x256xf32>,
    %c1_i32 = arith.constant 1 : i32
    %126 = vector.broadcast %c1_i32 : i32 to vector<32x8xi32>
    %127 = arith.cmpi eq, %100, %126 : vector<32x8xi32>
    %cst_66 = arith.constant 0.000000e+00 : f32
    %128 = vector.broadcast %cst_66 : f32 to vector<32x8xf32>
    %129 = arith.select %127, %74, %128 : vector<32x8xi1>, vector<32x8xf32>
    %cst_67 = arith.constant dense<0.000000e+00> : vector<32xf32>
    %130 = vector.multi_reduction <add>, %129, %cst_67 [1] : vector<32x8xf32> to vector<32xf32>
    %131 = vector.shape_cast %130 : vector<32xf32> to vector<32x1xf32>
    %132 = vector.extract_strided_slice %131 {offsets = [0, 0], sizes = [16, 1], strides = [1, 1]} : vector<32x1xf32> to vector<16x1xf32>
    %133 = vector.extract_strided_slice %131 {offsets = [16, 0], sizes = [16, 1], strides = [1, 1]} : vector<32x1xf32> to vector<16x1xf32>
    %134 = arith.index_cast %c1_i32 : i32 to index
    %c0_68 = arith.constant 0 : index
    %c0_69 = arith.constant 0 : index
    %135 = vector.load %arg20[%134, %c0_68, %c0_69] : memref<8x16x256xf32, #tpu.memory_space<vmem>>, vector<1x16x256xf32>
    %136 = vector.shape_cast %135 : vector<1x16x256xf32> to vector<16x256xf32>
    %137 = arith.mulf %136, %119 : vector<16x256xf32>
    %138 = arith.index_cast %c1_i32 : i32 to index
    %c0_70 = arith.constant 0 : index
    %139 = vector.load %arg21[%138, %c0_70] : memref<8x256xf32, #tpu.memory_space<vmem>>, vector<1x256xf32>
    %140 = vector.broadcast %132 : vector<16x1xf32> to vector<16x256xf32>
    %141 = vector.broadcast %139 : vector<1x256xf32> to vector<16x256xf32>
    %142 = arith.mulf %140, %141 : vector<16x256xf32>
    %143 = arith.addf %137, %142 : vector<16x256xf32>
    %144 = vector.broadcast %133 : vector<16x1xf32> to vector<16x256xf32>
    %145 = arith.mulf %144, %143 : vector<16x256xf32>
    %cst_71 = arith.constant dense<0.000000e+00> : vector<256xf32>
    %146 = vector.multi_reduction <add>, %145, %cst_71 [0] : vector<16x256xf32> to vector<256xf32>
    %147 = vector.shape_cast %146 : vector<256xf32> to vector<1x256xf32>
    %148 = arith.index_cast %c1_i32 : i32 to index
    %c0_72 = arith.constant 0 : index
    %149 = vector.load %arg22[%148, %c0_72] : memref<8x256xf32, #tpu.memory_space<vmem>>, vector<1x256xf32>
    tpu.vector_store %arg22[%148, %c0_72], %147 {strides = array<i32>} : memref<8x256xf32, #tpu.memory_space<vmem>>, vector<1x256xf32>,
    %c2_i32 = arith.constant 2 : i32
    %150 = vector.broadcast %c2_i32 : i32 to vector<32x8xi32>
    %151 = arith.cmpi eq, %100, %150 : vector<32x8xi32>
    %cst_73 = arith.constant 0.000000e+00 : f32
    %152 = vector.broadcast %cst_73 : f32 to vector<32x8xf32>
    %153 = arith.select %151, %74, %152 : vector<32x8xi1>, vector<32x8xf32>
    %cst_74 = arith.constant dense<0.000000e+00> : vector<32xf32>
    %154 = vector.multi_reduction <add>, %153, %cst_74 [1] : vector<32x8xf32> to vector<32xf32>
    %155 = vector.shape_cast %154 : vector<32xf32> to vector<32x1xf32>
    %156 = vector.extract_strided_slice %155 {offsets = [0, 0], sizes = [16, 1], strides = [1, 1]} : vector<32x1xf32> to vector<16x1xf32>
    %157 = vector.extract_strided_slice %155 {offsets = [16, 0], sizes = [16, 1], strides = [1, 1]} : vector<32x1xf32> to vector<16x1xf32>
    %158 = arith.index_cast %c2_i32 : i32 to index
    %c0_75 = arith.constant 0 : index
    %c0_76 = arith.constant 0 : index
    %159 = vector.load %arg20[%158, %c0_75, %c0_76] : memref<8x16x256xf32, #tpu.memory_space<vmem>>, vector<1x16x256xf32>
    %160 = vector.shape_cast %159 : vector<1x16x256xf32> to vector<16x256xf32>
    %161 = arith.mulf %160, %143 : vector<16x256xf32>
    %162 = arith.index_cast %c2_i32 : i32 to index
    %c0_77 = arith.constant 0 : index
    %163 = vector.load %arg21[%162, %c0_77] : memref<8x256xf32, #tpu.memory_space<vmem>>, vector<1x256xf32>
    %164 = vector.broadcast %156 : vector<16x1xf32> to vector<16x256xf32>
    %165 = vector.broadcast %163 : vector<1x256xf32> to vector<16x256xf32>
    %166 = arith.mulf %164, %165 : vector<16x256xf32>
    %167 = arith.addf %161, %166 : vector<16x256xf32>
    %168 = vector.broadcast %157 : vector<16x1xf32> to vector<16x256xf32>
    %169 = arith.mulf %168, %167 : vector<16x256xf32>
    %cst_78 = arith.constant dense<0.000000e+00> : vector<256xf32>
    %170 = vector.multi_reduction <add>, %169, %cst_78 [0] : vector<16x256xf32> to vector<256xf32>
    %171 = vector.shape_cast %170 : vector<256xf32> to vector<1x256xf32>
    %172 = arith.index_cast %c2_i32 : i32 to index
    %c0_79 = arith.constant 0 : index
    %173 = vector.load %arg22[%172, %c0_79] : memref<8x256xf32, #tpu.memory_space<vmem>>, vector<1x256xf32>
    tpu.vector_store %arg22[%172, %c0_79], %171 {strides = array<i32>} : memref<8x256xf32, #tpu.memory_space<vmem>>, vector<1x256xf32>,
    %c3_i32 = arith.constant 3 : i32
    %174 = vector.broadcast %c3_i32 : i32 to vector<32x8xi32>
    %175 = arith.cmpi eq, %100, %174 : vector<32x8xi32>
    %cst_80 = arith.constant 0.000000e+00 : f32
    %176 = vector.broadcast %cst_80 : f32 to vector<32x8xf32>
    %177 = arith.select %175, %74, %176 : vector<32x8xi1>, vector<32x8xf32>
    %cst_81 = arith.constant dense<0.000000e+00> : vector<32xf32>
    %178 = vector.multi_reduction <add>, %177, %cst_81 [1] : vector<32x8xf32> to vector<32xf32>
    %179 = vector.shape_cast %178 : vector<32xf32> to vector<32x1xf32>
    %180 = vector.extract_strided_slice %179 {offsets = [0, 0], sizes = [16, 1], strides = [1, 1]} : vector<32x1xf32> to vector<16x1xf32>
    %181 = vector.extract_strided_slice %179 {offsets = [16, 0], sizes = [16, 1], strides = [1, 1]} : vector<32x1xf32> to vector<16x1xf32>
    %182 = arith.index_cast %c3_i32 : i32 to index
    %c0_82 = arith.constant 0 : index
    %c0_83 = arith.constant 0 : index
    %183 = vector.load %arg20[%182, %c0_82, %c0_83] : memref<8x16x256xf32, #tpu.memory_space<vmem>>, vector<1x16x256xf32>
    %184 = vector.shape_cast %183 : vector<1x16x256xf32> to vector<16x256xf32>
    %185 = arith.mulf %184, %167 : vector<16x256xf32>
    %186 = arith.index_cast %c3_i32 : i32 to index
    %c0_84 = arith.constant 0 : index
    %187 = vector.load %arg21[%186, %c0_84] : memref<8x256xf32, #tpu.memory_space<vmem>>, vector<1x256xf32>
    %188 = vector.broadcast %180 : vector<16x1xf32> to vector<16x256xf32>
    %189 = vector.broadcast %187 : vector<1x256xf32> to vector<16x256xf32>
    %190 = arith.mulf %188, %189 : vector<16x256xf32>
    %191 = arith.addf %185, %190 : vector<16x256xf32>
    %192 = vector.broadcast %181 : vector<16x1xf32> to vector<16x256xf32>
    %193 = arith.mulf %192, %191 : vector<16x256xf32>
    %cst_85 = arith.constant dense<0.000000e+00> : vector<256xf32>
    %194 = vector.multi_reduction <add>, %193, %cst_85 [0] : vector<16x256xf32> to vector<256xf32>
    %195 = vector.shape_cast %194 : vector<256xf32> to vector<1x256xf32>
    %196 = arith.index_cast %c3_i32 : i32 to index
    %c0_86 = arith.constant 0 : index
    %197 = vector.load %arg22[%196, %c0_86] : memref<8x256xf32, #tpu.memory_space<vmem>>, vector<1x256xf32>
    tpu.vector_store %arg22[%196, %c0_86], %195 {strides = array<i32>} : memref<8x256xf32, #tpu.memory_space<vmem>>, vector<1x256xf32>,
    %c4_i32 = arith.constant 4 : i32
    %198 = vector.broadcast %c4_i32 : i32 to vector<32x8xi32>
    %199 = arith.cmpi eq, %100, %198 : vector<32x8xi32>
    %cst_87 = arith.constant 0.000000e+00 : f32
    %200 = vector.broadcast %cst_87 : f32 to vector<32x8xf32>
    %201 = arith.select %199, %74, %200 : vector<32x8xi1>, vector<32x8xf32>
    %cst_88 = arith.constant dense<0.000000e+00> : vector<32xf32>
    %202 = vector.multi_reduction <add>, %201, %cst_88 [1] : vector<32x8xf32> to vector<32xf32>
    %203 = vector.shape_cast %202 : vector<32xf32> to vector<32x1xf32>
    %204 = vector.extract_strided_slice %203 {offsets = [0, 0], sizes = [16, 1], strides = [1, 1]} : vector<32x1xf32> to vector<16x1xf32>
    %205 = vector.extract_strided_slice %203 {offsets = [16, 0], sizes = [16, 1], strides = [1, 1]} : vector<32x1xf32> to vector<16x1xf32>
    %206 = arith.index_cast %c4_i32 : i32 to index
    %c0_89 = arith.constant 0 : index
    %c0_90 = arith.constant 0 : index
    %207 = vector.load %arg20[%206, %c0_89, %c0_90] : memref<8x16x256xf32, #tpu.memory_space<vmem>>, vector<1x16x256xf32>
    %208 = vector.shape_cast %207 : vector<1x16x256xf32> to vector<16x256xf32>
    %209 = arith.mulf %208, %191 : vector<16x256xf32>
    %210 = arith.index_cast %c4_i32 : i32 to index
    %c0_91 = arith.constant 0 : index
    %211 = vector.load %arg21[%210, %c0_91] : memref<8x256xf32, #tpu.memory_space<vmem>>, vector<1x256xf32>
    %212 = vector.broadcast %204 : vector<16x1xf32> to vector<16x256xf32>
    %213 = vector.broadcast %211 : vector<1x256xf32> to vector<16x256xf32>
    %214 = arith.mulf %212, %213 : vector<16x256xf32>
    %215 = arith.addf %209, %214 : vector<16x256xf32>
    %216 = vector.broadcast %205 : vector<16x1xf32> to vector<16x256xf32>
    %217 = arith.mulf %216, %215 : vector<16x256xf32>
    %cst_92 = arith.constant dense<0.000000e+00> : vector<256xf32>
    %218 = vector.multi_reduction <add>, %217, %cst_92 [0] : vector<16x256xf32> to vector<256xf32>
    %219 = vector.shape_cast %218 : vector<256xf32> to vector<1x256xf32>
    %220 = arith.index_cast %c4_i32 : i32 to index
    %c0_93 = arith.constant 0 : index
    %221 = vector.load %arg22[%220, %c0_93] : memref<8x256xf32, #tpu.memory_space<vmem>>, vector<1x256xf32>
    tpu.vector_store %arg22[%220, %c0_93], %219 {strides = array<i32>} : memref<8x256xf32, #tpu.memory_space<vmem>>, vector<1x256xf32>,
    %c5_i32 = arith.constant 5 : i32
    %222 = vector.broadcast %c5_i32 : i32 to vector<32x8xi32>
    %223 = arith.cmpi eq, %100, %222 : vector<32x8xi32>
    %cst_94 = arith.constant 0.000000e+00 : f32
    %224 = vector.broadcast %cst_94 : f32 to vector<32x8xf32>
    %225 = arith.select %223, %74, %224 : vector<32x8xi1>, vector<32x8xf32>
    %cst_95 = arith.constant dense<0.000000e+00> : vector<32xf32>
    %226 = vector.multi_reduction <add>, %225, %cst_95 [1] : vector<32x8xf32> to vector<32xf32>
    %227 = vector.shape_cast %226 : vector<32xf32> to vector<32x1xf32>
    %228 = vector.extract_strided_slice %227 {offsets = [0, 0], sizes = [16, 1], strides = [1, 1]} : vector<32x1xf32> to vector<16x1xf32>
    %229 = vector.extract_strided_slice %227 {offsets = [16, 0], sizes = [16, 1], strides = [1, 1]} : vector<32x1xf32> to vector<16x1xf32>
    %230 = arith.index_cast %c5_i32 : i32 to index
    %c0_96 = arith.constant 0 : index
    %c0_97 = arith.constant 0 : index
    %231 = vector.load %arg20[%230, %c0_96, %c0_97] : memref<8x16x256xf32, #tpu.memory_space<vmem>>, vector<1x16x256xf32>
    %232 = vector.shape_cast %231 : vector<1x16x256xf32> to vector<16x256xf32>
    %233 = arith.mulf %232, %215 : vector<16x256xf32>
    %234 = arith.index_cast %c5_i32 : i32 to index
    %c0_98 = arith.constant 0 : index
    %235 = vector.load %arg21[%234, %c0_98] : memref<8x256xf32, #tpu.memory_space<vmem>>, vector<1x256xf32>
    %236 = vector.broadcast %228 : vector<16x1xf32> to vector<16x256xf32>
    %237 = vector.broadcast %235 : vector<1x256xf32> to vector<16x256xf32>
    %238 = arith.mulf %236, %237 : vector<16x256xf32>
    %239 = arith.addf %233, %238 : vector<16x256xf32>
    %240 = vector.broadcast %229 : vector<16x1xf32> to vector<16x256xf32>
    %241 = arith.mulf %240, %239 : vector<16x256xf32>
    %cst_99 = arith.constant dense<0.000000e+00> : vector<256xf32>
    %242 = vector.multi_reduction <add>, %241, %cst_99 [0] : vector<16x256xf32> to vector<256xf32>
    %243 = vector.shape_cast %242 : vector<256xf32> to vector<1x256xf32>
    %244 = arith.index_cast %c5_i32 : i32 to index
    %c0_100 = arith.constant 0 : index
    %245 = vector.load %arg22[%244, %c0_100] : memref<8x256xf32, #tpu.memory_space<vmem>>, vector<1x256xf32>
    tpu.vector_store %arg22[%244, %c0_100], %243 {strides = array<i32>} : memref<8x256xf32, #tpu.memory_space<vmem>>, vector<1x256xf32>,
    %c6_i32 = arith.constant 6 : i32
    %246 = vector.broadcast %c6_i32 : i32 to vector<32x8xi32>
    %247 = arith.cmpi eq, %100, %246 : vector<32x8xi32>
    %cst_101 = arith.constant 0.000000e+00 : f32
    %248 = vector.broadcast %cst_101 : f32 to vector<32x8xf32>
    %249 = arith.select %247, %74, %248 : vector<32x8xi1>, vector<32x8xf32>
    %cst_102 = arith.constant dense<0.000000e+00> : vector<32xf32>
    %250 = vector.multi_reduction <add>, %249, %cst_102 [1] : vector<32x8xf32> to vector<32xf32>
    %251 = vector.shape_cast %250 : vector<32xf32> to vector<32x1xf32>
    %252 = vector.extract_strided_slice %251 {offsets = [0, 0], sizes = [16, 1], strides = [1, 1]} : vector<32x1xf32> to vector<16x1xf32>
    %253 = vector.extract_strided_slice %251 {offsets = [16, 0], sizes = [16, 1], strides = [1, 1]} : vector<32x1xf32> to vector<16x1xf32>
    %254 = arith.index_cast %c6_i32 : i32 to index
    %c0_103 = arith.constant 0 : index
    %c0_104 = arith.constant 0 : index
    %255 = vector.load %arg20[%254, %c0_103, %c0_104] : memref<8x16x256xf32, #tpu.memory_space<vmem>>, vector<1x16x256xf32>
    %256 = vector.shape_cast %255 : vector<1x16x256xf32> to vector<16x256xf32>
    %257 = arith.mulf %256, %239 : vector<16x256xf32>
    %258 = arith.index_cast %c6_i32 : i32 to index
    %c0_105 = arith.constant 0 : index
    %259 = vector.load %arg21[%258, %c0_105] : memref<8x256xf32, #tpu.memory_space<vmem>>, vector<1x256xf32>
    %260 = vector.broadcast %252 : vector<16x1xf32> to vector<16x256xf32>
    %261 = vector.broadcast %259 : vector<1x256xf32> to vector<16x256xf32>
    %262 = arith.mulf %260, %261 : vector<16x256xf32>
    %263 = arith.addf %257, %262 : vector<16x256xf32>
    %264 = vector.broadcast %253 : vector<16x1xf32> to vector<16x256xf32>
    %265 = arith.mulf %264, %263 : vector<16x256xf32>
    %cst_106 = arith.constant dense<0.000000e+00> : vector<256xf32>
    %266 = vector.multi_reduction <add>, %265, %cst_106 [0] : vector<16x256xf32> to vector<256xf32>
    %267 = vector.shape_cast %266 : vector<256xf32> to vector<1x256xf32>
    %268 = arith.index_cast %c6_i32 : i32 to index
    %c0_107 = arith.constant 0 : index
    %269 = vector.load %arg22[%268, %c0_107] : memref<8x256xf32, #tpu.memory_space<vmem>>, vector<1x256xf32>
    tpu.vector_store %arg22[%268, %c0_107], %267 {strides = array<i32>} : memref<8x256xf32, #tpu.memory_space<vmem>>, vector<1x256xf32>,
    %c7_i32 = arith.constant 7 : i32
    %270 = vector.broadcast %c7_i32 : i32 to vector<32x8xi32>
    %271 = arith.cmpi eq, %100, %270 : vector<32x8xi32>
    %cst_108 = arith.constant 0.000000e+00 : f32
    %272 = vector.broadcast %cst_108 : f32 to vector<32x8xf32>
    %273 = arith.select %271, %74, %272 : vector<32x8xi1>, vector<32x8xf32>
    %cst_109 = arith.constant dense<0.000000e+00> : vector<32xf32>
    %274 = vector.multi_reduction <add>, %273, %cst_109 [1] : vector<32x8xf32> to vector<32xf32>
    %275 = vector.shape_cast %274 : vector<32xf32> to vector<32x1xf32>
    %276 = vector.extract_strided_slice %275 {offsets = [0, 0], sizes = [16, 1], strides = [1, 1]} : vector<32x1xf32> to vector<16x1xf32>
    %277 = vector.extract_strided_slice %275 {offsets = [16, 0], sizes = [16, 1], strides = [1, 1]} : vector<32x1xf32> to vector<16x1xf32>
    %278 = arith.index_cast %c7_i32 : i32 to index
    %c0_110 = arith.constant 0 : index
    %c0_111 = arith.constant 0 : index
    %279 = vector.load %arg20[%278, %c0_110, %c0_111] : memref<8x16x256xf32, #tpu.memory_space<vmem>>, vector<1x16x256xf32>
    %280 = vector.shape_cast %279 : vector<1x16x256xf32> to vector<16x256xf32>
    %281 = arith.mulf %280, %263 : vector<16x256xf32>
    %282 = arith.index_cast %c7_i32 : i32 to index
    %c0_112 = arith.constant 0 : index
    %283 = vector.load %arg21[%282, %c0_112] : memref<8x256xf32, #tpu.memory_space<vmem>>, vector<1x256xf32>
    %284 = vector.broadcast %276 : vector<16x1xf32> to vector<16x256xf32>
    %285 = vector.broadcast %283 : vector<1x256xf32> to vector<16x256xf32>
    %286 = arith.mulf %284, %285 : vector<16x256xf32>
    %287 = arith.addf %281, %286 : vector<16x256xf32>
    %288 = vector.broadcast %277 : vector<16x1xf32> to vector<16x256xf32>
    %289 = arith.mulf %288, %287 : vector<16x256xf32>
    %cst_113 = arith.constant dense<0.000000e+00> : vector<256xf32>
    %290 = vector.multi_reduction <add>, %289, %cst_113 [0] : vector<16x256xf32> to vector<256xf32>
    %291 = vector.shape_cast %290 : vector<256xf32> to vector<1x256xf32>
    %292 = arith.index_cast %c7_i32 : i32 to index
    %c0_114 = arith.constant 0 : index
    %293 = vector.load %arg22[%292, %c0_114] : memref<8x256xf32, #tpu.memory_space<vmem>>, vector<1x256xf32>
    tpu.vector_store %arg22[%292, %c0_114], %291 {strides = array<i32>} : memref<8x256xf32, #tpu.memory_space<vmem>>, vector<1x256xf32>,
    %c8_i32 = arith.constant 8 : i32
    %c0_115 = arith.constant 0 : index
    %c0_116 = arith.constant 0 : index
    %294 = vector.load %arg18[%c0_115, %c0_116] : memref<16x256xf32, #tpu.memory_space<vmem>>, vector<16x256xf32>
    tpu.vector_store %arg18[%c0_115, %c0_116], %287 {strides = array<i32>} : memref<16x256xf32, #tpu.memory_space<vmem>>, vector<16x256xf32>,
    %c0_117 = arith.constant 0 : index
    %c0_118 = arith.constant 0 : index
    %295 = vector.load %arg22[%c0_117, %c0_118] : memref<8x256xf32, #tpu.memory_space<vmem>>, vector<8x256xf32>
    %c0_119 = arith.constant 0 : index
    %c0_120 = arith.constant 0 : index
    %296 = vector.load %arg14[%c0_119, %c0_120] : memref<1x256xf32, #tpu.memory_space<vmem>>, vector<1x256xf32>
    %297 = vector.broadcast %296 : vector<1x256xf32> to vector<8x256xf32>
    %298 = arith.mulf %69, %297 : vector<8x256xf32>
    %299 = arith.addf %295, %298 : vector<8x256xf32>
    %cst_121 = arith.constant 0.000000e+00 : f32
    %300 = vector.broadcast %cst_121 : f32 to vector<8x256xf32>
    %301 = arith.subf %300, %37 : vector<8x256xf32>
    %302 = math.exp %301 : vector<8x256xf32>
    %cst_122 = arith.constant 1.000000e+00 : f32
    %303 = vector.broadcast %cst_122 : f32 to vector<8x256xf32>
    %304 = arith.addf %303, %302 : vector<8x256xf32>
    %cst_123 = arith.constant 1.000000e+00 : f32
    %305 = vector.broadcast %cst_123 : f32 to vector<8x256xf32>
    %306 = arith.divf %305, %304 : vector<8x256xf32>
    %307 = arith.mulf %37, %306 : vector<8x256xf32>
    %308 = arith.mulf %299, %307 : vector<8x256xf32>
    %309 = arith.truncf %308 : vector<8x256xf32> to vector<8x256xbf16>
    %c0_124 = arith.constant 0 : index
    %c0_125 = arith.constant 0 : index
    %310 = vector.load %arg15[%c0_124, %c0_125] : memref<256x128xbf16, #tpu.memory_space<vmem>>, vector<256x128xbf16>
    %cst_126 = arith.constant dense<0.000000e+00> : vector<8x128xf32>
    %311 = tpu.matmul %309, %310, %cst_126 {dimension_numbers = #tpu.dot_dimension_numbers<[1], [0], [0], [1], [0, 0, 1, 1], [], []>} : vector<8x256xbf16>, vector<256x128xbf16>, vector<8x128xf32> -> vector<8x128xf32>
    %c0_127 = arith.constant 0 : index
    %c0_128 = arith.constant 0 : index
    %c0_129 = arith.constant 0 : index
    %312 = vector.load %arg16[%c0_127, %c0_128, %c0_129] : memref<1x8x128xf32, #tpu.memory_space<vmem>>, vector<1x8x128xf32>
    %313 = vector.shape_cast %312 : vector<1x8x128xf32> to vector<8x128xf32>
    %314 = vector.shape_cast %311 : vector<8x128xf32> to vector<1x8x128xf32>
    tpu.vector_store %arg16[%c0_127, %c0_128, %c0_129], %314 {strides = array<i32>} : memref<1x8x128xf32, #tpu.memory_space<vmem>>, vector<1x8x128xf32>,
    return
  }
  func.func @transform_0(%arg0: i32, %arg1: i32) -> (i32, i32, i32) {
    %c0_i32 = arith.constant 0 : i32
    %c0_i32_0 = arith.constant 0 : i32
    return %arg0, %arg1, %c0_i32 : i32, i32, i32
  }
  func.func @transform_1(%arg0: i32, %arg1: i32) -> (i32, i32, i32) {
    %c0_i32 = arith.constant 0 : i32
    %c0_i32_0 = arith.constant 0 : i32
    return %arg0, %arg1, %c0_i32 : i32, i32, i32
  }
  func.func @transform_2(%arg0: i32, %arg1: i32) -> (i32, i32) {
    %c0_i32 = arith.constant 0 : i32
    %c0_i32_0 = arith.constant 0 : i32
    %c0_i32_1 = arith.constant 0 : i32
    return %c0_i32, %c0_i32_0 : i32, i32
  }
  func.func @transform_3(%arg0: i32, %arg1: i32) -> (i32, i32) {
    %c0_i32 = arith.constant 0 : i32
    %c0_i32_0 = arith.constant 0 : i32
    %c0_i32_1 = arith.constant 0 : i32
    return %c0_i32, %c0_i32_0 : i32, i32
  }
  func.func @transform_4(%arg0: i32, %arg1: i32) -> (i32, i32) {
    %c0_i32 = arith.constant 0 : i32
    %c0_i32_0 = arith.constant 0 : i32
    %c0_i32_1 = arith.constant 0 : i32
    return %c0_i32, %c0_i32_0 : i32, i32
  }
  func.func @transform_5(%arg0: i32, %arg1: i32) -> (i32, i32) {
    %c0_i32 = arith.constant 0 : i32
    %c0_i32_0 = arith.constant 0 : i32
    %c0_i32_1 = arith.constant 0 : i32
    return %c0_i32, %c0_i32_0 : i32, i32
  }
  func.func @transform_6(%arg0: i32, %arg1: i32) -> (i32, i32) {
    %c0_i32 = arith.constant 0 : i32
    %c0_i32_0 = arith.constant 0 : i32
    %c0_i32_1 = arith.constant 0 : i32
    return %c0_i32, %c0_i32_0 : i32, i32
  }
  func.func @transform_7(%arg0: i32, %arg1: i32) -> (i32, i32) {
    %c0_i32 = arith.constant 0 : i32
    %c0_i32_0 = arith.constant 0 : i32
    %c0_i32_1 = arith.constant 0 : i32
    return %c0_i32, %c0_i32_0 : i32, i32
  }
  func.func @transform_8(%arg0: i32, %arg1: i32) -> (i32, i32) {
    %c0_i32 = arith.constant 0 : i32
    %c0_i32_0 = arith.constant 0 : i32
    %c0_i32_1 = arith.constant 0 : i32
    return %c0_i32, %c0_i32_0 : i32, i32
  }
  func.func @transform_9(%arg0: i32, %arg1: i32) -> (i32, i32) {
    %c0_i32 = arith.constant 0 : i32
    %c0_i32_0 = arith.constant 0 : i32
    %c0_i32_1 = arith.constant 0 : i32
    return %c0_i32, %c0_i32_0 : i32, i32
  }
  func.func @transform_10(%arg0: i32, %arg1: i32) -> (i32, i32) {
    %c0_i32 = arith.constant 0 : i32
    %c0_i32_0 = arith.constant 0 : i32
    %c0_i32_1 = arith.constant 0 : i32
    return %c0_i32, %c0_i32_0 : i32, i32
  }
  func.func @transform_11(%arg0: i32, %arg1: i32) -> (i32, i32) {
    %c0_i32 = arith.constant 0 : i32
    %c0_i32_0 = arith.constant 0 : i32
    %c0_i32_1 = arith.constant 0 : i32
    return %c0_i32, %c0_i32_0 : i32, i32
  }
  func.func @transform_12(%arg0: i32, %arg1: i32) -> (i32, i32) {
    %c0_i32 = arith.constant 0 : i32
    %c0_i32_0 = arith.constant 0 : i32
    %c0_i32_1 = arith.constant 0 : i32
    return %c0_i32, %c0_i32_0 : i32, i32
  }
  func.func @transform_13(%arg0: i32, %arg1: i32) -> (i32, i32) {
    %c0_i32 = arith.constant 0 : i32
    %c0_i32_0 = arith.constant 0 : i32
    %c0_i32_1 = arith.constant 0 : i32
    return %c0_i32, %c0_i32_0 : i32, i32
  }
  func.func @transform_14(%arg0: i32, %arg1: i32) -> (i32, i32, i32) {
    %c0_i32 = arith.constant 0 : i32
    %c0_i32_0 = arith.constant 0 : i32
    return %arg0, %arg1, %c0_i32 : i32, i32, i32
  }
  func.func @transform_15(%arg0: i32, %arg1: i32) -> (i32, i32, i32) {
    %c0_i32 = arith.constant 0 : i32
    %c0_i32_0 = arith.constant 0 : i32
    return %arg0, %arg1, %c0_i32 : i32, i32, i32
  }
}

module attributes {stable_mosaic.version = 11 : i64} {
  func.func @_block_kernel(%arg0: i32, %arg1: i32, %arg2: memref<1x8x128xf32, #tpu.memory_space<vmem>>, %arg3: memref<1x8x128xf32, #tpu.memory_space<vmem>>, %arg4: memref<1x128xf32, #tpu.memory_space<vmem>>, %arg5: memref<1x128xf32, #tpu.memory_space<vmem>>, %arg6: memref<128x512xbf16, #tpu.memory_space<vmem>>, %arg7: memref<4x256xf32, #tpu.memory_space<vmem>>, %arg8: memref<1x256xf32, #tpu.memory_space<vmem>>, %arg9: memref<256x8xbf16, #tpu.memory_space<vmem>>, %arg10: memref<32x256xbf16, #tpu.memory_space<vmem>>, %arg11: memref<8x256xbf16, #tpu.memory_space<vmem>>, %arg12: memref<1x256xf32, #tpu.memory_space<vmem>>, %arg13: memref<16x256xf32, #tpu.memory_space<vmem>>, %arg14: memref<1x256xf32, #tpu.memory_space<vmem>>, %arg15: memref<256x128xbf16, #tpu.memory_space<vmem>>, %arg16: memref<1x8x128xf32, #tpu.memory_space<vmem>>, %arg17: memref<1x8x128xf32, #tpu.memory_space<vmem>>, %arg18: memref<16x256xf32, #tpu.memory_space<vmem>>, %arg19: memref<11x256xf32, #tpu.memory_space<vmem>>, %arg20: memref<8x16x256xf32, #tpu.memory_space<vmem>>, %arg21: memref<8x256xf32, #tpu.memory_space<vmem>>, %arg22: memref<8x256xf32, #tpu.memory_space<vmem>>) attributes {dimension_semantics = [#tpu.dimension_semantics<parallel>, #tpu.dimension_semantics<arbitrary>], iteration_bounds = array<i64: 2, 2>, scalar_prefetch = 0 : i64, scratch_operands = 5 : i64, tpu.core_type = #tpu.core_type<tc>, window_params = [{transform_indices = @transform_0, window_bounds = array<i64: 1, 8, 128>}, {transform_indices = @transform_1, window_bounds = array<i64: 1, 8, 128>}, {pipeline_mode = #tpu.pipeline_mode<synchronous>, transform_indices = @transform_2, window_bounds = array<i64: 1, 128>}, {pipeline_mode = #tpu.pipeline_mode<synchronous>, transform_indices = @transform_3, window_bounds = array<i64: 1, 128>}, {pipeline_mode = #tpu.pipeline_mode<synchronous>, transform_indices = @transform_4, window_bounds = array<i64: 128, 512>}, {pipeline_mode = #tpu.pipeline_mode<synchronous>, transform_indices = @transform_5, window_bounds = array<i64: 4, 256>}, {pipeline_mode = #tpu.pipeline_mode<synchronous>, transform_indices = @transform_6, window_bounds = array<i64: 1, 256>}, {pipeline_mode = #tpu.pipeline_mode<synchronous>, transform_indices = @transform_7, window_bounds = array<i64: 256, 8>}, {pipeline_mode = #tpu.pipeline_mode<synchronous>, transform_indices = @transform_8, window_bounds = array<i64: 32, 256>}, {pipeline_mode = #tpu.pipeline_mode<synchronous>, transform_indices = @transform_9, window_bounds = array<i64: 8, 256>}, {pipeline_mode = #tpu.pipeline_mode<synchronous>, transform_indices = @transform_10, window_bounds = array<i64: 1, 256>}, {pipeline_mode = #tpu.pipeline_mode<synchronous>, transform_indices = @transform_11, window_bounds = array<i64: 16, 256>}, {pipeline_mode = #tpu.pipeline_mode<synchronous>, transform_indices = @transform_12, window_bounds = array<i64: 1, 256>}, {pipeline_mode = #tpu.pipeline_mode<synchronous>, transform_indices = @transform_13, window_bounds = array<i64: 256, 128>}, {transform_indices = @transform_14, window_bounds = array<i64: 1, 8, 128>}, {transform_indices = @transform_15, window_bounds = array<i64: 1, 8, 128>}]} {
    %c0_i32 = arith.constant 0 : i32
    %0 = arith.cmpi eq, %arg1, %c0_i32 : i32
    %1 = arith.extui %0 : i1 to i32
    %c0_i32_0 = arith.constant 0 : i32
    %2 = arith.cmpi ne, %1, %c0_i32_0 : i32
    scf.if %2 {
      %cst_164 = arith.constant 0.000000e+00 : f32
      %382 = vector.broadcast %cst_164 : f32 to vector<16x256xf32>
      %c0_165 = arith.constant 0 : index
      %c0_166 = arith.constant 0 : index
      %383 = vector.load %arg18[%c0_165, %c0_166] : memref<16x256xf32, #tpu.memory_space<vmem>>, vector<16x256xf32>
      tpu.vector_store %arg18[%c0_165, %c0_166], %382 {strides = array<i32>} : memref<16x256xf32, #tpu.memory_space<vmem>>, vector<16x256xf32>,
      %cst_167 = arith.constant 0.000000e+00 : f32
      %384 = vector.broadcast %cst_167 : f32 to vector<3x256xf32>
      %c0_168 = arith.constant 0 : index
      %c0_169 = arith.constant 0 : index
      %385 = vector.load %arg19[%c0_168, %c0_169] : memref<11x256xf32, #tpu.memory_space<vmem>>, vector<3x256xf32>
      tpu.vector_store %arg19[%c0_168, %c0_169], %384 {strides = array<i32>} : memref<11x256xf32, #tpu.memory_space<vmem>>, vector<3x256xf32>,
    } else {
    }
    %c0 = arith.constant 0 : index
    %c0_1 = arith.constant 0 : index
    %c0_2 = arith.constant 0 : index
    %3 = vector.load %arg2[%c0, %c0_1, %c0_2] : memref<1x8x128xf32, #tpu.memory_space<vmem>>, vector<1x8x128xf32>
    %4 = vector.shape_cast %3 : vector<1x8x128xf32> to vector<8x128xf32>
    %c0_3 = arith.constant 0 : index
    %c0_4 = arith.constant 0 : index
    %c0_5 = arith.constant 0 : index
    %5 = vector.load %arg3[%c0_3, %c0_4, %c0_5] : memref<1x8x128xf32, #tpu.memory_space<vmem>>, vector<1x8x128xf32>
    %6 = vector.shape_cast %5 : vector<1x8x128xf32> to vector<8x128xf32>
    %7 = arith.addf %4, %6 : vector<8x128xf32>
    %c0_6 = arith.constant 0 : index
    %c0_7 = arith.constant 0 : index
    %c0_8 = arith.constant 0 : index
    %8 = vector.load %arg17[%c0_6, %c0_7, %c0_8] : memref<1x8x128xf32, #tpu.memory_space<vmem>>, vector<1x8x128xf32>
    %9 = vector.shape_cast %8 : vector<1x8x128xf32> to vector<8x128xf32>
    %10 = vector.shape_cast %7 : vector<8x128xf32> to vector<1x8x128xf32>
    tpu.vector_store %arg17[%c0_6, %c0_7, %c0_8], %10 {strides = array<i32>} : memref<1x8x128xf32, #tpu.memory_space<vmem>>, vector<1x8x128xf32>,
    %cst = arith.constant dense<0.000000e+00> : vector<8xf32>
    %11 = vector.multi_reduction <add>, %7, %cst [1] : vector<8x128xf32> to vector<8xf32>
    %12 = vector.shape_cast %11 : vector<8xf32> to vector<8x1xf32>
    %cst_9 = arith.constant 1.280000e+02 : f32
    %13 = vector.broadcast %cst_9 : f32 to vector<8x1xf32>
    %14 = arith.divf %12, %13 : vector<8x1xf32>
    %15 = vector.broadcast %14 : vector<8x1xf32> to vector<8x128xf32>
    %16 = arith.subf %7, %15 : vector<8x128xf32>
    %17 = arith.mulf %16, %16 : vector<8x128xf32>
    %cst_10 = arith.constant dense<0.000000e+00> : vector<8xf32>
    %18 = vector.multi_reduction <add>, %17, %cst_10 [1] : vector<8x128xf32> to vector<8xf32>
    %19 = vector.shape_cast %18 : vector<8xf32> to vector<8x1xf32>
    %cst_11 = arith.constant 1.280000e+02 : f32
    %20 = vector.broadcast %cst_11 : f32 to vector<8x1xf32>
    %21 = arith.divf %19, %20 : vector<8x1xf32>
    %cst_12 = arith.constant 9.99999974E-6 : f32
    %22 = vector.broadcast %cst_12 : f32 to vector<8x1xf32>
    %23 = arith.addf %21, %22 : vector<8x1xf32>
    %24 = math.rsqrt %23 : vector<8x1xf32>
    %25 = vector.broadcast %24 : vector<8x1xf32> to vector<8x128xf32>
    %26 = arith.mulf %16, %25 : vector<8x128xf32>
    %c0_13 = arith.constant 0 : index
    %c0_14 = arith.constant 0 : index
    %27 = vector.load %arg4[%c0_13, %c0_14] : memref<1x128xf32, #tpu.memory_space<vmem>>, vector<1x128xf32>
    %28 = vector.broadcast %27 : vector<1x128xf32> to vector<8x128xf32>
    %29 = arith.mulf %26, %28 : vector<8x128xf32>
    %c0_15 = arith.constant 0 : index
    %c0_16 = arith.constant 0 : index
    %30 = vector.load %arg5[%c0_15, %c0_16] : memref<1x128xf32, #tpu.memory_space<vmem>>, vector<1x128xf32>
    %31 = vector.broadcast %30 : vector<1x128xf32> to vector<8x128xf32>
    %32 = arith.addf %29, %31 : vector<8x128xf32>
    %33 = arith.truncf %32 : vector<8x128xf32> to vector<8x128xbf16>
    %c0_17 = arith.constant 0 : index
    %c0_18 = arith.constant 0 : index
    %34 = vector.load %arg6[%c0_17, %c0_18] : memref<128x512xbf16, #tpu.memory_space<vmem>>, vector<128x512xbf16>
    %cst_19 = arith.constant dense<0.000000e+00> : vector<8x512xf32>
    %35 = tpu.matmul %33, %34, %cst_19 {dimension_numbers = #tpu.dot_dimension_numbers<[1], [0], [0], [1], [0, 0, 1, 1], [], []>} : vector<8x128xbf16>, vector<128x512xbf16>, vector<8x512xf32> -> vector<8x512xf32>
    %36 = vector.extract_strided_slice %35 {offsets = [0, 0], sizes = [8, 256], strides = [1, 1]} : vector<8x512xf32> to vector<8x256xf32>
    %37 = vector.extract_strided_slice %35 {offsets = [0, 256], sizes = [8, 256], strides = [1, 1]} : vector<8x512xf32> to vector<8x256xf32>
    %c3 = arith.constant 3 : index
    %c0_20 = arith.constant 0 : index
    %38 = vector.load %arg19[%c3, %c0_20] : memref<11x256xf32, #tpu.memory_space<vmem>>, vector<8x256xf32>
    tpu.vector_store %arg19[%c3, %c0_20], %36 {strides = array<i32>} : memref<11x256xf32, #tpu.memory_space<vmem>>, vector<8x256xf32>,
    %c0_21 = arith.constant 0 : index
    %c0_22 = arith.constant 0 : index
    %39 = vector.load %arg19[%c0_21, %c0_22] : memref<11x256xf32, #tpu.memory_space<vmem>>, vector<11x256xf32>
    %40 = vector.extract_strided_slice %39 {offsets = [0, 0], sizes = [8, 256], strides = [1, 1]} : vector<11x256xf32> to vector<8x256xf32>
    %c0_23 = arith.constant 0 : index
    %c0_24 = arith.constant 0 : index
    %41 = vector.load %arg7[%c0_23, %c0_24] : memref<4x256xf32, #tpu.memory_space<vmem>>, vector<1x256xf32>
    %42 = vector.broadcast %41 : vector<1x256xf32> to vector<8x256xf32>
    %43 = arith.mulf %40, %42 : vector<8x256xf32>
    %44 = vector.extract_strided_slice %39 {offsets = [1, 0], sizes = [8, 256], strides = [1, 1]} : vector<11x256xf32> to vector<8x256xf32>
    %c1 = arith.constant 1 : index
    %c0_25 = arith.constant 0 : index
    %45 = vector.load %arg7[%c1, %c0_25] : memref<4x256xf32, #tpu.memory_space<vmem>>, vector<1x256xf32>
    %46 = vector.broadcast %45 : vector<1x256xf32> to vector<8x256xf32>
    %47 = arith.mulf %44, %46 : vector<8x256xf32>
    %48 = arith.addf %43, %47 : vector<8x256xf32>
    %49 = vector.extract_strided_slice %39 {offsets = [2, 0], sizes = [8, 256], strides = [1, 1]} : vector<11x256xf32> to vector<8x256xf32>
    %c2 = arith.constant 2 : index
    %c0_26 = arith.constant 0 : index
    %50 = vector.load %arg7[%c2, %c0_26] : memref<4x256xf32, #tpu.memory_space<vmem>>, vector<1x256xf32>
    %51 = vector.broadcast %50 : vector<1x256xf32> to vector<8x256xf32>
    %52 = arith.mulf %49, %51 : vector<8x256xf32>
    %53 = arith.addf %48, %52 : vector<8x256xf32>
    %54 = vector.extract_strided_slice %39 {offsets = [3, 0], sizes = [8, 256], strides = [1, 1]} : vector<11x256xf32> to vector<8x256xf32>
    %c3_27 = arith.constant 3 : index
    %c0_28 = arith.constant 0 : index
    %55 = vector.load %arg7[%c3_27, %c0_28] : memref<4x256xf32, #tpu.memory_space<vmem>>, vector<1x256xf32>
    %56 = vector.broadcast %55 : vector<1x256xf32> to vector<8x256xf32>
    %57 = arith.mulf %54, %56 : vector<8x256xf32>
    %58 = arith.addf %53, %57 : vector<8x256xf32>
    %c0_29 = arith.constant 0 : index
    %c0_30 = arith.constant 0 : index
    %59 = vector.load %arg8[%c0_29, %c0_30] : memref<1x256xf32, #tpu.memory_space<vmem>>, vector<1x256xf32>
    %60 = vector.broadcast %59 : vector<1x256xf32> to vector<8x256xf32>
    %61 = arith.addf %58, %60 : vector<8x256xf32>
    %cst_31 = arith.constant 0.000000e+00 : f32
    %62 = vector.broadcast %cst_31 : f32 to vector<8x256xf32>
    %63 = arith.subf %62, %61 : vector<8x256xf32>
    %64 = math.exp %63 : vector<8x256xf32>
    %cst_32 = arith.constant 1.000000e+00 : f32
    %65 = vector.broadcast %cst_32 : f32 to vector<8x256xf32>
    %66 = arith.addf %65, %64 : vector<8x256xf32>
    %cst_33 = arith.constant 1.000000e+00 : f32
    %67 = vector.broadcast %cst_33 : f32 to vector<8x256xf32>
    %68 = arith.divf %67, %66 : vector<8x256xf32>
    %69 = arith.mulf %61, %68 : vector<8x256xf32>
    %70 = vector.extract_strided_slice %39 {offsets = [8, 0], sizes = [3, 256], strides = [1, 1]} : vector<11x256xf32> to vector<3x256xf32>
    %c0_34 = arith.constant 0 : index
    %c0_35 = arith.constant 0 : index
    %71 = vector.load %arg19[%c0_34, %c0_35] : memref<11x256xf32, #tpu.memory_space<vmem>>, vector<3x256xf32>
    tpu.vector_store %arg19[%c0_34, %c0_35], %70 {strides = array<i32>} : memref<11x256xf32, #tpu.memory_space<vmem>>, vector<3x256xf32>,
    %72 = arith.truncf %69 : vector<8x256xf32> to vector<8x256xbf16>
    %c0_36 = arith.constant 0 : index
    %c0_37 = arith.constant 0 : index
    %73 = vector.load %arg10[%c0_36, %c0_37] : memref<32x256xbf16, #tpu.memory_space<vmem>>, vector<32x256xbf16>
    %cst_38 = arith.constant dense<0.000000e+00> : vector<32x8xf32>
    %74 = tpu.matmul %73, %72, %cst_38 {dimension_numbers = #tpu.dot_dimension_numbers<[1], [1], [0], [0], [0, 0, 1, 0], [], []>} : vector<32x256xbf16>, vector<8x256xbf16>, vector<32x8xf32> -> vector<32x8xf32>
    %c0_39 = arith.constant 0 : index
    %c0_40 = arith.constant 0 : index
    %75 = vector.load %arg9[%c0_39, %c0_40] : memref<256x8xbf16, #tpu.memory_space<vmem>>, vector<256x8xbf16>
    %cst_41 = arith.constant dense<0.000000e+00> : vector<8x8xf32>
    %76 = tpu.matmul %72, %75, %cst_41 {dimension_numbers = #tpu.dot_dimension_numbers<[1], [0], [0], [1], [0, 0, 1, 1], [], []>} : vector<8x256xbf16>, vector<256x8xbf16>, vector<8x8xf32> -> vector<8x8xf32>
    %77 = arith.truncf %76 : vector<8x8xf32> to vector<8x8xbf16>
    %c0_42 = arith.constant 0 : index
    %c0_43 = arith.constant 0 : index
    %78 = vector.load %arg11[%c0_42, %c0_43] : memref<8x256xbf16, #tpu.memory_space<vmem>>, vector<8x256xbf16>
    %cst_44 = arith.constant dense<0.000000e+00> : vector<8x256xf32>
    %79 = tpu.matmul %77, %78, %cst_44 {dimension_numbers = #tpu.dot_dimension_numbers<[1], [0], [0], [1], [0, 0, 1, 1], [], []>} : vector<8x8xbf16>, vector<8x256xbf16>, vector<8x256xf32> -> vector<8x256xf32>
    %c0_45 = arith.constant 0 : index
    %c0_46 = arith.constant 0 : index
    %80 = vector.load %arg12[%c0_45, %c0_46] : memref<1x256xf32, #tpu.memory_space<vmem>>, vector<1x256xf32>
    %81 = vector.broadcast %80 : vector<1x256xf32> to vector<8x256xf32>
    %82 = arith.addf %79, %81 : vector<8x256xf32>
    %cst_47 = arith.constant 2.000000e+01 : f32
    %83 = vector.broadcast %cst_47 : f32 to vector<8x256xf32>
    %84 = arith.cmpf ogt, %82, %83 : vector<8x256xf32>
    %cst_48 = arith.constant 2.000000e+01 : f32
    %85 = vector.broadcast %cst_48 : f32 to vector<8x256xf32>
    %86 = arith.minimumf %82, %85 : vector<8x256xf32>
    %87 = math.exp %86 : vector<8x256xf32>
    %88 = math.log1p %87 : vector<8x256xf32>
    %89 = arith.select %84, %82, %88 : vector<8x256xi1>, vector<8x256xf32>
    %c0_49 = arith.constant 0 : index
    %c0_50 = arith.constant 0 : index
    %90 = vector.load %arg13[%c0_49, %c0_50] : memref<16x256xf32, #tpu.memory_space<vmem>>, vector<16x256xf32>
    %c0_51 = arith.constant 0 : index
    %c0_52 = arith.constant 0 : index
    %91 = vector.load %arg21[%c0_51, %c0_52] : memref<8x256xf32, #tpu.memory_space<vmem>>, vector<8x256xf32>
    tpu.vector_store %arg21[%c0_51, %c0_52], %89 {strides = array<i32>} : memref<8x256xf32, #tpu.memory_space<vmem>>, vector<8x256xf32>,
    %c0_i32_53 = arith.constant 0 : i32
    %92 = arith.index_cast %c0_i32_53 : i32 to index
    %c0_54 = arith.constant 0 : index
    %93 = vector.load %arg21[%92, %c0_54] : memref<8x256xf32, #tpu.memory_space<vmem>>, vector<1x256xf32>
    %94 = vector.broadcast %93 : vector<1x256xf32> to vector<16x256xf32>
    %95 = arith.mulf %94, %90 : vector<16x256xf32>
    %96 = math.exp %95 : vector<16x256xf32>
    %97 = arith.index_cast %c0_i32_53 : i32 to index
    %c0_55 = arith.constant 0 : index
    %c0_56 = arith.constant 0 : index
    %98 = vector.load %arg20[%97, %c0_55, %c0_56] : memref<8x16x256xf32, #tpu.memory_space<vmem>>, vector<1x16x256xf32>
    %99 = vector.shape_cast %98 : vector<1x16x256xf32> to vector<16x256xf32>
    %100 = vector.shape_cast %96 : vector<16x256xf32> to vector<1x16x256xf32>
    tpu.vector_store %arg20[%97, %c0_55, %c0_56], %100 {strides = array<i32>} : memref<8x16x256xf32, #tpu.memory_space<vmem>>, vector<1x16x256xf32>,
    %c1_i32 = arith.constant 1 : i32
    %101 = arith.index_cast %c1_i32 : i32 to index
    %c0_57 = arith.constant 0 : index
    %102 = vector.load %arg21[%101, %c0_57] : memref<8x256xf32, #tpu.memory_space<vmem>>, vector<1x256xf32>
    %103 = vector.broadcast %102 : vector<1x256xf32> to vector<16x256xf32>
    %104 = arith.mulf %103, %90 : vector<16x256xf32>
    %105 = math.exp %104 : vector<16x256xf32>
    %106 = arith.index_cast %c1_i32 : i32 to index
    %c0_58 = arith.constant 0 : index
    %c0_59 = arith.constant 0 : index
    %107 = vector.load %arg20[%106, %c0_58, %c0_59] : memref<8x16x256xf32, #tpu.memory_space<vmem>>, vector<1x16x256xf32>
    %108 = vector.shape_cast %107 : vector<1x16x256xf32> to vector<16x256xf32>
    %109 = vector.shape_cast %105 : vector<16x256xf32> to vector<1x16x256xf32>
    tpu.vector_store %arg20[%106, %c0_58, %c0_59], %109 {strides = array<i32>} : memref<8x16x256xf32, #tpu.memory_space<vmem>>, vector<1x16x256xf32>,
    %c2_i32 = arith.constant 2 : i32
    %110 = arith.index_cast %c2_i32 : i32 to index
    %c0_60 = arith.constant 0 : index
    %111 = vector.load %arg21[%110, %c0_60] : memref<8x256xf32, #tpu.memory_space<vmem>>, vector<1x256xf32>
    %112 = vector.broadcast %111 : vector<1x256xf32> to vector<16x256xf32>
    %113 = arith.mulf %112, %90 : vector<16x256xf32>
    %114 = math.exp %113 : vector<16x256xf32>
    %115 = arith.index_cast %c2_i32 : i32 to index
    %c0_61 = arith.constant 0 : index
    %c0_62 = arith.constant 0 : index
    %116 = vector.load %arg20[%115, %c0_61, %c0_62] : memref<8x16x256xf32, #tpu.memory_space<vmem>>, vector<1x16x256xf32>
    %117 = vector.shape_cast %116 : vector<1x16x256xf32> to vector<16x256xf32>
    %118 = vector.shape_cast %114 : vector<16x256xf32> to vector<1x16x256xf32>
    tpu.vector_store %arg20[%115, %c0_61, %c0_62], %118 {strides = array<i32>} : memref<8x16x256xf32, #tpu.memory_space<vmem>>, vector<1x16x256xf32>,
    %c3_i32 = arith.constant 3 : i32
    %119 = arith.index_cast %c3_i32 : i32 to index
    %c0_63 = arith.constant 0 : index
    %120 = vector.load %arg21[%119, %c0_63] : memref<8x256xf32, #tpu.memory_space<vmem>>, vector<1x256xf32>
    %121 = vector.broadcast %120 : vector<1x256xf32> to vector<16x256xf32>
    %122 = arith.mulf %121, %90 : vector<16x256xf32>
    %123 = math.exp %122 : vector<16x256xf32>
    %124 = arith.index_cast %c3_i32 : i32 to index
    %c0_64 = arith.constant 0 : index
    %c0_65 = arith.constant 0 : index
    %125 = vector.load %arg20[%124, %c0_64, %c0_65] : memref<8x16x256xf32, #tpu.memory_space<vmem>>, vector<1x16x256xf32>
    %126 = vector.shape_cast %125 : vector<1x16x256xf32> to vector<16x256xf32>
    %127 = vector.shape_cast %123 : vector<16x256xf32> to vector<1x16x256xf32>
    tpu.vector_store %arg20[%124, %c0_64, %c0_65], %127 {strides = array<i32>} : memref<8x16x256xf32, #tpu.memory_space<vmem>>, vector<1x16x256xf32>,
    %c4_i32 = arith.constant 4 : i32
    %128 = arith.index_cast %c4_i32 : i32 to index
    %c0_66 = arith.constant 0 : index
    %129 = vector.load %arg21[%128, %c0_66] : memref<8x256xf32, #tpu.memory_space<vmem>>, vector<1x256xf32>
    %130 = vector.broadcast %129 : vector<1x256xf32> to vector<16x256xf32>
    %131 = arith.mulf %130, %90 : vector<16x256xf32>
    %132 = math.exp %131 : vector<16x256xf32>
    %133 = arith.index_cast %c4_i32 : i32 to index
    %c0_67 = arith.constant 0 : index
    %c0_68 = arith.constant 0 : index
    %134 = vector.load %arg20[%133, %c0_67, %c0_68] : memref<8x16x256xf32, #tpu.memory_space<vmem>>, vector<1x16x256xf32>
    %135 = vector.shape_cast %134 : vector<1x16x256xf32> to vector<16x256xf32>
    %136 = vector.shape_cast %132 : vector<16x256xf32> to vector<1x16x256xf32>
    tpu.vector_store %arg20[%133, %c0_67, %c0_68], %136 {strides = array<i32>} : memref<8x16x256xf32, #tpu.memory_space<vmem>>, vector<1x16x256xf32>,
    %c5_i32 = arith.constant 5 : i32
    %137 = arith.index_cast %c5_i32 : i32 to index
    %c0_69 = arith.constant 0 : index
    %138 = vector.load %arg21[%137, %c0_69] : memref<8x256xf32, #tpu.memory_space<vmem>>, vector<1x256xf32>
    %139 = vector.broadcast %138 : vector<1x256xf32> to vector<16x256xf32>
    %140 = arith.mulf %139, %90 : vector<16x256xf32>
    %141 = math.exp %140 : vector<16x256xf32>
    %142 = arith.index_cast %c5_i32 : i32 to index
    %c0_70 = arith.constant 0 : index
    %c0_71 = arith.constant 0 : index
    %143 = vector.load %arg20[%142, %c0_70, %c0_71] : memref<8x16x256xf32, #tpu.memory_space<vmem>>, vector<1x16x256xf32>
    %144 = vector.shape_cast %143 : vector<1x16x256xf32> to vector<16x256xf32>
    %145 = vector.shape_cast %141 : vector<16x256xf32> to vector<1x16x256xf32>
    tpu.vector_store %arg20[%142, %c0_70, %c0_71], %145 {strides = array<i32>} : memref<8x16x256xf32, #tpu.memory_space<vmem>>, vector<1x16x256xf32>,
    %c6_i32 = arith.constant 6 : i32
    %146 = arith.index_cast %c6_i32 : i32 to index
    %c0_72 = arith.constant 0 : index
    %147 = vector.load %arg21[%146, %c0_72] : memref<8x256xf32, #tpu.memory_space<vmem>>, vector<1x256xf32>
    %148 = vector.broadcast %147 : vector<1x256xf32> to vector<16x256xf32>
    %149 = arith.mulf %148, %90 : vector<16x256xf32>
    %150 = math.exp %149 : vector<16x256xf32>
    %151 = arith.index_cast %c6_i32 : i32 to index
    %c0_73 = arith.constant 0 : index
    %c0_74 = arith.constant 0 : index
    %152 = vector.load %arg20[%151, %c0_73, %c0_74] : memref<8x16x256xf32, #tpu.memory_space<vmem>>, vector<1x16x256xf32>
    %153 = vector.shape_cast %152 : vector<1x16x256xf32> to vector<16x256xf32>
    %154 = vector.shape_cast %150 : vector<16x256xf32> to vector<1x16x256xf32>
    tpu.vector_store %arg20[%151, %c0_73, %c0_74], %154 {strides = array<i32>} : memref<8x16x256xf32, #tpu.memory_space<vmem>>, vector<1x16x256xf32>,
    %c7_i32 = arith.constant 7 : i32
    %155 = arith.index_cast %c7_i32 : i32 to index
    %c0_75 = arith.constant 0 : index
    %156 = vector.load %arg21[%155, %c0_75] : memref<8x256xf32, #tpu.memory_space<vmem>>, vector<1x256xf32>
    %157 = vector.broadcast %156 : vector<1x256xf32> to vector<16x256xf32>
    %158 = arith.mulf %157, %90 : vector<16x256xf32>
    %159 = math.exp %158 : vector<16x256xf32>
    %160 = arith.index_cast %c7_i32 : i32 to index
    %c0_76 = arith.constant 0 : index
    %c0_77 = arith.constant 0 : index
    %161 = vector.load %arg20[%160, %c0_76, %c0_77] : memref<8x16x256xf32, #tpu.memory_space<vmem>>, vector<1x16x256xf32>
    %162 = vector.shape_cast %161 : vector<1x16x256xf32> to vector<16x256xf32>
    %163 = vector.shape_cast %159 : vector<16x256xf32> to vector<1x16x256xf32>
    tpu.vector_store %arg20[%160, %c0_76, %c0_77], %163 {strides = array<i32>} : memref<8x16x256xf32, #tpu.memory_space<vmem>>, vector<1x16x256xf32>,
    %c8_i32 = arith.constant 8 : i32
    %c0_78 = arith.constant 0 : index
    %c0_79 = arith.constant 0 : index
    %164 = vector.load %arg21[%c0_78, %c0_79] : memref<8x256xf32, #tpu.memory_space<vmem>>, vector<8x256xf32>
    %165 = arith.mulf %164, %69 : vector<8x256xf32>
    %c0_80 = arith.constant 0 : index
    %c0_81 = arith.constant 0 : index
    %166 = vector.load %arg21[%c0_80, %c0_81] : memref<8x256xf32, #tpu.memory_space<vmem>>, vector<8x256xf32>
    tpu.vector_store %arg21[%c0_80, %c0_81], %165 {strides = array<i32>} : memref<8x256xf32, #tpu.memory_space<vmem>>, vector<8x256xf32>,
    %167 = tpu.iota {dimensions = array<i32: 1>} : vector<32x8xi32>
    %c0_82 = arith.constant 0 : index
    %c0_83 = arith.constant 0 : index
    %168 = vector.load %arg18[%c0_82, %c0_83] : memref<16x256xf32, #tpu.memory_space<vmem>>, vector<16x256xf32>
    %c0_i32_84 = arith.constant 0 : i32
    %169 = vector.broadcast %c0_i32_84 : i32 to vector<32x8xi32>
    %170 = arith.cmpi eq, %167, %169 : vector<32x8xi32>
    %cst_85 = arith.constant 0.000000e+00 : f32
    %171 = vector.broadcast %cst_85 : f32 to vector<32x8xf32>
    %172 = arith.select %170, %74, %171 : vector<32x8xi1>, vector<32x8xf32>
    %cst_86 = arith.constant dense<0.000000e+00> : vector<32xf32>
    %173 = vector.multi_reduction <add>, %172, %cst_86 [1] : vector<32x8xf32> to vector<32xf32>
    %174 = vector.shape_cast %173 : vector<32xf32> to vector<32x1xf32>
    %175 = vector.extract_strided_slice %174 {offsets = [0, 0], sizes = [16, 1], strides = [1, 1]} : vector<32x1xf32> to vector<16x1xf32>
    %176 = vector.extract_strided_slice %174 {offsets = [16, 0], sizes = [16, 1], strides = [1, 1]} : vector<32x1xf32> to vector<16x1xf32>
    %177 = arith.index_cast %c0_i32_84 : i32 to index
    %c0_87 = arith.constant 0 : index
    %c0_88 = arith.constant 0 : index
    %178 = vector.load %arg20[%177, %c0_87, %c0_88] : memref<8x16x256xf32, #tpu.memory_space<vmem>>, vector<1x16x256xf32>
    %179 = vector.shape_cast %178 : vector<1x16x256xf32> to vector<16x256xf32>
    %180 = arith.mulf %179, %168 : vector<16x256xf32>
    %181 = arith.index_cast %c0_i32_84 : i32 to index
    %c0_89 = arith.constant 0 : index
    %182 = vector.load %arg21[%181, %c0_89] : memref<8x256xf32, #tpu.memory_space<vmem>>, vector<1x256xf32>
    %183 = vector.broadcast %175 : vector<16x1xf32> to vector<16x256xf32>
    %184 = vector.broadcast %182 : vector<1x256xf32> to vector<16x256xf32>
    %185 = arith.mulf %183, %184 : vector<16x256xf32>
    %186 = arith.addf %180, %185 : vector<16x256xf32>
    %187 = vector.broadcast %176 : vector<16x1xf32> to vector<16x256xf32>
    %188 = arith.mulf %187, %186 : vector<16x256xf32>
    %cst_90 = arith.constant dense<0.000000e+00> : vector<256xf32>
    %189 = vector.multi_reduction <add>, %188, %cst_90 [0] : vector<16x256xf32> to vector<256xf32>
    %190 = vector.shape_cast %189 : vector<256xf32> to vector<1x256xf32>
    %191 = arith.index_cast %c0_i32_84 : i32 to index
    %c0_91 = arith.constant 0 : index
    %192 = vector.load %arg22[%191, %c0_91] : memref<8x256xf32, #tpu.memory_space<vmem>>, vector<1x256xf32>
    tpu.vector_store %arg22[%191, %c0_91], %190 {strides = array<i32>} : memref<8x256xf32, #tpu.memory_space<vmem>>, vector<1x256xf32>,
    %c1_i32_92 = arith.constant 1 : i32
    %193 = vector.broadcast %c1_i32_92 : i32 to vector<32x8xi32>
    %194 = arith.cmpi eq, %167, %193 : vector<32x8xi32>
    %cst_93 = arith.constant 0.000000e+00 : f32
    %195 = vector.broadcast %cst_93 : f32 to vector<32x8xf32>
    %196 = arith.select %194, %74, %195 : vector<32x8xi1>, vector<32x8xf32>
    %cst_94 = arith.constant dense<0.000000e+00> : vector<32xf32>
    %197 = vector.multi_reduction <add>, %196, %cst_94 [1] : vector<32x8xf32> to vector<32xf32>
    %198 = vector.shape_cast %197 : vector<32xf32> to vector<32x1xf32>
    %199 = vector.extract_strided_slice %198 {offsets = [0, 0], sizes = [16, 1], strides = [1, 1]} : vector<32x1xf32> to vector<16x1xf32>
    %200 = vector.extract_strided_slice %198 {offsets = [16, 0], sizes = [16, 1], strides = [1, 1]} : vector<32x1xf32> to vector<16x1xf32>
    %201 = arith.index_cast %c1_i32_92 : i32 to index
    %c0_95 = arith.constant 0 : index
    %c0_96 = arith.constant 0 : index
    %202 = vector.load %arg20[%201, %c0_95, %c0_96] : memref<8x16x256xf32, #tpu.memory_space<vmem>>, vector<1x16x256xf32>
    %203 = vector.shape_cast %202 : vector<1x16x256xf32> to vector<16x256xf32>
    %204 = arith.mulf %203, %186 : vector<16x256xf32>
    %205 = arith.index_cast %c1_i32_92 : i32 to index
    %c0_97 = arith.constant 0 : index
    %206 = vector.load %arg21[%205, %c0_97] : memref<8x256xf32, #tpu.memory_space<vmem>>, vector<1x256xf32>
    %207 = vector.broadcast %199 : vector<16x1xf32> to vector<16x256xf32>
    %208 = vector.broadcast %206 : vector<1x256xf32> to vector<16x256xf32>
    %209 = arith.mulf %207, %208 : vector<16x256xf32>
    %210 = arith.addf %204, %209 : vector<16x256xf32>
    %211 = vector.broadcast %200 : vector<16x1xf32> to vector<16x256xf32>
    %212 = arith.mulf %211, %210 : vector<16x256xf32>
    %cst_98 = arith.constant dense<0.000000e+00> : vector<256xf32>
    %213 = vector.multi_reduction <add>, %212, %cst_98 [0] : vector<16x256xf32> to vector<256xf32>
    %214 = vector.shape_cast %213 : vector<256xf32> to vector<1x256xf32>
    %215 = arith.index_cast %c1_i32_92 : i32 to index
    %c0_99 = arith.constant 0 : index
    %216 = vector.load %arg22[%215, %c0_99] : memref<8x256xf32, #tpu.memory_space<vmem>>, vector<1x256xf32>
    tpu.vector_store %arg22[%215, %c0_99], %214 {strides = array<i32>} : memref<8x256xf32, #tpu.memory_space<vmem>>, vector<1x256xf32>,
    %c2_i32_100 = arith.constant 2 : i32
    %217 = vector.broadcast %c2_i32_100 : i32 to vector<32x8xi32>
    %218 = arith.cmpi eq, %167, %217 : vector<32x8xi32>
    %cst_101 = arith.constant 0.000000e+00 : f32
    %219 = vector.broadcast %cst_101 : f32 to vector<32x8xf32>
    %220 = arith.select %218, %74, %219 : vector<32x8xi1>, vector<32x8xf32>
    %cst_102 = arith.constant dense<0.000000e+00> : vector<32xf32>
    %221 = vector.multi_reduction <add>, %220, %cst_102 [1] : vector<32x8xf32> to vector<32xf32>
    %222 = vector.shape_cast %221 : vector<32xf32> to vector<32x1xf32>
    %223 = vector.extract_strided_slice %222 {offsets = [0, 0], sizes = [16, 1], strides = [1, 1]} : vector<32x1xf32> to vector<16x1xf32>
    %224 = vector.extract_strided_slice %222 {offsets = [16, 0], sizes = [16, 1], strides = [1, 1]} : vector<32x1xf32> to vector<16x1xf32>
    %225 = arith.index_cast %c2_i32_100 : i32 to index
    %c0_103 = arith.constant 0 : index
    %c0_104 = arith.constant 0 : index
    %226 = vector.load %arg20[%225, %c0_103, %c0_104] : memref<8x16x256xf32, #tpu.memory_space<vmem>>, vector<1x16x256xf32>
    %227 = vector.shape_cast %226 : vector<1x16x256xf32> to vector<16x256xf32>
    %228 = arith.mulf %227, %210 : vector<16x256xf32>
    %229 = arith.index_cast %c2_i32_100 : i32 to index
    %c0_105 = arith.constant 0 : index
    %230 = vector.load %arg21[%229, %c0_105] : memref<8x256xf32, #tpu.memory_space<vmem>>, vector<1x256xf32>
    %231 = vector.broadcast %223 : vector<16x1xf32> to vector<16x256xf32>
    %232 = vector.broadcast %230 : vector<1x256xf32> to vector<16x256xf32>
    %233 = arith.mulf %231, %232 : vector<16x256xf32>
    %234 = arith.addf %228, %233 : vector<16x256xf32>
    %235 = vector.broadcast %224 : vector<16x1xf32> to vector<16x256xf32>
    %236 = arith.mulf %235, %234 : vector<16x256xf32>
    %cst_106 = arith.constant dense<0.000000e+00> : vector<256xf32>
    %237 = vector.multi_reduction <add>, %236, %cst_106 [0] : vector<16x256xf32> to vector<256xf32>
    %238 = vector.shape_cast %237 : vector<256xf32> to vector<1x256xf32>
    %239 = arith.index_cast %c2_i32_100 : i32 to index
    %c0_107 = arith.constant 0 : index
    %240 = vector.load %arg22[%239, %c0_107] : memref<8x256xf32, #tpu.memory_space<vmem>>, vector<1x256xf32>
    tpu.vector_store %arg22[%239, %c0_107], %238 {strides = array<i32>} : memref<8x256xf32, #tpu.memory_space<vmem>>, vector<1x256xf32>,
    %c3_i32_108 = arith.constant 3 : i32
    %241 = vector.broadcast %c3_i32_108 : i32 to vector<32x8xi32>
    %242 = arith.cmpi eq, %167, %241 : vector<32x8xi32>
    %cst_109 = arith.constant 0.000000e+00 : f32
    %243 = vector.broadcast %cst_109 : f32 to vector<32x8xf32>
    %244 = arith.select %242, %74, %243 : vector<32x8xi1>, vector<32x8xf32>
    %cst_110 = arith.constant dense<0.000000e+00> : vector<32xf32>
    %245 = vector.multi_reduction <add>, %244, %cst_110 [1] : vector<32x8xf32> to vector<32xf32>
    %246 = vector.shape_cast %245 : vector<32xf32> to vector<32x1xf32>
    %247 = vector.extract_strided_slice %246 {offsets = [0, 0], sizes = [16, 1], strides = [1, 1]} : vector<32x1xf32> to vector<16x1xf32>
    %248 = vector.extract_strided_slice %246 {offsets = [16, 0], sizes = [16, 1], strides = [1, 1]} : vector<32x1xf32> to vector<16x1xf32>
    %249 = arith.index_cast %c3_i32_108 : i32 to index
    %c0_111 = arith.constant 0 : index
    %c0_112 = arith.constant 0 : index
    %250 = vector.load %arg20[%249, %c0_111, %c0_112] : memref<8x16x256xf32, #tpu.memory_space<vmem>>, vector<1x16x256xf32>
    %251 = vector.shape_cast %250 : vector<1x16x256xf32> to vector<16x256xf32>
    %252 = arith.mulf %251, %234 : vector<16x256xf32>
    %253 = arith.index_cast %c3_i32_108 : i32 to index
    %c0_113 = arith.constant 0 : index
    %254 = vector.load %arg21[%253, %c0_113] : memref<8x256xf32, #tpu.memory_space<vmem>>, vector<1x256xf32>
    %255 = vector.broadcast %247 : vector<16x1xf32> to vector<16x256xf32>
    %256 = vector.broadcast %254 : vector<1x256xf32> to vector<16x256xf32>
    %257 = arith.mulf %255, %256 : vector<16x256xf32>
    %258 = arith.addf %252, %257 : vector<16x256xf32>
    %259 = vector.broadcast %248 : vector<16x1xf32> to vector<16x256xf32>
    %260 = arith.mulf %259, %258 : vector<16x256xf32>
    %cst_114 = arith.constant dense<0.000000e+00> : vector<256xf32>
    %261 = vector.multi_reduction <add>, %260, %cst_114 [0] : vector<16x256xf32> to vector<256xf32>
    %262 = vector.shape_cast %261 : vector<256xf32> to vector<1x256xf32>
    %263 = arith.index_cast %c3_i32_108 : i32 to index
    %c0_115 = arith.constant 0 : index
    %264 = vector.load %arg22[%263, %c0_115] : memref<8x256xf32, #tpu.memory_space<vmem>>, vector<1x256xf32>
    tpu.vector_store %arg22[%263, %c0_115], %262 {strides = array<i32>} : memref<8x256xf32, #tpu.memory_space<vmem>>, vector<1x256xf32>,
    %c4_i32_116 = arith.constant 4 : i32
    %265 = vector.broadcast %c4_i32_116 : i32 to vector<32x8xi32>
    %266 = arith.cmpi eq, %167, %265 : vector<32x8xi32>
    %cst_117 = arith.constant 0.000000e+00 : f32
    %267 = vector.broadcast %cst_117 : f32 to vector<32x8xf32>
    %268 = arith.select %266, %74, %267 : vector<32x8xi1>, vector<32x8xf32>
    %cst_118 = arith.constant dense<0.000000e+00> : vector<32xf32>
    %269 = vector.multi_reduction <add>, %268, %cst_118 [1] : vector<32x8xf32> to vector<32xf32>
    %270 = vector.shape_cast %269 : vector<32xf32> to vector<32x1xf32>
    %271 = vector.extract_strided_slice %270 {offsets = [0, 0], sizes = [16, 1], strides = [1, 1]} : vector<32x1xf32> to vector<16x1xf32>
    %272 = vector.extract_strided_slice %270 {offsets = [16, 0], sizes = [16, 1], strides = [1, 1]} : vector<32x1xf32> to vector<16x1xf32>
    %273 = arith.index_cast %c4_i32_116 : i32 to index
    %c0_119 = arith.constant 0 : index
    %c0_120 = arith.constant 0 : index
    %274 = vector.load %arg20[%273, %c0_119, %c0_120] : memref<8x16x256xf32, #tpu.memory_space<vmem>>, vector<1x16x256xf32>
    %275 = vector.shape_cast %274 : vector<1x16x256xf32> to vector<16x256xf32>
    %276 = arith.mulf %275, %258 : vector<16x256xf32>
    %277 = arith.index_cast %c4_i32_116 : i32 to index
    %c0_121 = arith.constant 0 : index
    %278 = vector.load %arg21[%277, %c0_121] : memref<8x256xf32, #tpu.memory_space<vmem>>, vector<1x256xf32>
    %279 = vector.broadcast %271 : vector<16x1xf32> to vector<16x256xf32>
    %280 = vector.broadcast %278 : vector<1x256xf32> to vector<16x256xf32>
    %281 = arith.mulf %279, %280 : vector<16x256xf32>
    %282 = arith.addf %276, %281 : vector<16x256xf32>
    %283 = vector.broadcast %272 : vector<16x1xf32> to vector<16x256xf32>
    %284 = arith.mulf %283, %282 : vector<16x256xf32>
    %cst_122 = arith.constant dense<0.000000e+00> : vector<256xf32>
    %285 = vector.multi_reduction <add>, %284, %cst_122 [0] : vector<16x256xf32> to vector<256xf32>
    %286 = vector.shape_cast %285 : vector<256xf32> to vector<1x256xf32>
    %287 = arith.index_cast %c4_i32_116 : i32 to index
    %c0_123 = arith.constant 0 : index
    %288 = vector.load %arg22[%287, %c0_123] : memref<8x256xf32, #tpu.memory_space<vmem>>, vector<1x256xf32>
    tpu.vector_store %arg22[%287, %c0_123], %286 {strides = array<i32>} : memref<8x256xf32, #tpu.memory_space<vmem>>, vector<1x256xf32>,
    %c5_i32_124 = arith.constant 5 : i32
    %289 = vector.broadcast %c5_i32_124 : i32 to vector<32x8xi32>
    %290 = arith.cmpi eq, %167, %289 : vector<32x8xi32>
    %cst_125 = arith.constant 0.000000e+00 : f32
    %291 = vector.broadcast %cst_125 : f32 to vector<32x8xf32>
    %292 = arith.select %290, %74, %291 : vector<32x8xi1>, vector<32x8xf32>
    %cst_126 = arith.constant dense<0.000000e+00> : vector<32xf32>
    %293 = vector.multi_reduction <add>, %292, %cst_126 [1] : vector<32x8xf32> to vector<32xf32>
    %294 = vector.shape_cast %293 : vector<32xf32> to vector<32x1xf32>
    %295 = vector.extract_strided_slice %294 {offsets = [0, 0], sizes = [16, 1], strides = [1, 1]} : vector<32x1xf32> to vector<16x1xf32>
    %296 = vector.extract_strided_slice %294 {offsets = [16, 0], sizes = [16, 1], strides = [1, 1]} : vector<32x1xf32> to vector<16x1xf32>
    %297 = arith.index_cast %c5_i32_124 : i32 to index
    %c0_127 = arith.constant 0 : index
    %c0_128 = arith.constant 0 : index
    %298 = vector.load %arg20[%297, %c0_127, %c0_128] : memref<8x16x256xf32, #tpu.memory_space<vmem>>, vector<1x16x256xf32>
    %299 = vector.shape_cast %298 : vector<1x16x256xf32> to vector<16x256xf32>
    %300 = arith.mulf %299, %282 : vector<16x256xf32>
    %301 = arith.index_cast %c5_i32_124 : i32 to index
    %c0_129 = arith.constant 0 : index
    %302 = vector.load %arg21[%301, %c0_129] : memref<8x256xf32, #tpu.memory_space<vmem>>, vector<1x256xf32>
    %303 = vector.broadcast %295 : vector<16x1xf32> to vector<16x256xf32>
    %304 = vector.broadcast %302 : vector<1x256xf32> to vector<16x256xf32>
    %305 = arith.mulf %303, %304 : vector<16x256xf32>
    %306 = arith.addf %300, %305 : vector<16x256xf32>
    %307 = vector.broadcast %296 : vector<16x1xf32> to vector<16x256xf32>
    %308 = arith.mulf %307, %306 : vector<16x256xf32>
    %cst_130 = arith.constant dense<0.000000e+00> : vector<256xf32>
    %309 = vector.multi_reduction <add>, %308, %cst_130 [0] : vector<16x256xf32> to vector<256xf32>
    %310 = vector.shape_cast %309 : vector<256xf32> to vector<1x256xf32>
    %311 = arith.index_cast %c5_i32_124 : i32 to index
    %c0_131 = arith.constant 0 : index
    %312 = vector.load %arg22[%311, %c0_131] : memref<8x256xf32, #tpu.memory_space<vmem>>, vector<1x256xf32>
    tpu.vector_store %arg22[%311, %c0_131], %310 {strides = array<i32>} : memref<8x256xf32, #tpu.memory_space<vmem>>, vector<1x256xf32>,
    %c6_i32_132 = arith.constant 6 : i32
    %313 = vector.broadcast %c6_i32_132 : i32 to vector<32x8xi32>
    %314 = arith.cmpi eq, %167, %313 : vector<32x8xi32>
    %cst_133 = arith.constant 0.000000e+00 : f32
    %315 = vector.broadcast %cst_133 : f32 to vector<32x8xf32>
    %316 = arith.select %314, %74, %315 : vector<32x8xi1>, vector<32x8xf32>
    %cst_134 = arith.constant dense<0.000000e+00> : vector<32xf32>
    %317 = vector.multi_reduction <add>, %316, %cst_134 [1] : vector<32x8xf32> to vector<32xf32>
    %318 = vector.shape_cast %317 : vector<32xf32> to vector<32x1xf32>
    %319 = vector.extract_strided_slice %318 {offsets = [0, 0], sizes = [16, 1], strides = [1, 1]} : vector<32x1xf32> to vector<16x1xf32>
    %320 = vector.extract_strided_slice %318 {offsets = [16, 0], sizes = [16, 1], strides = [1, 1]} : vector<32x1xf32> to vector<16x1xf32>
    %321 = arith.index_cast %c6_i32_132 : i32 to index
    %c0_135 = arith.constant 0 : index
    %c0_136 = arith.constant 0 : index
    %322 = vector.load %arg20[%321, %c0_135, %c0_136] : memref<8x16x256xf32, #tpu.memory_space<vmem>>, vector<1x16x256xf32>
    %323 = vector.shape_cast %322 : vector<1x16x256xf32> to vector<16x256xf32>
    %324 = arith.mulf %323, %306 : vector<16x256xf32>
    %325 = arith.index_cast %c6_i32_132 : i32 to index
    %c0_137 = arith.constant 0 : index
    %326 = vector.load %arg21[%325, %c0_137] : memref<8x256xf32, #tpu.memory_space<vmem>>, vector<1x256xf32>
    %327 = vector.broadcast %319 : vector<16x1xf32> to vector<16x256xf32>
    %328 = vector.broadcast %326 : vector<1x256xf32> to vector<16x256xf32>
    %329 = arith.mulf %327, %328 : vector<16x256xf32>
    %330 = arith.addf %324, %329 : vector<16x256xf32>
    %331 = vector.broadcast %320 : vector<16x1xf32> to vector<16x256xf32>
    %332 = arith.mulf %331, %330 : vector<16x256xf32>
    %cst_138 = arith.constant dense<0.000000e+00> : vector<256xf32>
    %333 = vector.multi_reduction <add>, %332, %cst_138 [0] : vector<16x256xf32> to vector<256xf32>
    %334 = vector.shape_cast %333 : vector<256xf32> to vector<1x256xf32>
    %335 = arith.index_cast %c6_i32_132 : i32 to index
    %c0_139 = arith.constant 0 : index
    %336 = vector.load %arg22[%335, %c0_139] : memref<8x256xf32, #tpu.memory_space<vmem>>, vector<1x256xf32>
    tpu.vector_store %arg22[%335, %c0_139], %334 {strides = array<i32>} : memref<8x256xf32, #tpu.memory_space<vmem>>, vector<1x256xf32>,
    %c7_i32_140 = arith.constant 7 : i32
    %337 = vector.broadcast %c7_i32_140 : i32 to vector<32x8xi32>
    %338 = arith.cmpi eq, %167, %337 : vector<32x8xi32>
    %cst_141 = arith.constant 0.000000e+00 : f32
    %339 = vector.broadcast %cst_141 : f32 to vector<32x8xf32>
    %340 = arith.select %338, %74, %339 : vector<32x8xi1>, vector<32x8xf32>
    %cst_142 = arith.constant dense<0.000000e+00> : vector<32xf32>
    %341 = vector.multi_reduction <add>, %340, %cst_142 [1] : vector<32x8xf32> to vector<32xf32>
    %342 = vector.shape_cast %341 : vector<32xf32> to vector<32x1xf32>
    %343 = vector.extract_strided_slice %342 {offsets = [0, 0], sizes = [16, 1], strides = [1, 1]} : vector<32x1xf32> to vector<16x1xf32>
    %344 = vector.extract_strided_slice %342 {offsets = [16, 0], sizes = [16, 1], strides = [1, 1]} : vector<32x1xf32> to vector<16x1xf32>
    %345 = arith.index_cast %c7_i32_140 : i32 to index
    %c0_143 = arith.constant 0 : index
    %c0_144 = arith.constant 0 : index
    %346 = vector.load %arg20[%345, %c0_143, %c0_144] : memref<8x16x256xf32, #tpu.memory_space<vmem>>, vector<1x16x256xf32>
    %347 = vector.shape_cast %346 : vector<1x16x256xf32> to vector<16x256xf32>
    %348 = arith.mulf %347, %330 : vector<16x256xf32>
    %349 = arith.index_cast %c7_i32_140 : i32 to index
    %c0_145 = arith.constant 0 : index
    %350 = vector.load %arg21[%349, %c0_145] : memref<8x256xf32, #tpu.memory_space<vmem>>, vector<1x256xf32>
    %351 = vector.broadcast %343 : vector<16x1xf32> to vector<16x256xf32>
    %352 = vector.broadcast %350 : vector<1x256xf32> to vector<16x256xf32>
    %353 = arith.mulf %351, %352 : vector<16x256xf32>
    %354 = arith.addf %348, %353 : vector<16x256xf32>
    %355 = vector.broadcast %344 : vector<16x1xf32> to vector<16x256xf32>
    %356 = arith.mulf %355, %354 : vector<16x256xf32>
    %cst_146 = arith.constant dense<0.000000e+00> : vector<256xf32>
    %357 = vector.multi_reduction <add>, %356, %cst_146 [0] : vector<16x256xf32> to vector<256xf32>
    %358 = vector.shape_cast %357 : vector<256xf32> to vector<1x256xf32>
    %359 = arith.index_cast %c7_i32_140 : i32 to index
    %c0_147 = arith.constant 0 : index
    %360 = vector.load %arg22[%359, %c0_147] : memref<8x256xf32, #tpu.memory_space<vmem>>, vector<1x256xf32>
    tpu.vector_store %arg22[%359, %c0_147], %358 {strides = array<i32>} : memref<8x256xf32, #tpu.memory_space<vmem>>, vector<1x256xf32>,
    %c8_i32_148 = arith.constant 8 : i32
    %c0_149 = arith.constant 0 : index
    %c0_150 = arith.constant 0 : index
    %361 = vector.load %arg18[%c0_149, %c0_150] : memref<16x256xf32, #tpu.memory_space<vmem>>, vector<16x256xf32>
    tpu.vector_store %arg18[%c0_149, %c0_150], %354 {strides = array<i32>} : memref<16x256xf32, #tpu.memory_space<vmem>>, vector<16x256xf32>,
    %c0_151 = arith.constant 0 : index
    %c0_152 = arith.constant 0 : index
    %362 = vector.load %arg22[%c0_151, %c0_152] : memref<8x256xf32, #tpu.memory_space<vmem>>, vector<8x256xf32>
    %c0_153 = arith.constant 0 : index
    %c0_154 = arith.constant 0 : index
    %363 = vector.load %arg14[%c0_153, %c0_154] : memref<1x256xf32, #tpu.memory_space<vmem>>, vector<1x256xf32>
    %364 = vector.broadcast %363 : vector<1x256xf32> to vector<8x256xf32>
    %365 = arith.mulf %69, %364 : vector<8x256xf32>
    %366 = arith.addf %362, %365 : vector<8x256xf32>
    %cst_155 = arith.constant 0.000000e+00 : f32
    %367 = vector.broadcast %cst_155 : f32 to vector<8x256xf32>
    %368 = arith.subf %367, %37 : vector<8x256xf32>
    %369 = math.exp %368 : vector<8x256xf32>
    %cst_156 = arith.constant 1.000000e+00 : f32
    %370 = vector.broadcast %cst_156 : f32 to vector<8x256xf32>
    %371 = arith.addf %370, %369 : vector<8x256xf32>
    %cst_157 = arith.constant 1.000000e+00 : f32
    %372 = vector.broadcast %cst_157 : f32 to vector<8x256xf32>
    %373 = arith.divf %372, %371 : vector<8x256xf32>
    %374 = arith.mulf %37, %373 : vector<8x256xf32>
    %375 = arith.mulf %366, %374 : vector<8x256xf32>
    %376 = arith.truncf %375 : vector<8x256xf32> to vector<8x256xbf16>
    %c0_158 = arith.constant 0 : index
    %c0_159 = arith.constant 0 : index
    %377 = vector.load %arg15[%c0_158, %c0_159] : memref<256x128xbf16, #tpu.memory_space<vmem>>, vector<256x128xbf16>
    %cst_160 = arith.constant dense<0.000000e+00> : vector<8x128xf32>
    %378 = tpu.matmul %376, %377, %cst_160 {dimension_numbers = #tpu.dot_dimension_numbers<[1], [0], [0], [1], [0, 0, 1, 1], [], []>} : vector<8x256xbf16>, vector<256x128xbf16>, vector<8x128xf32> -> vector<8x128xf32>
    %c0_161 = arith.constant 0 : index
    %c0_162 = arith.constant 0 : index
    %c0_163 = arith.constant 0 : index
    %379 = vector.load %arg16[%c0_161, %c0_162, %c0_163] : memref<1x8x128xf32, #tpu.memory_space<vmem>>, vector<1x8x128xf32>
    %380 = vector.shape_cast %379 : vector<1x8x128xf32> to vector<8x128xf32>
    %381 = vector.shape_cast %378 : vector<8x128xf32> to vector<1x8x128xf32>
    tpu.vector_store %arg16[%c0_161, %c0_162, %c0_163], %381 {strides = array<i32>} : memref<1x8x128xf32, #tpu.memory_space<vmem>>, vector<1x8x128xf32>,
    return
  }
  func.func @transform_0(%arg0: i32, %arg1: i32) -> (i32, i32, i32) {
    %c0_i32 = arith.constant 0 : i32
    %c0_i32_0 = arith.constant 0 : i32
    return %arg0, %arg1, %c0_i32 : i32, i32, i32
  }
  func.func @transform_1(%arg0: i32, %arg1: i32) -> (i32, i32, i32) {
    %c0_i32 = arith.constant 0 : i32
    %c0_i32_0 = arith.constant 0 : i32
    return %arg0, %arg1, %c0_i32 : i32, i32, i32
  }
  func.func @transform_2(%arg0: i32, %arg1: i32) -> (i32, i32) {
    %c0_i32 = arith.constant 0 : i32
    %c0_i32_0 = arith.constant 0 : i32
    %c0_i32_1 = arith.constant 0 : i32
    return %c0_i32, %c0_i32_0 : i32, i32
  }
  func.func @transform_3(%arg0: i32, %arg1: i32) -> (i32, i32) {
    %c0_i32 = arith.constant 0 : i32
    %c0_i32_0 = arith.constant 0 : i32
    %c0_i32_1 = arith.constant 0 : i32
    return %c0_i32, %c0_i32_0 : i32, i32
  }
  func.func @transform_4(%arg0: i32, %arg1: i32) -> (i32, i32) {
    %c0_i32 = arith.constant 0 : i32
    %c0_i32_0 = arith.constant 0 : i32
    %c0_i32_1 = arith.constant 0 : i32
    return %c0_i32, %c0_i32_0 : i32, i32
  }
  func.func @transform_5(%arg0: i32, %arg1: i32) -> (i32, i32) {
    %c0_i32 = arith.constant 0 : i32
    %c0_i32_0 = arith.constant 0 : i32
    %c0_i32_1 = arith.constant 0 : i32
    return %c0_i32, %c0_i32_0 : i32, i32
  }
  func.func @transform_6(%arg0: i32, %arg1: i32) -> (i32, i32) {
    %c0_i32 = arith.constant 0 : i32
    %c0_i32_0 = arith.constant 0 : i32
    %c0_i32_1 = arith.constant 0 : i32
    return %c0_i32, %c0_i32_0 : i32, i32
  }
  func.func @transform_7(%arg0: i32, %arg1: i32) -> (i32, i32) {
    %c0_i32 = arith.constant 0 : i32
    %c0_i32_0 = arith.constant 0 : i32
    %c0_i32_1 = arith.constant 0 : i32
    return %c0_i32, %c0_i32_0 : i32, i32
  }
  func.func @transform_8(%arg0: i32, %arg1: i32) -> (i32, i32) {
    %c0_i32 = arith.constant 0 : i32
    %c0_i32_0 = arith.constant 0 : i32
    %c0_i32_1 = arith.constant 0 : i32
    return %c0_i32, %c0_i32_0 : i32, i32
  }
  func.func @transform_9(%arg0: i32, %arg1: i32) -> (i32, i32) {
    %c0_i32 = arith.constant 0 : i32
    %c0_i32_0 = arith.constant 0 : i32
    %c0_i32_1 = arith.constant 0 : i32
    return %c0_i32, %c0_i32_0 : i32, i32
  }
  func.func @transform_10(%arg0: i32, %arg1: i32) -> (i32, i32) {
    %c0_i32 = arith.constant 0 : i32
    %c0_i32_0 = arith.constant 0 : i32
    %c0_i32_1 = arith.constant 0 : i32
    return %c0_i32, %c0_i32_0 : i32, i32
  }
  func.func @transform_11(%arg0: i32, %arg1: i32) -> (i32, i32) {
    %c0_i32 = arith.constant 0 : i32
    %c0_i32_0 = arith.constant 0 : i32
    %c0_i32_1 = arith.constant 0 : i32
    return %c0_i32, %c0_i32_0 : i32, i32
  }
  func.func @transform_12(%arg0: i32, %arg1: i32) -> (i32, i32) {
    %c0_i32 = arith.constant 0 : i32
    %c0_i32_0 = arith.constant 0 : i32
    %c0_i32_1 = arith.constant 0 : i32
    return %c0_i32, %c0_i32_0 : i32, i32
  }
  func.func @transform_13(%arg0: i32, %arg1: i32) -> (i32, i32) {
    %c0_i32 = arith.constant 0 : i32
    %c0_i32_0 = arith.constant 0 : i32
    %c0_i32_1 = arith.constant 0 : i32
    return %c0_i32, %c0_i32_0 : i32, i32
  }
  func.func @transform_14(%arg0: i32, %arg1: i32) -> (i32, i32, i32) {
    %c0_i32 = arith.constant 0 : i32
    %c0_i32_0 = arith.constant 0 : i32
    return %arg0, %arg1, %c0_i32 : i32, i32, i32
  }
  func.func @transform_15(%arg0: i32, %arg1: i32) -> (i32, i32, i32) {
    %c0_i32 = arith.constant 0 : i32
    %c0_i32_0 = arith.constant 0 : i32
    return %arg0, %arg1, %c0_i32 : i32, i32, i32
  }
}

</mosaic_0001>

<bundles_post_ra>
// kernel: tpu_custom_call.1
= control target key start
LH: loop header
LB: loop body
LE: loop exit
PB: predicated region body
PF: predicated region fallthrough
CT: control target
= control target key end

     0   :  { %s4676_s0 = inlined_call_operand.hbm [shape: f32[2,16,128], index: 0, kind: input, shape index: {}]   ;;  %s4677_s1 = inlined_call_operand.hbm [shape: f32[2,16,128], index: 1, kind: input, shape index: {}]   ;;  %s4678_s2 = inlined_call_operand.hbm [shape: f32[1,128], index: 2, kind: input, shape index: {}]   ;;  %s4679_s3 = inlined_call_operand.hbm [shape: f32[1,128], index: 3, kind: input, shape index: {}]   ;;  %s4680_s4 = inlined_call_operand.hbm [shape: bf16[128,512], index: 4, kind: input, shape index: {}]   ;;  %s4681_s5 = inlined_call_operand.vmem [shape: f32[4,256], index: 5, kind: input, shape index: {}]   ;;  %s4682_s6 = inlined_call_operand.vmem [shape: f32[1,256], index: 6, kind: input, shape index: {}]   ;;  %s4683_s7 = inlined_call_operand.vmem [shape: bf16[256,8], index: 7, kind: input, shape index: {}]   ;;  %s4684_s8 = inlined_call_operand.hbm [shape: bf16[32,256], index: 8, kind: input, shape index: {}]   ;;  %s4685_s9 = inlined_call_operand.vmem [shape: bf16[8,256], index: 9, kind: input, shape index: {}]   ;;  %s4686_s10 = inlined_call_operand.vmem [shape: f32[1,256], index: 10, kind: input, shape index: {}]   ;;  %s4687_s11 = inlined_call_operand.hbm [shape: f32[16,256], index: 11, kind: input, shape index: {}]   ;;  %s4688_s12 = inlined_call_operand.hbm [shape: f32[1,256], index: 12, kind: input, shape index: {}]   ;;  %s4689_s13 = inlined_call_operand.vmem [shape: bf16[256,128], index: 13, kind: input, shape index: {}]   ;;  %s4690_s14 = inlined_call_operand.hbm [shape: f32[2,16,128], index: 14, kind: output, shape index: {0}]   ;;  %s4691_s15 = inlined_call_operand.hbm [shape: f32[2,16,128], index: 15, kind: output, shape index: {1}]  }
   0x1   :  { %4716 = sst [smem:[#allocation53_spill]] %s4678_s2 }
   0x2   :  { %4717 = sst [smem:[#allocation54_spill]] %s4679_s3 }
   0x3   :  { %4718 = sst [smem:[#allocation55_spill]] %s4680_s4 }
   0x4   :  { %4719 = sst [smem:[#allocation56_spill]] %s4681_s5 }
   0x5   :  { %4720 = sst [smem:[#allocation57_spill]] %s4682_s6 }
   0x6   :  { %4721 = sst [smem:[#allocation58_spill]] %s4684_s8 }
   0x7   :  { %4722 = sst [smem:[#allocation59_spill]] %s4685_s9 }
   0x8   :  { %4723 = sst [smem:[#allocation60_spill]] %s4686_s10 }
   0x9   :  { %4724 = sst [smem:[#allocation61_spill]] %s4687_s11 }
   0xa   :  { %4725 = sst [smem:[#allocation62_spill]] %s4688_s12 }
   0xb   :  { %4726 = sst [smem:[#allocation63_spill]] %s4689_s13 }
   0xc   :  { %4727 = sst [smem:[#allocation64_spill]] %s4690_s14 }
   0xd   :  { %4728 = sst [smem:[#allocation65_spill]] %s4691_s15 }
   0xe   :  { %21 = vsyncpa [#allocation8], 0 }
   0xf   :  { %23 = vsyncpa [#allocation8 + $0x1], 0 }
  0x10   :  { %24 = vsyncpa [#allocation11], 0 }
  0x11   :  { %26 = vsyncpa [#allocation11 + $0x1], 0 }
  0x12   :  { %27 = vsyncpa [#allocation14], 0 }
  0x13   :  { %28 = vsyncpa [#allocation17], 0 }
  0x14   :  { %29 = vsyncpa [#allocation20], 0 }
  0x15   :  { %30 = vsyncpa [#allocation9], 0 }
  0x16   :  { %32 = vsyncpa [#allocation9 + $0x1], 0 }
  0x17   :  { %33 = vsyncpa [#allocation23], 0 }
  0x18   :  { %35 = vsyncpa [#allocation23 + $0x1], 0  ;;  %s3728_s18 = smov 0   ;;  %s3730_s19 = smov 0  }
  0x19   :  { %s3732_s20 = smov 0   ;;  %s3734_s21 = smov 0  }
  0x1a   :  { %s3736_s22 = smov 0   ;;  %s3738_s23 = smov 0  }
  0x1b   :  { %s3740_s24 = smov 0   ;;  %s3742_s25 = smov 0  }
  0x1c LB: > { %4729 = sst [smem:[#allocation32_spill]] %s3622_s22  ;;  %s3769_s26 = sadd.s32 4294967295, %s3634_s25   ;;  %s3634_s25 = sphi %s3742_s25, %s41_s25   ;;  %s3630_s24 = sphi %s3740_s24, %s4801_s24   ;;  %s3626_s23 = sphi %s3738_s23, %s4800_s23   ;;  %s3622_s22 = sphi %s3736_s22, %s4799_s22   ;;  %s3618_s21 = sphi %s3734_s21, %s4798_s21   ;;  %s3614_s20 = sphi %s3732_s20, %s4804_s20   ;;  %s3610_s19 = sphi %s3730_s19, %s4803_s19   ;;  %s3606_s18 = sphi %s3728_s18, %s4802_s18  }
  0x1d   : > { %4730 = sst [smem:[#allocation33_spill]] %s3626_s23  ;;  %p2616_p0 = scmp.ge.s32.totalorder %s3634_s25, 1 }
  0x1e   : > { %4731 = sst [smem:[#allocation34_spill]] %s3630_s24  ;;  %p76_p1 = scmp.eq.s32.totalorder %s3769_s26, 0 }
  0x1f   : > { %p422_p2 = scmp.lt.s32.totalorder %s3634_s25, 5  ;;  %s4732_s2 = sld [smem:[#allocation53_spill]] }
  0x20   : > { %s3636_s16 = smov [#allocation12]   ;;  %s4734_s3 = sld [smem:[#allocation54_spill]] }
  0x21   : > { %p3777_p3 = pnand %p2616_p0, %p422_p2  ;;  %s436_s17 = sshll.u32 %s3636_s16, 4  ;;  %s437_s17 = int_to_ptr.vmem [resolvable:$true] %s436_s17 }
  0x22   : > { %s4736_s8 = sld [smem:[#allocation58_spill]]  ;;  %s3637_s10 = smov [#allocation13]  }
  0x23   : > { %p3027_p4 = pneg %p3777_p3  ;;  %s448_s16 = sshll.u32 %s3637_s10, 4  ;;  %s449_s16 = int_to_ptr.vmem [resolvable:$true] %s448_s16 }
  0x24   : > { %s3638_s14 = smov [#allocation16]   ;;  %s4737_s4 = sld [smem:[#allocation55_spill]] }
  0x25   : > { %s434_s29 = sshll.u32 %s4732_s2, 4  ;;  %p3788_p5 = pnand %p3027_p4, %p76_p1  ;;  %s435_s29 = int_to_ptr.hbm [resolvable:$true] %s434_s29 }
  0x26   : > { %s446_s22 = sshll.u32 %s4734_s3, 4  ;;  %s482_s15 = sshll.u32 %s3638_s14, 4  ;;  %s447_s22 = int_to_ptr.hbm [resolvable:$true] %s446_s22  ;;  %s483_s15 = int_to_ptr.vmem [resolvable:$true] %s482_s15 }
  0x27   : > { %3030 = dma.hbm_to_vmem [thread:$0]  (!%p3788_p5), %s435_s29, 16, %s437_s17, [#allocation11]  }
  0x28   : > { %s480_s2 = sshll.u32 %s4736_s8, 4  ;;  %s3639_s5 = smov 128   ;;  %s481_s2 = int_to_ptr.hbm [resolvable:$true] %s480_s2 }
  0x29   : > { %3033 = dma.hbm_to_vmem [thread:$0]  (!%p3788_p5), %s447_s22, 16, %s449_s16, [#allocation14]  }
  0x2a   : > { %s457_s6 = sshll.u32 %s4737_s4, 4  ;;  %s3640_s27 = smov 8   ;;  %s458_s6 = int_to_ptr.hbm [resolvable:$true] %s457_s6 }
  0x2b   : > { %3039 = dma.hbm_to_vmem [thread:$0]  (!%p3788_p5), %s481_s2, 512, %s483_s15, [#allocation17], %s3639_s5, %s3639_s5, %s3640_s27  }
  0x2c   : > { %s3641_s10 = smov [#allocation15]   ;;  %s3642_s17 = smov 256  }
  0x2d   : > { %s459_s29 = sshll.u32 %s3641_s10, 4  ;;  %s3643_s22 = smov 16   ;;  %s460_s29 = int_to_ptr.vmem [resolvable:$true] %s459_s29 }
  0x2e   : > { %3036 = dma.hbm_to_vmem [thread:$0]  (!%p3788_p5), %s458_s6, 4096, %s460_s29, [#allocation14], %s3642_s17, %s3642_s17, %s3643_s22  }
  0x2f   : > { %s4738_s11 = sld [smem:[#allocation61_spill]]  ;;  %s3644_s2 = smov [#allocation18]  }
  0x30   : > { %s502_s5 = sshll.u32 %s3644_s2, 4  ;;  %s4739_s12 = sld [smem:[#allocation62_spill]]  ;;  %s503_s5 = int_to_ptr.vmem [resolvable:$true] %s502_s5 }
  0x31   : > { %s3645_s6 = smov [#allocation19]   ;;  %s2615_s10 = sadd.s32 4294967294, %s3634_s25  }
  0x32   : > { %s517_s27 = sshll.u32 %s3645_s6, 4  ;;  %s50_s29 = sadd.s32 1, %s3626_s23  ;;  %s518_s27 = int_to_ptr.vmem [resolvable:$true] %s517_s27 }
  0x33   : > { %p51_p6 = scmp.ge.s32.totalorder %s50_s29, 2  ;;  %s53_s28 = sadd.s32 1, %s3630_s24 }
  0x34   : > { %s62_s16 = sadd.s32 1, %s3614_s20  ;;  %p69_p7 = scmp.ne.s32.totalorder %s3614_s20, %s3610_s19 }
  0x35   : > { %s500_s3 = sshll.u32 %s4738_s11, 4  ;;  %s4806_s29 = smov (%p51_p6, %s50_s29), 0  ;;  %s501_s3 = int_to_ptr.hbm [resolvable:$true] %s500_s3 }
  0x36   : > { %s515_s15 = sshll.u32 %s4739_s12, 4  ;;  %4740 = sst [smem:[#allocation35_spill]] %s4806_s29  ;;  %s516_s15 = int_to_ptr.hbm [resolvable:$true] %s515_s15 }
  0x37   : > { %3042 = dma.hbm_to_vmem [thread:$0]  (!%p3788_p5), %s501_s3, 512, %s503_s5, [#allocation17], %s3642_s17, %s3642_s17, %s3643_s22  }
  0x38   : > { %3045 = dma.hbm_to_vmem [thread:$0]  (!%p3788_p5), %s516_s15, 32, %s518_s27, [#allocation20]  }
  0x39   : > { %s4808_s28 = smov (!%p51_p6, %s53_s28), %s3630_s24  ;;  %s58_s17 = ssub.s32 %s3626_s23, %s4806_s29 }
  0x3a   : > { %p70_p8 = scmp.eq.s32.totalorder %s3634_s25, 0  ;;  %p55_p9 = scmp.ge.s32.totalorder %s4808_s28, 2 }
  0x3b   : > { %p75_p10 = scmp.ne.s32.totalorder %s3610_s19, %s3606_s18  ;;  %p381_p12 = scmp.eq.s32.totalorder %s3769_s26, 3 }
  0x3c   : > { %p3830_p11 = por %p70_p8, %p69_p7  ;;  %s4810_s28 = smov (%p55_p9, %s4808_s28), 0 }
  0x3d   : > { %4742 = sst [smem:[#allocation36_spill]] %s4810_s28  ;;  %p3839_p13 = por %p76_p1, %p75_p10 }
  0x3e   : > { %p3843_p0 = por %p381_p12, %p69_p7  ;;  %s57_s2 = ssub.s32 %s3630_s24, %s4810_s28 }
  0x3f   : > { %p387_p2 = scmp.eq.s32.totalorder %s2615_s10, 3  ;;  %s59_s5 = sor.u32 %s58_s17, %s57_s2 }
  0x40   : > { %p3066_p4 = scmp.lt.s32.totalorder %s3634_s25, 4  ;;  %p60_p5 = scmp.eq.s32.totalorder %s59_s5, 0 }
  0x41   : > { %p3850_p6 = por %p387_p2, %p75_p10  ;;  %s531_s14 = sand.u32 1, %s3614_s20  }
  0x42   : > { %s2625_s15 = sshll.u32 %s3630_s24, 1  ;;  %s2624_s27 = sshll.u32 %s531_s14, 3 }
  0x43   : > { %s3857_s6 = scalar_select %p60_p5, %s3614_s20, %s62_s16  }
  0x44   : > { %s539_s4 = sadd.s32 %s3626_s23, %s2625_s15  ;;  %s535_s11 = scalar_lea.vmem [#allocation7], %s2624_s27 }
  0x45   : > { %s2626_s8 = sshll.u32 %s539_s4, 3  ;;  %s545_s12 = sshll.u32 %s535_s11, 4  ;;  %s546_s12 = int_to_ptr.vmem [resolvable:$true] %s545_s12 }
  0x46   : > { %s541_s17 = scalar_lea.hbm %s4676_s0, %s2626_s8  ;;  %p3047_p7 = pnand %p3066_p4, %p3830_p11 }
  0x47   : > { %s543_s2 = sshll.u32 %s541_s17, 4  ;;  %s562_s16 = scalar_lea.hbm %s4677_s1, %s2626_s8  ;;  %s544_s2 = int_to_ptr.hbm [resolvable:$true] %s543_s2 }
  0x48   : > { %s532_s24 = scalar_lea.sflag [#allocation8], %s531_s14  ;;  %s552_s15 = sand.u32 1, %s3634_s25  }
  0x49   : > { %3049 = dma.hbm_to_vmem [thread:$0]  (!%p3047_p7), %s544_s2, 128, %s546_s12, %s532_s24  }
  0x4a   : > { %s564_s4 = sshll.u32 %s562_s16, 4  ;;  %s556_s11 = scalar_lea.vmem [#allocation10], %s2624_s27  ;;  %s565_s4 = int_to_ptr.hbm [resolvable:$true] %s564_s4 }
  0x4b   : > { %s566_s23 = sshll.u32 %s556_s11, 4  ;;  %s553_s28 = scalar_lea.sflag [#allocation11], %s552_s15  ;;  %s567_s23 = int_to_ptr.vmem [resolvable:$true] %s566_s23 }
  0x4c   : > { %3052 = dma.hbm_to_vmem [thread:$0]  (!%p3047_p7), %s565_s4, 128, %s567_s23, %s553_s28  }
  0x4d   : > { %575 = sbr.rel (%p3777_p3) target bundleno = 1133 (0x46d), region = 76 }
  0x52   : > { %s3874_s13 = sand.u32 1, %s3610_s19  }
  0x53   : > { %s3877_s8 = sshll.u32 %s3874_s13, 3  ;;  %s578_s12 = scalar_lea.sflag [#allocation8], %s3874_s13 }
  0x54   : > { %s581_s24 = scalar_lea.vmem [#allocation7], %s3877_s8 }
  0x55   : > { %3573 = dma.done.wait (%p3839_p13), %s578_s12, 128  }
  0x56   : > { %3575 = vsyncadd (%p3839_p13), %s578_s12, 4294967168  ;;  %s587_s23 = sand.u32 1, %s3769_s26   ;;  %s591_s29 = scalar_lea.vmem [#allocation10], %s3877_s8 }
  0x57   : > { %s588_s30 = scalar_lea.sflag [#allocation11], %s587_s23 }
  0x58   : > { %3577 = dma.done.wait (%p3839_p13), %s588_s30, 128  }
  0x59   : > { %3579 = vsyncadd (%p3839_p13), %s588_s30, 4294967168 }
  0x5a   : > { %3581 = dma.done.wait (%p76_p1), [#allocation11], 16  }
  0x5b   : > { %3583 = vsyncadd (%p76_p1), [#allocation11], 4294967280 }
  0x5c   : > { %3585 = dma.done.wait (%p76_p1), [#allocation14], 4112  }
  0x5d   : > { %3587 = vsyncadd (%p76_p1), [#allocation14], 4294963184 }
  0x5e   : > { %3589 = dma.done.wait (%p76_p1), [#allocation17], 1024  }
  0x5f   : > { %3591 = vsyncadd (%p76_p1), [#allocation17], 4294966272 }
  0x60   : > { %3593 = dma.done.wait (%p76_p1), [#allocation20], 32  }
  0x61   : > { %3595 = vsyncadd (%p76_p1), [#allocation20], 4294967264  ;;  %s671_s22 = scalar_lea.vmem [#allocation21], %s3877_s8  ;;  %s678_s14 = scalar_lea.vmem [#allocation22], %s3877_s8 }
  0x62   : > { %p2641_p3 = scmp.ne.s32.totalorder %s3618_s21, 0 }
  0x64   : > { %683 = sbr.rel (%p2641_p3) target bundleno = 112 (0x70), region = 112 }
  0x69   : > { %v3646_v0 = vmov 0.0  }
  0x6a   : > { %684 = vst [vmem:[#allocation2 + $0x10] sm:$0xff] %v3646_v0 }
  0x6b   : > { %685 = vst [vmem:[#allocation2] sm:$0xff] %v3646_v0 }
  0x6c   : > { %686 = vst [vmem:[#allocation2 + $0x18] sm:$0xff] %v3646_v0 }
  0x6d   : > { %687 = vst [vmem:[#allocation2 + $0x8] sm:$0xff] %v3646_v0 }
  0x6e   : > { %688 = vst [vmem:[#allocation3] sm:$0x7] %v3646_v0 }
  0x6f   : > { %689 = vst [vmem:[#allocation3 + $0x18] sm:$0x7] %v3646_v0 }
  0x70 PF: > { %v690_v1 = vld [vmem:[%s581_s24] sm:$0xff]  ;;  %v691_v2 = vld [vmem:[%s591_s29] sm:$0xff]  ;;  %v3647_v4 = vmov 128.0   ;;  %s4746_s28 = sld [smem:[#allocation56_spill]]  ;;  %vm1013_vm4 = vcmask 1046528   ;;  %vm1039_vm5 = vcmask 1045504  }
  0x71   : > { %v692_v3 = vadd.f32 %v691_v2, %v690_v1  ;;  %3152 = vrcp.f32 %v3647_v4  ;;  %v2756_v5 = vld [vmem:[#allocation15 + $0xe0] sm:$0xf]  ;;  %v2957_v6 = vld [vmem:[#allocation15 + $0xec] sm:$0xf0]  ;;  %v2955_v7 = vld [vmem:[#allocation15 + $0xe4] sm:$0xf] }
  0x72   : > { %v2757_v8 = vor.u32 %v2957_v6, %v2756_v5  ;;  %v2758_v9 = vld [vmem:[#allocation15 + $0xf0] sm:$0xf0]  ;;  %v2764_v10 = vld [vmem:[#allocation15 + $0xe8] sm:$0xf]  ;;  %v2958_v11 = vld [vmem:[#allocation15 + $0xf4] sm:$0xf0] }
  0x73   : > { %694 = vadd.xlane.f32.xlu0 %v692_v3  ;;  %693 = vst [vmem:[%s678_s14] sm:$0xff] %v692_v3  ;;  %v2761_v12 = vor.u32 %v2955_v7, %v2758_v9  ;;  %v2765_v13 = vor.u32 %v2958_v11, %v2764_v10  ;;  %v2956_v14 = vld [vmem:[#allocation15 + $0xec] sm:$0xf]  ;;  %v2766_v15 = vld [vmem:[#allocation15 + $0xf8] sm:$0xf0]  ;;  %v2740_v27 = vld [vmem:[#allocation15 + $0xc0] sm:$0xf] }
  0x74   : > { %924 = vmatpush.bf16.msra.mxu0 %v2757_v8  ;;  %v2769_v16 = vor.u32 %v2956_v14, %v2766_v15  ;;  %v2953_v28 = vld [vmem:[#allocation15 + $0xcc] sm:$0xf0]  ;;  %v2951_v29 = vld [vmem:[#allocation15 + $0xc4] sm:$0xf]  ;;  %v2742_v31 = vld [vmem:[#allocation15 + $0xd0] sm:$0xf0] }
  0x75   : > { %937 = vmatpush.bf16.msra.mxu1 %v2761_v12  ;;  %950 = vmatpush.bf16.msra.mxu2 %v2765_v13  ;;  %v2741_v30 = vor.u32 %v2953_v28, %v2740_v27  ;;  %v2748_v32 = vld [vmem:[#allocation15 + $0xc8] sm:$0xf]  ;;  %v2954_v33 = vld [vmem:[#allocation15 + $0xd4] sm:$0xf0]  ;;  %v2745_v34 = vor.u32 %v2951_v29, %v2742_v31  ;;  %v2952_v36 = vld [vmem:[#allocation15 + $0xcc] sm:$0xf] }
  0x76   : > { %963 = vmatpush.bf16.msra.mxu3 %v2769_v16  ;;  %v2749_v35 = vor.u32 %v2954_v33, %v2748_v32  ;;  %v2750_v37 = vld [vmem:[#allocation15 + $0xd8] sm:$0xf0]  ;;  %v2724_v39 = vld [vmem:[#allocation15 + $0xa0] sm:$0xf]  ;;  %v2949_v40 = vld [vmem:[#allocation15 + $0xac] sm:$0xf0] }
  0x77   : > { %v3153_v17 = vpop.eup %3152  ;;  %v2753_v38 = vor.u32 %v2952_v36, %v2750_v37  ;;  %v2947_v41 = vld [vmem:[#allocation15 + $0xa4] sm:$0xf]  ;;  %v2725_v42 = vor.u32 %v2949_v40, %v2724_v39  ;;  %v2726_v43 = vld [vmem:[#allocation15 + $0xb0] sm:$0xf0]  ;;  %v2732_v44 = vld [vmem:[#allocation15 + $0xa8] sm:$0xf] }
  0x78   : > { %v697_v18 = vmul.f32 128.0, %v3153_v17  ;;  %vm701_vm0 = vweird.f32 %v3153_v17  ;;  %925 = vmatpush.bf16.msra.mxu0 %v2741_v30  ;;  %v2950_v45 = vld [vmem:[#allocation15 + $0xb4] sm:$0xf0]  ;;  %v2729_v46 = vor.u32 %v2947_v41, %v2726_v43  ;;  %v2948_v48 = vld [vmem:[#allocation15 + $0xac] sm:$0xf]  ;;  %s4749_s4 = sld [smem:[#allocation57_spill]] }
  0x79   : > { %938 = vmatpush.bf16.msra.mxu1 %v2745_v34  ;;  %951 = vmatpush.bf16.msra.mxu2 %v2749_v35  ;;  %v2733_v47 = vor.u32 %v2950_v45, %v2732_v44  ;;  %v2734_v49 = vld [vmem:[#allocation15 + $0xb8] sm:$0xf0]  ;;  %v2708_v51 = vld [vmem:[#allocation15 + $0x80] sm:$0xf]  ;;  %v2945_v52 = vld [vmem:[#allocation15 + $0x8c] sm:$0xf0] }
  0x7a   : > { %v698_v19 = vsub.f32 1.0, %v697_v18  ;;  %964 = vmatpush.bf16.msra.mxu3 %v2753_v38  ;;  %v2737_v50 = vor.u32 %v2948_v48, %v2734_v49  ;;  %v2943_v53 = vld [vmem:[#allocation15 + $0x84] sm:$0xf]  ;;  %v2709_v54 = vor.u32 %v2945_v52, %v2708_v51  ;;  %v2710_v55 = vld [vmem:[#allocation15 + $0x90] sm:$0xf0]  ;;  %vm1065_vm6 = vcmask 1044480  }
  0x7b   : > { %v2716_v56 = vld [vmem:[#allocation15 + $0x88] sm:$0xf]  ;;  %v2946_v57 = vld [vmem:[#allocation15 + $0x94] sm:$0xf0]  ;;  %v2713_v58 = vor.u32 %v2943_v53, %v2710_v55  ;;  %v2944_v60 = vld [vmem:[#allocation15 + $0x8c] sm:$0xf] }
  0x7c   : > { %v699_v20 = vmul.f32 %v3153_v17, %v698_v19  ;;  %926 = vmatpush.bf16.msra.mxu0 %v2725_v42  ;;  %v2717_v59 = vor.u32 %v2946_v57, %v2716_v56  ;;  %v2718_v61 = vld [vmem:[#allocation15 + $0x98] sm:$0xf0]  ;;  %v2692_v63 = vld [vmem:[#allocation15 + $0x60] sm:$0xf]  ;;  %v2941_v0 = vld [vmem:[#allocation15 + $0x6c] sm:$0xf0] }
  0x7d   : > { %939 = vmatpush.bf16.msra.mxu1 %v2729_v46  ;;  %952 = vmatpush.bf16.msra.mxu2 %v2733_v47  ;;  %v2721_v62 = vor.u32 %v2944_v60, %v2718_v61  ;;  %v2939_v1 = vld [vmem:[#allocation15 + $0x64] sm:$0xf]  ;;  %v2693_v2 = vor.u32 %v2941_v0, %v2692_v63  ;;  %v2700_v4 = vld [vmem:[#allocation15 + $0x68] sm:$0xf]  ;;  %v2942_v5 = vld [vmem:[#allocation15 + $0x74] sm:$0xf0] }
  0x7e   : > { %v700_v21 = vadd.f32 %v3153_v17, %v699_v20  ;;  %965 = vmatpush.bf16.msra.mxu3 %v2737_v50  ;;  %v2701_v7 = vor.u32 %v2942_v5, %v2700_v4  ;;  %v2940_v8 = vld [vmem:[#allocation15 + $0x6c] sm:$0xf]  ;;  %v2702_v9 = vld [vmem:[#allocation15 + $0x78] sm:$0xf0]  ;;  %v2676_v11 = vld [vmem:[#allocation15 + $0x40] sm:$0xf] }
  0x7f   : > { %v2705_v10 = vor.u32 %v2940_v8, %v2702_v9  ;;  %v2937_v12 = vld [vmem:[#allocation15 + $0x4c] sm:$0xf0]  ;;  %v2935_v13 = vld [vmem:[#allocation15 + $0x44] sm:$0xf]  ;;  %v2678_v15 = vld [vmem:[#allocation15 + $0x50] sm:$0xf0] }
  0x80   : > { %v3912_v22 = vsel %vm701_vm0, %v3153_v17, %v700_v21  ;;  %927 = vmatpush.bf16.msra.mxu0 %v2709_v54  ;;  %v2677_v14 = vor.u32 %v2937_v12, %v2676_v11  ;;  %v2684_v16 = vld [vmem:[#allocation15 + $0x48] sm:$0xf]  ;;  %v2938_v17 = vld [vmem:[#allocation15 + $0x54] sm:$0xf0]  ;;  %v2681_v18 = vor.u32 %v2935_v13, %v2678_v15  ;;  %v2936_v20 = vld [vmem:[#allocation15 + $0x4c] sm:$0xf] }
  0x81   : > { %940 = vmatpush.bf16.msra.mxu1 %v2713_v58  ;;  %953 = vmatpush.bf16.msra.mxu2 %v2717_v59  ;;  %v2685_v19 = vor.u32 %v2938_v17, %v2684_v16  ;;  %v2686_v21 = vld [vmem:[#allocation15 + $0x58] sm:$0xf0]  ;;  %v2931_v27 = vld [vmem:[#allocation15 + $0x24] sm:$0xf]  ;;  %v2662_v29 = vld [vmem:[#allocation15 + $0x30] sm:$0xf0] }
  0x82   : > { %966 = vmatpush.bf16.msra.mxu3 %v2721_v62  ;;  %v2668_v30 = vld [vmem:[#allocation15 + $0x28] sm:$0xf]  ;;  %v2934_v31 = vld [vmem:[#allocation15 + $0x34] sm:$0xf0]  ;;  %v2665_v32 = vor.u32 %v2931_v27, %v2662_v29  ;;  %v2932_v34 = vld [vmem:[#allocation15 + $0x2c] sm:$0xf] }
  0x83   : > { %v2669_v33 = vor.u32 %v2934_v31, %v2668_v30  ;;  %v2670_v35 = vld [vmem:[#allocation15 + $0x38] sm:$0xf0]  ;;  %v2644_v36 = vld [vmem:[#allocation15] sm:$0xf]  ;;  %v2929_v38 = vld [vmem:[#allocation15 + $0xc] sm:$0xf0] }
  0x84   : > { %928 = vmatpush.bf16.msra.mxu0 %v2693_v2  ;;  %v2673_v37 = vor.u32 %v2932_v34, %v2670_v35  ;;  %v2927_v39 = vld [vmem:[#allocation15 + $0x4] sm:$0xf]  ;;  %v2646_v40 = vld [vmem:[#allocation15 + $0x10] sm:$0xf0]  ;;  %v2645_v41 = vor.u32 %v2929_v38, %v2644_v36  ;;  %v2652_v43 = vld [vmem:[#allocation15 + $0x8] sm:$0xf] }
  0x85   : > { %954 = vmatpush.bf16.msra.mxu2 %v2701_v7  ;;  %v2649_v42 = vor.u32 %v2927_v39, %v2646_v40  ;;  %v2930_v44 = vld [vmem:[#allocation15 + $0x14] sm:$0xf0]  ;;  %v2928_v45 = vld [vmem:[#allocation15 + $0xc] sm:$0xf]  ;;  %v2654_v47 = vld [vmem:[#allocation15 + $0x18] sm:$0xf0] }
  0x86   : > { %967 = vmatpush.bf16.msra.mxu3 %v2705_v10  ;;  %v2653_v46 = vor.u32 %v2930_v44, %v2652_v43  ;;  %v2657_v48 = vor.u32 %v2928_v45, %v2654_v47  ;;  %v3150_v58 = vld [vmem:[#allocation12] ss:$0 sm:$0xff]  ;;  %v3151_v61 = vld [vmem:[#allocation13] ss:$0 sm:$0xff]  ;;  %v2977_v4 = vld [vmem:[%s4683_s7 + $0x70] sm:$0xff]  ;;  %s4750_s26 = sld [smem:[#allocation59_spill]] }
  0x87   : > { %v2770_v7 = vld [vmem:[%s4746_s28 + $0x1] ss:$4 sm:$0x3]  ;;  %v2771_v8 = vld [vmem:[%s4746_s28 + $0x2] ss:$4 sm:$0x3] }
  0x88   : > { %929 = vmatpush.bf16.msra.mxu0 %v2677_v14  ;;  %v2968_v9 = vld [vmem:[%s4683_s7 + $0x28] sm:$0xff]  ;;  %v3948_v11 = vld [vmem:[%s4746_s28 + $0x3] ss:$4 sm:$0x3]  ;;  %v1001_v17 = vperm.slane %v2770_v7, 0  ;;  %v1002_v29 = vperm.slane %v2770_v7, 1 }
  0x89   : > { %955 = vmatpush.bf16.msra.mxu2 %v2685_v19  ;;  %v2976_v10 = vld [vmem:[%s4683_s7 + $0x68] sm:$0xff]  ;;  %v990_v12 = vld [vmem:[%s4746_s28] ss:$4 sm:$0x3]  ;;  %v1054_v34 = vperm.slane %v3948_v11, 1  ;;  %v2965_v40 = vld [vmem:[%s4683_s7 + $0x10] sm:$0xff] }
  0x8a   : > { %v2967_v15 = vld [vmem:[%s4683_s7 + $0x20] sm:$0xff]  ;;  %v992_v27 = vperm.slane %v990_v12, 0  ;;  %v2973_v43 = vld [vmem:[%s4683_s7 + $0x50] sm:$0xff]  ;;  %vm1361_vm14 = vcmask 1043456   ;;  %s4753_s17 = sld [smem:[#allocation60_spill]]  ;;  %s2409_s10 = sshll.u32 %s678_s14, 4  ;;  %s2410_s10 = int_to_ptr.vmem [resolvable:$true] %s2409_s10 }
  0x8b   : > { %v2975_v16 = vld [vmem:[%s4683_s7 + $0x60] sm:$0xff]  ;;  %s4784_s16 = sld [smem:[#allocation63_spill]]  ;;  %s2379_s2 = scalar_lea.sflag [#allocation23], %s3874_s13 }
  0x8c   : > { %s4791_s11 = sld [smem:[#allocation32_spill]] }
  0x8d   : > { %956 = vmatpush.bf16.msra.mxu2 %v2669_v33  ;;  %v1028_v33 = vperm.slane %v2771_v8, 1 }
  0x91   : > { %957 = vmatpush.bf16.msra.mxu2 %v2653_v46 }
  0x92   : > { %s2921_s12 = sshll.u32 %s4791_s11, 1 }
  0x93   : > { %s2389_s24 = sadd.s32 %s3618_s21, %s2921_s12 }
  0x94   : > { %s2922_s23 = sshll.u32 %s2389_s24, 3 }
  0xe6   : > { %v695_v23 = vpop.xlane.xlu0 %694 }
  0xe7   : > { %v703_v24 = vmul.f32 %v3912_v22, %v695_v23  ;;  %v2689_v23 = vor.u32 %v2936_v20, %v2686_v21  ;;  %v1053_v21 = vperm.slane %v3948_v11, 0 }
  0xe9   : > { %v3915_v25 = vsub.f32 %v692_v3, %v703_v24  ;;  %v2694_v3 = vld [vmem:[#allocation15 + $0x70] sm:$0xf0]  ;;  %v2660_v24 = vld [vmem:[#allocation15 + $0x20] sm:$0xf]  ;;  %968 = vmatpush.bf16.msra.mxu3 %v2689_v23 }
  0xea   : > { %v2697_v6 = vor.u32 %v2939_v1, %v2694_v3  ;;  %v2978_v1 = vld [vmem:[%s4683_s7 + $0x78] sm:$0xff]  ;;  %v2969_v3 = vld [vmem:[%s4683_s7 + $0x30] sm:$0xff] }
  0xeb   : > { %v705_v26 = vmul.f32 %v3915_v25, %v3915_v25  ;;  %v2966_v23 = vld [vmem:[%s4683_s7 + $0x18] sm:$0xff] }
  0xec   : > { %941 = vmatpush.bf16.msra.mxu1 %v2697_v6 }
  0xed   : > { %706 = vadd.xlane.f32.xlu0 %v705_v26  ;;  %v2933_v26 = vld [vmem:[#allocation15 + $0x2c] sm:$0xf0]  ;;  %969 = vmatpush.bf16.msra.mxu3 %v2673_v37 }
  0xee   : > { %v2661_v28 = vor.u32 %v2933_v26, %v2660_v24  ;;  %v2974_v24 = vld [vmem:[%s4683_s7 + $0x58] sm:$0xff] }
  0xf0   : > { %942 = vmatpush.bf16.msra.mxu1 %v2681_v18  ;;  %930 = vmatpush.bf16.msra.mxu0 %v2661_v28  ;;  %v1027_v18 = vperm.slane %v2771_v8, 0  ;;  %v993_v28 = vperm.slane %v990_v12, 1 }
  0xf1   : > { %970 = vmatpush.bf16.msra.mxu3 %v2657_v48 }
  0xf4   : > { %943 = vmatpush.bf16.msra.mxu1 %v2665_v32  ;;  %931 = vmatpush.bf16.msra.mxu0 %v2645_v41 }
  0xf5   : > { %1331 = vmatpush.bf16.msrb.mxu3 %v2978_v1 }
  0xf8   : > { %944 = vmatpush.bf16.msra.mxu1 %v2649_v42 }
  0xf9   : > { %1332 = vmatpush.bf16.msrb.mxu3 %v2977_v4 }
  0xfd   : > { %1333 = vmatpush.bf16.msrb.mxu3 %v2976_v10  ;;  %v2971_v10 = vld [vmem:[%s4683_s7 + $0x40] sm:$0xff] }
 0x101   : > { %1334 = vmatpush.bf16.msrb.mxu3 %v2975_v16 }
 0x105   : > { %1335 = vmatpush.bf16.msrb.mxu3 %v2974_v24 }
 0x109   : > { %1336 = vmatpush.bf16.msrb.mxu3 %v2973_v43 }
 0x160   : > { %v707_v49 = vpop.xlane.xlu0 %706 }
 0x161   : > { %v708_v50 = vmul.f32 %v707_v49, %v3912_v22  ;;  %v2970_v22 = vld [vmem:[%s4683_s7 + $0x38] sm:$0xff] }
 0x162   : > { %1318 = vmatpush.bf16.msrb.mxu2 %v2970_v22  ;;  %v1076_v22 = vld [vmem:[%s4749_s4] sm:$0x3] }
 0x163   : > { %v709_v51 = vadd.f32 1e-05, %v708_v50  ;;  %v1078_v8 = vperm.slane %v1076_v22, 0 }
 0x165   : > { %3154 = vrsqrt.f32 %v709_v51  ;;  %vm716_vm2 = vweird.f32 %v709_v51 }
 0x166   : > { %1319 = vmatpush.bf16.msrb.mxu2 %v2969_v3 }
 0x16a   : > { %1320 = vmatpush.bf16.msrb.mxu2 %v2968_v9  ;;  %v2963_v9 = vld [vmem:[%s4683_s7] sm:$0xff] }
 0x16b   : > { %v3155_v52 = vpop.eup %3154 }
 0x16c   : > { %v711_v53 = vmul.f32 %v3155_v52, %v709_v51  ;;  %vm717_vm1 = vweird.f32 %v3155_v52 }
 0x16d   : > { %vm718_vm3 = vmor %vm716_vm2, %vm717_vm1 }
 0x16e   : > { %v712_v54 = vmul.f32 %v3155_v52, %v711_v53  ;;  %1321 = vmatpush.bf16.msrb.mxu2 %v2967_v15 }
 0x170   : > { %v713_v55 = vmul.f32 0.5, %v712_v54 }
 0x172   : > { %v714_v56 = vsub.f32 1.5, %v713_v55  ;;  %1322 = vmatpush.bf16.msrb.mxu2 %v2966_v23 }
 0x174   : > { %v715_v57 = vmul.f32 %v3155_v52, %v714_v56 }
 0x176   : > { %v719_v59 = vsel %vm718_vm3, %v3155_v52, %v715_v57  ;;  %1323 = vmatpush.bf16.msrb.mxu2 %v2965_v40  ;;  %vm1357_vm3 = vcmask 64512  }
 0x177   : > { %v720_v60 = vmul.f32 %v719_v59, %v3915_v25 }
 0x179   : > { %v725_v62 = vmul.f32 %v3150_v58, %v720_v60 }
 0x17b   : > { %v730_v63 = vadd.f32 %v3151_v61, %v725_v62  ;;  %v2964_v62 = vld [vmem:[%s4683_s7 + $0x8] sm:$0xff] }
 0x17c   : > { %1324 = vmatpush.bf16.msrb.mxu2 %v2964_v62  ;;  %v2960_v62 = vld [vmem:[#allocation16 + $0x4] sm:$0xf0] }
 0x17d   : > { %v731_v0 = vpack.c.bf16 %v730_v63, %v730_v63  ;;  %v2972_v63 = vld [vmem:[%s4683_s7 + $0x48] sm:$0xff] }
 0x17e   : > { %1337 = vmatpush.bf16.msrb.mxu3 %v2972_v63 }
 0x17f   : > { %932 = vmatmul.bf16.vlgmr.msra.gmra.mxu0 %v731_v0  ;;  %945 = vmatmul.bf16.vlgmr.msra.gmra.mxu1 %v731_v0 }
 0x180   : > { %958 = vmatmul.bf16.vlgmr.msra.gmra.mxu2 %v731_v0  ;;  %971 = vmatmul.bf16.vlgmr.msra.gmra.mxu3 %v731_v0 }
 0x181   : > { %1325 = vmatpush.bf16.msrb.mxu2 %v2963_v9  ;;  %v4700_v9 = vlaneseq }
 0x182   : > { %1338 = vmatpush.bf16.msrb.mxu3 %v2971_v10 }
 0x1fc   : > { %v933_v2 = vpop.f32.mrf.mxu0  ;;  %v946_v25 = vpop.f32.mrf.mxu1 }
 0x1fd   : > { %v978_v5 = vrot.slane %v933_v2, 5  ;;  %v979_v6 = vrot.slane %v946_v25, 5 }
 0x1ff   : > { %982 = vst [vmem:[#allocation3] sm:$0xf8] %v978_v5 }
 0x200   : > { %984 = vst [vmem:[#allocation3 + $0x8] sm:$0x7] %v978_v5 }
 0x201   : > { %983 = vst [vmem:[#allocation3 + $0x18] sm:$0xf8] %v979_v6 }
 0x202   : > { %985 = vst [vmem:[#allocation3 + $0x10] sm:$0x7] %v979_v6 }
 0x203   : > { %v3953_v13 = vpop.f32.mrf.mxu2  ;;  %v3955_v14 = vpop.f32.mrf.mxu3 }
 0x204   : > { %4747 = vst [vmem:[#allocation37_spill] sm:$0xff] %v3953_v13  ;;  %v935_v19 = vpop.f32.mrf.mxu0  ;;  %v948_v20 = vpop.f32.mrf.mxu1 }
 0x205   : > { %4748 = vst [vmem:[#allocation38_spill] sm:$0xff] %v3955_v14 }
 0x206   : > { %v986_v26 = vld [vmem:[#allocation3] sm:$0xff] }
 0x207   : > { %v988_v30 = vld [vmem:[#allocation3 + $0x8] sm:$0x7]  ;;  %v1005_v31 = vmul.f32 %v1001_v17, %v986_v26  ;;  %v1031_v32 = vmul.f32 %v1027_v18, %v986_v26  ;;  %v1057_v37 = vmul.f32 %v1053_v21, %v986_v26  ;;  %v996_v44 = vmul.f32 %v992_v27, %v986_v26 }
 0x208   : > { %v1007_v35 = vmul.f32 %v1001_v17, %v988_v30  ;;  %v1033_v36 = vmul.f32 %v1027_v18, %v988_v30  ;;  %v1059_v38 = vmul.f32 %v1053_v21, %v988_v30  ;;  %1124 = vst [vmem:[#allocation3] sm:$0x7] %v988_v30  ;;  %v987_v39 = vld [vmem:[#allocation3 + $0x18] sm:$0xff]  ;;  %v1079_v17 = vperm.slane %v1076_v22, 1 }
 0x209   : > { %v1014_v41 = vrot.slane %v1005_v31, 1  ;;  %v989_v42 = vld [vmem:[#allocation3 + $0x10] sm:$0x7]  ;;  %v1040_v46 = vrot.slane %v1031_v32, 2  ;;  %v1006_v50 = vmul.f32 %v1002_v29, %v987_v39  ;;  %v1032_v52 = vmul.f32 %v1028_v33, %v987_v39 }
 0x20a   : > { %v1015_v45 = vrot.slane %v1007_v35, 1  ;;  %v1041_v47 = vrot.slane %v1033_v36, 2  ;;  %1125 = vst [vmem:[#allocation3 + $0x18] sm:$0x7] %v989_v42  ;;  %v1008_v51 = vmul.f32 %v1002_v29, %v989_v42  ;;  %v1034_v53 = vmul.f32 %v1028_v33, %v989_v42 }
 0x20b   : > { %v961_v48 = vpop.f32.mrf.mxu2  ;;  %v974_v49 = vpop.f32.mrf.mxu3  ;;  %v1066_v55 = vrot.slane %v1057_v37, 3  ;;  %v1067_v56 = vrot.slane %v1059_v38, 3  ;;  %v1058_v57 = vmul.f32 %v1054_v34, %v987_v39  ;;  %v997_v59 = vmul.f32 %v993_v28, %v987_v39 }
 0x20c   : > { %v1016_v54 = vsel %vm1013_vm4, %v1014_v41, %v1015_v45  ;;  %v1017_v60 = vrot.slane %v1006_v50, 1  ;;  %v1018_v61 = vrot.slane %v1008_v51, 1  ;;  %v1042_v0 = vsel %vm1039_vm5, %v1040_v46, %v1041_v47  ;;  %v1345_v47 = vld [vmem:[%s4750_s26] sm:$0xff]  ;;  %s4796_s26 = sld [smem:[#allocation65_spill]] }
 0x20d   : > { %v1022_v58 = vadd.f32 %v1016_v54, %v996_v44  ;;  %v1043_v1 = vrot.slane %v1032_v52, 2  ;;  %v1044_v2 = vrot.slane %v1034_v53, 2  ;;  %v1060_v25 = vmul.f32 %v1054_v34, %v989_v42 }
 0x20e   : > { %v1019_v4 = vsel %vm1013_vm4, %v1017_v60, %v1018_v61  ;;  %v1069_v6 = vrot.slane %v1058_v57, 3  ;;  %v1068_v11 = vsel %vm1065_vm6, %v1066_v55, %v1067_v56  ;;  %v1354_v50 = vunpack.c.h.b16 %v1345_v47  ;;  %v2775_v61 = vld [vmem:[#allocation16] sm:$0xf] }
 0x20f   : > { %v1048_v3 = vadd.f32 %v1042_v0, %v1022_v58  ;;  %v1023_v5 = vadd.f32 %v1019_v4, %v997_v59  ;;  %v1070_v7 = vrot.slane %v1060_v25, 3  ;;  %v1045_v12 = vsel %vm1039_vm5, %v1043_v1, %v1044_v2  ;;  %v2959_v1 = vld [vmem:[#allocation16 + $0x4] sm:$0xf]  ;;  %v2777_v2 = vld [vmem:[#allocation16 + $0x8] sm:$0xf0] }
 0x210   : > { %v1353_v51 = vunpack.c.l.b16 %v1345_v47  ;;  %v1356_v55 = vpack.c.b16 %v1354_v50, %v1354_v50  ;;  %v2776_v22 = vor.u32 %v2960_v62, %v2775_v61  ;;  %v2780_v25 = vor.u32 %v2959_v1, %v2777_v2  ;;  %v2962_v4 = vld [vmem:[#allocation16 + $0x14] sm:$0xf0] }
 0x211   : > { %v1074_v15 = vadd.f32 %v1068_v11, %v1048_v3  ;;  %v1049_v16 = vadd.f32 %v1045_v12, %v1023_v5  ;;  %v1071_v18 = vsel %vm1065_vm6, %v1069_v6, %v1070_v7  ;;  %v2783_v3 = vld [vmem:[#allocation16 + $0x10] sm:$0xf]  ;;  %v2961_v6 = vld [vmem:[#allocation16 + $0x14] sm:$0xf]  ;;  %v2785_v7 = vld [vmem:[#allocation16 + $0x18] sm:$0xf0] }
 0x212   : > { %v1355_v56 = vpack.c.b16 %v1353_v51, %v1353_v51  ;;  %v1366_v0 = vsel %vm1361_vm14, %v1356_v55, 0  ;;  %v2784_v5 = vor.u32 %v2962_v4, %v2783_v3  ;;  %v4008_v11 = vand.u32 127, %v4700_v9  ;;  %s2407_s27 = scalar_lea.hbm %s4796_s26, %s2922_s23  ;;  %s3504_s11 = scalar_lea.hbm %s4796_s26, 32 }
 0x213   : > { %v1082_v19 = vadd.f32 %v1078_v8, %v1074_v15  ;;  %v1075_v20 = vadd.f32 %v1071_v18, %v1049_v16  ;;  %v2788_v8 = vor.u32 %v2961_v6, %v2785_v7 }
 0x214   : > { %v1363_v60 = vsel %vm1361_vm14, %v1355_v56, 0  ;;  %vm1756_vm0 = vcmp.eq.s32.totalorder %v4008_v11, 2  ;;  %vm1689_vm1 = vcmp.eq.s32.totalorder %v4008_v11, 1  ;;  %vm1621_vm2 = vcmp.eq.s32.totalorder %v4008_v11, 0 }
 0x215   : > { %v1084_v21 = vsub.f32 0.0, %v1082_v19  ;;  %v1083_v23 = vadd.f32 %v1079_v17, %v1075_v20  ;;  %vm1957_vm5 = vcmp.eq.s32.totalorder %v4008_v11, 5  ;;  %vm1823_vm6 = vcmp.eq.s32.totalorder %v4008_v11, 3 }
 0x217   : > { %v1086_v24 = vmul.f32 1.442695, %v1084_v21  ;;  %v1085_v26 = vsub.f32 0.0, %v1083_v23 }
 0x219   : > { %3156 = vpow2.f32 %v1086_v24  ;;  %v1088_v27 = vmul.f32 1.442695, %v1085_v26 }
 0x21b   : > { %3158 = vpow2.f32 %v1088_v27 }
 0x21f   : > { %v3157_v28 = vpop.eup %3156 }
 0x220   : > { %v1090_v29 = vadd.f32 1.0, %v3157_v28 }
 0x221   : > { %v3159_v30 = vpop.eup %3158 }
 0x222   : > { %3160 = vrcp.f32 %v1090_v29  ;;  %v1091_v31 = vadd.f32 1.0, %v3159_v30  ;;  %v1103_v36 = vand.u32 2147483648, %v1090_v29  ;;  %v1101_v39 = vand.u32 2147483647, %v1090_v29 }
 0x223   : > { %vm1097_vm8 = vweird.f32 %v1090_v29 }
 0x224   : > { %3162 = vrcp.f32 %v1091_v31  ;;  %v1118_v42 = vand.u32 2147483648, %v1091_v31  ;;  %v1104_v43 = vor.u32 1.1754944e-38, %v1103_v36  ;;  %v1116_v45 = vand.u32 2147483647, %v1091_v31 }
 0x225   : > { %vm1102_vm11 = vcmp.eq.f32.partialorder %v1101_v39, 8.507059e+37  ;;  %vm1112_vm12 = vweird.f32 %v1091_v31 }
 0x226   : > { %v1119_v53 = vor.u32 1.1754944e-38, %v1118_v42  ;;  %vm1117_vm15 = vcmp.eq.f32.partialorder %v1116_v45, 8.507059e+37 }
 0x228   : > { %v3161_v32 = vpop.eup %3160 }
 0x229   : > { %v1093_v33 = vmul.f32 %v3161_v32, %v1090_v29  ;;  %vm1098_vm7 = vweird.f32 %v3161_v32 }
 0x22a   : > { %v3163_v34 = vpop.eup %3162  ;;  %vm1099_vm9 = vmor %vm1097_vm8, %vm1098_vm7  ;;  %vm1890_vm7 = vcmp.eq.s32.totalorder %v4008_v11, 4  ;;  %vm2024_vm8 = vcmp.eq.s32.totalorder %v4008_v11, 6 }
 0x22b   : > { %v1094_v35 = vsub.f32 1.0, %v1093_v33  ;;  %v1108_v37 = vmul.f32 %v3163_v34, %v1091_v31  ;;  %vm1113_vm10 = vweird.f32 %v3163_v34 }
 0x22c   : > { %vm1114_vm13 = vmor %vm1112_vm12, %vm1113_vm10 }
 0x22d   : > { %v1095_v38 = vmul.f32 %v3161_v32, %v1094_v35  ;;  %v1109_v40 = vsub.f32 1.0, %v1108_v37 }
 0x22f   : > { %v1096_v41 = vadd.f32 %v3161_v32, %v1095_v38  ;;  %v1110_v44 = vmul.f32 %v3163_v34, %v1109_v40 }
 0x231   : > { %v1100_v46 = vsel %vm1099_vm9, %v3161_v32, %v1096_v41  ;;  %v1111_v49 = vadd.f32 %v3163_v34, %v1110_v44  ;;  %vm2091_vm9 = vcmp.eq.s32.totalorder %v4008_v11, 7 }
 0x232   : > { %v1105_v48 = vsel %vm1102_vm11, %v1104_v43, %v1100_v46 }
 0x233   : > { %v3999_v52 = vmul.f32 %v1105_v48, %v1082_v19  ;;  %v1115_v54 = vsel %vm1114_vm13, %v3163_v34, %v1111_v49  ;;  %vm1429_vm13 = vcmask 1040384  }
 0x234   : > { %v1120_v58 = vsel %vm1117_vm15, %v1119_v53, %v1115_v54  ;;  %vm1431_vm15 = vcmask 1041409  }
 0x235   : > { %4751 = vst [vmem:[#allocation39_spill] sm:$0xff] %v3999_v52  ;;  %v1126_v57 = vpack.c.bf16 %v3999_v52, %v3999_v52  ;;  %v4003_v59 = vmul.f32 %v1120_v58, %v1083_v23 }
 0x237   : > { %4752 = vst [vmem:[#allocation40_spill] sm:$0xff] %v4003_v59  ;;  %1159 = vmatpush.bf16.xpose.msrb.mxu0 %v1126_v57  ;;  %1326 = vmatmul.bf16.vlgmr.msrb.gmra.mxu2 %v1126_v57  ;;  %v1127_v63 = vpack.c.bf16 %v4003_v59, %v4003_v59 }
 0x239   : > { %1178 = vmatpush.bf16.xpose.msrb.mxu1 %v1127_v63  ;;  %1339 = vmatmul.bf16.vlgmr.msrb.gmra.mxu3 %v1127_v63 }
 0x23e   : > { %1160 = vmatmul.bf16.vlgmr.msrb.gmra.mxu0 %v2776_v22 }
 0x23f   : > { %1375 = vmatpush.bf16.msra.mxu0 %v1363_v60 }
 0x240   : > { %1179 = vmatmul.bf16.vlgmr.msrb.gmra.mxu1 %v2780_v25 }
 0x241   : > { %1388 = vmatpush.bf16.msra.mxu1 %v1366_v0 }
 0x24e   : > { %1165 = vmatmul.bf16.gmra.mxu0 %v2784_v5 }
 0x250   : > { %1184 = vmatmul.bf16.gmra.mxu1 %v2788_v8 }
 0x2ba   : > { %v1327_v10 = vpop.f32.mrf.mxu2 }
 0x2bb   : > { %v1161_v12 = vpop.f32.mrf.mxu0 }
 0x2bc   : > { %v1340_v15 = vpop.f32.mrf.mxu3 }
 0x2bd   : > { %v1341_v16 = vadd.f32 %v1340_v15, %v1327_v10  ;;  %v1180_v17 = vpop.f32.mrf.mxu1 }
 0x2be   : > { %v1181_v18 = vadd.f32 %v1180_v17, %v1161_v12 }
 0x2bf   : > { %v1344_v19 = vpack.c.bf16 %v1341_v16, %v1341_v16 }
 0x2c0   : > { %v1757_v20 = vsel %vm1756_vm0, %v1181_v18, 0.0  ;;  %v1690_v21 = vsel %vm1689_vm1, %v1181_v18, 0.0  ;;  %v1622_v23 = vsel %vm1621_vm2, %v1181_v18, 0.0  ;;  %v1958_v32 = vsel %vm1957_vm5, %v1181_v18, 0.0 }
 0x2c1   : > { %2853 = vmatmul.msk.bf16.vlgmr.msra.gmra.mxu0 %vm1357_vm3, %v1344_v19  ;;  %2854 = vmatmul.msk.bf16.vlgmr.msra.gmra.mxu1 %vm1357_vm3, %v1344_v19  ;;  %v1761_v24 = vsel %vm1357_vm3, %v1757_v20, 0.0  ;;  %v1694_v26 = vsel %vm1357_vm3, %v1690_v21, 0.0  ;;  %v1626_v27 = vsel %vm1357_vm3, %v1622_v23, 0.0  ;;  %v1824_v33 = vsel %vm1823_vm6, %v1181_v18, 0.0 }
 0x2c2   : > { %v1329_v28 = vpop.f32.mrf.mxu2  ;;  %1762 = vadd.xlane.f32.xlu0 %v1761_v24  ;;  %1695 = vadd.xlane.f32.xlu2 %v1694_v26  ;;  %v1891_v34 = vsel %vm1890_vm7, %v1181_v18, 0.0  ;;  %v1962_v35 = vsel %vm1357_vm3, %v1958_v32, 0.0  ;;  %v1828_v36 = vsel %vm1357_vm3, %v1824_v33, 0.0  ;;  %v2025_v41 = vsel %vm2024_vm8, %v1181_v18, 0.0 }
 0x2c3   : > { %1627 = vadd.xlane.f32.xlu1 %v1626_v27  ;;  %v1163_v29 = vpop.f32.mrf.mxu0  ;;  %v1895_v38 = vsel %vm1357_vm3, %v1891_v34, 0.0  ;;  %v2092_v43 = vsel %vm2091_vm9, %v1181_v18, 0.0  ;;  %v2029_v44 = vsel %vm1357_vm3, %v2025_v41, 0.0 }
 0x2c4   : > { %v1342_v30 = vpop.f32.mrf.mxu3  ;;  %v2096_v46 = vsel %vm1357_vm3, %v2092_v43, 0.0 }
 0x2c5   : > { %v1182_v31 = vpop.f32.mrf.mxu1 }
 0x2c6   : > { %v1183_v37 = vadd.f32 %v1182_v31, %v1163_v29 }
 0x2c8   : > { %v1825_v42 = vsel %vm1823_vm6, %v1183_v37, 0.0  ;;  %v2026_v49 = vsel %vm2024_vm8, %v1183_v37, 0.0  ;;  %v1691_v50 = vsel %vm1689_vm1, %v1183_v37, 0.0  ;;  %v1623_v53 = vsel %vm1621_vm2, %v1183_v37, 0.0 }
 0x2c9   : > { %v1831_v45 = vsel %vm1357_vm3, %v1825_v42, 0.0  ;;  %v2032_v57 = vsel %vm1357_vm3, %v2026_v49, 0.0  ;;  %v1697_v58 = vsel %vm1357_vm3, %v1691_v50, 0.0  ;;  %v1629_v62 = vsel %vm1357_vm3, %v1623_v53, 0.0 }
 0x2ca   : > { %1963 = vadd.xlane.f32.xlu0 %v1962_v35  ;;  %1829 = vadd.xlane.f32.xlu2 %v1828_v36  ;;  %v1892_v4 = vsel %vm1890_vm7, %v1183_v37, 0.0  ;;  %v1758_v5 = vsel %vm1756_vm0, %v1183_v37, 0.0  ;;  %v2093_v12 = vsel %vm2091_vm9, %v1183_v37, 0.0  ;;  %v1959_v15 = vsel %vm1957_vm5, %v1183_v37, 0.0 }
 0x2cb   : > { %1896 = vadd.xlane.f32.xlu1 %v1895_v38  ;;  %v1166_v39 = vpop.f32.mrf.mxu0  ;;  %v1898_v7 = vsel %vm1357_vm3, %v1892_v4, 0.0  ;;  %v1764_v8 = vsel %vm1357_vm3, %v1758_v5, 0.0  ;;  %v2099_v17 = vsel %vm1357_vm3, %v2093_v12, 0.0  ;;  %v1965_v18 = vsel %vm1357_vm3, %v1959_v15, 0.0 }
 0x2cc   : > { %v2175_v12 = vsub.f32 0.0, %v3955_v14 }
 0x2cd   : > { %v1185_v40 = vpop.f32.mrf.mxu1 }
 0x2ce   : > { %v4053_v54 = vadd.f32 %v1185_v40, %v1166_v39  ;;  %v1346_v40 = vld [vmem:[%s4753_s17] sm:$0x3]  ;;  %s2411_s17 = sshll.u32 %s2407_s27, 4  ;;  %s2412_s17 = int_to_ptr.hbm [resolvable:$true] %s2411_s17 }
 0x2cf   : > { %v1348_v41 = vperm.slane %v1346_v40, 0  ;;  %v1349_v42 = vperm.slane %v1346_v40, 1  ;;  %s3498_s5 = sshra.s32 %s2412_s17, 4  ;;  %s3499_s5 = int_to_ptr.hbm [resolvable:$true] %s3498_s5 }
 0x2d0   : > { %v1624_v3 = vsel %vm1621_vm2, %v4053_v54, 0.0  ;;  %v1826_v10 = vsel %vm1823_vm6, %v4053_v54, 0.0  ;;  %v1692_v19 = vsel %vm1689_vm1, %v4053_v54, 0.0  ;;  %v2027_v20 = vsel %vm2024_vm8, %v4053_v54, 0.0  ;;  %s3500_s15 = scalar_lea.hbm %s3499_s5, 8  ;;  %p3505_p10 = scmp.lt.s32.totalorder %s3499_s5, %s4796_s26 }
 0x2d1   : > { %v1632_v6 = vsel %vm1357_vm3, %v1624_v3, 0.0  ;;  %v1834_v16 = vsel %vm1357_vm3, %v1826_v10, 0.0  ;;  %v1759_v21 = vsel %vm1756_vm0, %v4053_v54, 0.0  ;;  %v1700_v23 = vsel %vm1357_vm3, %v1692_v19, 0.0  ;;  %p3501_p1 = scmp.ne.s32.totalorder %s3499_s5, %s3500_s15  ;;  %p3506_p11 = scmp.lt.s32.totalorder %s3504_s11, %s3500_s15 }
 0x2d2   : > { %2030 = vadd.xlane.f32.xlu2 %v2029_v44  ;;  %1832 = vadd.xlane.f32.xlu0 %v1831_v45  ;;  %v2035_v24 = vsel %vm1357_vm3, %v2027_v20, 0.0  ;;  %v1767_v26 = vsel %vm1357_vm3, %v1759_v21, 0.0  ;;  %v1893_v27 = vsel %vm1890_vm7, %v4053_v54, 0.0  ;;  %v1960_v29 = vsel %vm1957_vm5, %v4053_v54, 0.0 }
 0x2d3   : > { %2097 = vadd.xlane.f32.xlu1 %v2096_v46  ;;  %v1168_v47 = vpop.f32.mrf.mxu0  ;;  %v1901_v30 = vsel %vm1357_vm3, %v1893_v27, 0.0  ;;  %v1968_v32 = vsel %vm1357_vm3, %v1960_v29, 0.0  ;;  %v2094_v37 = vsel %vm2091_vm9, %v4053_v54, 0.0  ;;  %v2178_v27 = vmul.f32 1.442695, %v2175_v12  ;;  %p3502_p8 = pnand %p3501_p1, %p3843_p0  ;;  %p3507_p12 = por %p3506_p11, %p3505_p10 }
 0x2d4   : > { %v2102_v38 = vsel %vm1357_vm3, %v2094_v37, 0.0 }
 0x2d5   : > { %v1187_v48 = vpop.f32.mrf.mxu1  ;;  %p3503_p9 = pneg %p3502_p8 }
 0x2d6   : > { %v1188_v51 = vadd.f32 %v1187_v48, %v1168_v47 }
 0x2d7   : > { %p3508_p13 = pnand %p3507_p12, %p3503_p9 }
 0x2d8   : > { %v1760_v55 = vsel %vm1756_vm0, %v1188_v51, 0.0  ;;  %v1625_v56 = vsel %vm1621_vm2, %v1188_v51, 0.0  ;;  %v1961_v63 = vsel %vm1957_vm5, %v1188_v51, 0.0  ;;  %v1827_v0 = vsel %vm1823_vm6, %v1188_v51, 0.0 }
 0x2d9   : > { %v1770_v60 = vsel %vm1357_vm3, %v1760_v55, 0.0  ;;  %v1635_v61 = vsel %vm1357_vm3, %v1625_v56, 0.0  ;;  %v2028_v22 = vsel %vm2024_vm8, %v1188_v51, 0.0  ;;  %v1971_v1 = vsel %vm1357_vm3, %v1961_v63, 0.0 }
 0x2da   : > { %2033 = vadd.xlane.f32.xlu0 %v2032_v57  ;;  %1698 = vadd.xlane.f32.xlu2 %v1697_v58  ;;  %v1837_v2 = vsel %vm1357_vm3, %v1827_v0, 0.0  ;;  %v2038_v25 = vsel %vm1357_vm3, %v2028_v22, 0.0  ;;  %v1693_v28 = vsel %vm1689_vm1, %v1188_v51, 0.0  ;;  %v1894_v33 = vsel %vm1890_vm7, %v1188_v51, 0.0 }
 0x2db   : > { %1630 = vadd.xlane.f32.xlu1 %v1629_v62  ;;  %v1703_v31 = vsel %vm1357_vm3, %v1693_v28, 0.0  ;;  %v1904_v34 = vsel %vm1357_vm3, %v1894_v33, 0.0  ;;  %v2095_v35 = vsel %vm2091_vm9, %v1188_v51, 0.0  ;;  %v2174_v22 = vsub.f32 0.0, %v3953_v13  ;;  %v4162_v33 = vld [vmem:[#allocation18 + $0x18] sm:$0xff] }
 0x2dc   : > { %v2105_v36 = vsel %vm1357_vm3, %v2095_v35, 0.0  ;;  %vm1434_vm0 = vcmask 1042434   ;;  %vm1437_vm1 = vcmask 1043459   ;;  %vm1440_vm2 = vcmask 1044484  }
 0x2dd   : > { %vm1443_vm3 = vcmask 1045509   ;;  %vm1446_vm5 = vcmask 1046534  }
 0x2e2   : > { %1899 = vadd.xlane.f32.xlu2 %v1898_v7  ;;  %1633 = vadd.xlane.f32.xlu0 %v1632_v6 }
 0x2e3   : > { %1765 = vadd.xlane.f32.xlu1 %v1764_v8 }
 0x2ea   : > { %2100 = vadd.xlane.f32.xlu2 %v2099_v17  ;;  %1835 = vadd.xlane.f32.xlu0 %v1834_v16 }
 0x2eb   : > { %1966 = vadd.xlane.f32.xlu1 %v1965_v18 }
 0x2f2   : > { %1701 = vadd.xlane.f32.xlu2 %v1700_v23  ;;  %2036 = vadd.xlane.f32.xlu0 %v2035_v24 }
 0x2f3   : > { %1768 = vadd.xlane.f32.xlu1 %v1767_v26 }
 0x2fa   : > { %1902 = vadd.xlane.f32.xlu2 %v1901_v30  ;;  %1704 = vadd.xlane.f32.xlu0 %v1703_v31 }
 0x2fb   : > { %1969 = vadd.xlane.f32.xlu1 %v1968_v32  ;;  %v4160_v32 = vld [vmem:[#allocation18 + $0x10] sm:$0xff] }
 0x302   : > { %1771 = vadd.xlane.f32.xlu2 %v1770_v60  ;;  %1905 = vadd.xlane.f32.xlu0 %v1904_v34 }
 0x303   : > { %1636 = vadd.xlane.f32.xlu1 %v1635_v61 }
 0x30a   : > { %1972 = vadd.xlane.f32.xlu2 %v1971_v1  ;;  %2106 = vadd.xlane.f32.xlu0 %v2105_v36 }
 0x30b   : > { %1838 = vadd.xlane.f32.xlu1 %v1837_v2 }
 0x312   : > { %2103 = vadd.xlane.f32.xlu2 %v2102_v38 }
 0x313   : > { %2039 = vadd.xlane.f32.xlu1 %v2038_v25  ;;  %v2176_v25 = vmul.f32 1.442695, %v2174_v22 }
 0x335   : > { %v4131_v43 = vpop.xlane.xlu2 %1695  ;;  %v4135_v50 = vpop.xlane.xlu0 %1762 }
 0x336   : > { %v4126_v39 = vpop.xlane.xlu1 %1627 }
 0x33d   : > { %v4137_v56 = vpop.xlane.xlu2 %1829  ;;  %v4141_v62 = vpop.xlane.xlu0 %1963 }
 0x33e   : > { %v4133_v44 = vpop.xlane.xlu1 %1896  ;;  %v1377_v45 = vpop.f32.mrf.mxu0 }
 0x33f   : > { %v1378_v46 = vadd.f32 %v1377_v45, %v1348_v41  ;;  %v1390_v11 = vpop.f32.mrf.mxu1  ;;  %v4180_v45 = vld [vmem:[#allocation18 + $0x8] sm:$0xff] }
 0x340   : > { %v1391_v47 = vadd.f32 %v1390_v11, %v1349_v42  ;;  %v4178_v42 = vld [vmem:[#allocation18] sm:$0xff]  ;;  %4757 = vst [vmem:[#allocation44_spill] sm:$0xff] %v4180_v45 }
 0x341   : > { %v1396_v48 = vmin.f32 %v1378_v46, 20.0  ;;  %vm1394_vm11 = vcmp.gt.f32.partialorder %v1378_v46, 20.0  ;;  %4756 = vst [vmem:[#allocation43_spill] sm:$0xff] %v4178_v42 }
 0x342   : > { %v1397_v49 = vmin.f32 %v1391_v47, 20.0  ;;  %vm1395_vm14 = vcmp.gt.f32.partialorder %v1391_v47, 20.0 }
 0x343   : > { %v1398_v51 = vmul.f32 1.442695, %v1396_v48 }
 0x344   : > { %v1400_v53 = vmul.f32 1.442695, %v1397_v49 }
 0x345   : > { %3164 = vpow2.f32 %v1398_v51  ;;  %v4144_v5 = vpop.xlane.xlu2 %2030  ;;  %v4149_v20 = vpop.xlane.xlu0 %1832 }
 0x346   : > { %3166 = vpow2.f32 %v1400_v53  ;;  %v1379_v54 = vpop.f32.mrf.mxu0  ;;  %v4139_v57 = vpop.xlane.xlu1 %2097 }
 0x347   : > { %v1392_v55 = vpop.f32.mrf.mxu1  ;;  %4754 = vst [vmem:[#allocation41_spill] sm:$0xff] %v4139_v57 }
 0x34b   : > { %v3165_v58 = vpop.eup %3164 }
 0x34c   : > { %v3167_v60 = vpop.eup %3166  ;;  %v1402_v61 = vadd.f32 1.0, %v3165_v58  ;;  %v1405_v63 = vmul.f32 -0.5, %v3165_v58  ;;  %v1408_v3 = vand.u32 2147483647, %v3165_v58 }
 0x34d   : > { %v1411_v0 = vadd.f32 1.0, %v3167_v60  ;;  %v1414_v1 = vmul.f32 -0.5, %v3167_v60  ;;  %v1417_v7 = vand.u32 2147483647, %v3167_v60  ;;  %v4158_v31 = vpop.xlane.xlu2 %1698 }
 0x34e   : > { %3168 = vlog2.f32 %v1402_v61  ;;  %v1406_v2 = vadd.f32 1.0, %v1405_v63  ;;  %v4146_v6 = vpop.xlane.xlu1 %1630  ;;  %vm1409_vm10 = vcmp.lt.f32.partialorder %v1408_v3, 0.0004427343 }
 0x34f   : > { %3170 = vlog2.f32 %v1411_v0  ;;  %v1415_v4 = vadd.f32 1.0, %v1414_v1  ;;  %vm1418_vm12 = vcmp.lt.f32.partialorder %v1417_v7, 0.0004427343 }
 0x350   : > { %v1407_v16 = vmul.f32 %v3165_v58, %v1406_v2  ;;  %3172 = vpow2.f32 %v2176_v25  ;;  %v2034_v58 = vpop.xlane.xlu0 %2033 }
 0x351   : > { %v1416_v18 = vmul.f32 %v3167_v60, %v1415_v4  ;;  %3174 = vpow2.f32 %v2178_v27  ;;  %v1620_v27 = vld [vmem:[#allocation2 + $0x8] sm:$0xff] }
 0x354   : > { %v3169_v8 = vpop.eup %3168 }
 0x355   : > { %v3171_v10 = vpop.eup %3170  ;;  %v1404_v15 = vmul.f32 0.6931472, %v3169_v8 }
 0x356   : > { %v1413_v17 = vmul.f32 0.6931472, %v3171_v10  ;;  %v3173_v30 = vpop.eup %3172  ;;  %v4167_v35 = vpop.xlane.xlu1 %1765 }
 0x357   : > { %v1410_v19 = vsel %vm1409_vm10, %v1407_v16, %v1404_v15  ;;  %v4192_v22 = vadd.f32 1.0, %v3173_v30  ;;  %v4212_v10 = vpop.eup %3174 }
 0x358   : > { %v4151_v21 = vsel %vm1394_vm11, %v1378_v46, %v1410_v19  ;;  %v1419_v23 = vsel %vm1418_vm12, %v1416_v18, %v1413_v17  ;;  %4760 = vst [vmem:[#allocation47_spill] sm:$0xff] %v4212_v10 }
 0x359   : > { %v1611_v24 = vmul.f32 %v4151_v21, %v3999_v52  ;;  %v1421_v26 = vsel %vm1395_vm14, %v1391_v47, %v1419_v23  ;;  %4758 = vst [vmem:[#allocation45_spill] sm:$0xff] %v4192_v22 }
 0x35a   : > { %v4155_v28 = vrot.slane %v1421_v26, 7  ;;  %v1612_v29 = vmul.f32 %v1421_v26, %v4003_v59 }
 0x35b   : > { %1613 = vst [vmem:[#allocation5] sm:$0xff] %v1611_v24 }
 0x35c   : > { %4755 = vst [vmem:[#allocation42_spill] sm:$0xff] %v4155_v28  ;;  %v1430_v34 = vsel %vm1429_vm13, %v4151_v21, %v4155_v28  ;;  %v1432_v36 = vsel %vm1431_vm15, %v4151_v21, %v4155_v28  ;;  %v1435_v37 = vsel %vm1434_vm0, %v4151_v21, %v4155_v28  ;;  %v4176_v38 = vsel %vm1437_vm1, %v4151_v21, %v4155_v28 }
 0x35d   : > { %1614 = vst [vmem:[#allocation5 + $0x8] sm:$0xff] %v1612_v29  ;;  %v1451_v40 = vperm.slane %v1430_v34, 0  ;;  %v1452_v41 = vperm.slane %v1430_v34, 1  ;;  %v1433_v46 = vrot.slane %v1432_v36, 1  ;;  %v1436_v11 = vrot.slane %v1435_v37, 2  ;;  %v1900_v34 = vpop.xlane.xlu2 %1899 }
 0x35e   : > { %v4701_v47 = vrot.slane %v4176_v38, 3  ;;  %v4188_v51 = vsel %vm1440_vm2, %v4151_v21, %v4155_v28  ;;  %v4206_v7 = vsel %vm1443_vm3, %v4151_v21, %v4155_v28  ;;  %v4210_v8 = vsel %vm1446_vm5, %v4151_v21, %v4155_v28  ;;  %v4225_v36 = vpop.xlane.xlu1 %1966 }
 0x35f   : > { %v1485_v48 = vmul.f32 %v1451_v40, %v4160_v32  ;;  %v1486_v49 = vmul.f32 %v1452_v41, %v4162_v33  ;;  %v1453_v53 = vperm.slane %v1433_v46, 0  ;;  %v1483_v54 = vmul.f32 %v1451_v40, %v4178_v42 }
 0x360   : > { %v1484_v55 = vmul.f32 %v1452_v41, %v4180_v45  ;;  %v1454_v63 = vperm.slane %v1433_v46, 1  ;;  %v1455_v0 = vperm.slane %v1436_v11, 0  ;;  %v4195_v2 = vperm.slane %v1436_v11, 1 }
 0x361   : > { %v1519_v60 = vmul.f32 1.442695, %v1485_v48  ;;  %v1521_v61 = vmul.f32 1.442695, %v1486_v49  ;;  %v4199_v25 = vperm.slane %v4701_v47, 0  ;;  %v1487_v23 = vmul.f32 %v1453_v53, %v4178_v42 }
 0x362   : > { %v1515_v16 = vmul.f32 1.442695, %v1483_v54  ;;  %v1517_v17 = vmul.f32 1.442695, %v1484_v55  ;;  %v1488_v24 = vmul.f32 %v1454_v63, %v4180_v45  ;;  %v4219_v26 = vmul.f32 %v1455_v0, %v4178_v42 }
 0x363   : > { %3176 = vpow2.f32 %v1519_v60  ;;  %v4228_v37 = vmul.f32 %v1453_v53, %v4160_v32  ;;  %v4231_v40 = vmul.f32 %v1454_v63, %v4162_v33  ;;  %v4237_v48 = vmul.f32 %v4195_v2, %v4180_v45  ;;  %v1619_v53 = vld [vmem:[#allocation2 + $0x18] sm:$0xff] }
 0x364   : > { %v2051_v3 = vld [vmem:[#allocation5 + $0x6] ss:$8 sm:$0x3]  ;;  %v4201_v4 = vld [vmem:[#allocation5 + $0x7] ss:$8 sm:$0x3]  ;;  %3178 = vpow2.f32 %v1521_v61  ;;  %v4241_v49 = vmul.f32 %v4199_v25, %v4178_v42  ;;  %v4245_v61 = vmul.f32 %v1455_v0, %v4160_v32 }
 0x365   : > { %4759 = vst [vmem:[#allocation46_spill] sm:$0xff] %v4201_v4  ;;  %v2053_v12 = vperm.slane %v2051_v3, 0  ;;  %v2054_v15 = vperm.slane %v2051_v3, 1  ;;  %v4214_v18 = vld [vmem:[#allocation5 + $0x3] ss:$8 sm:$0x3]  ;;  %3180 = vpow2.f32 %v1515_v16 }
 0x366   : > { %v1716_v19 = vld [vmem:[#allocation5 + $0x1] ss:$8 sm:$0x3]  ;;  %v4223_v30 = vld [vmem:[#allocation5] ss:$8 sm:$0x3]  ;;  %3182 = vpow2.f32 %v1517_v17  ;;  %v4304_v17 = vpop.xlane.xlu2 %2100 }
 0x367   : > { %v4706_v41 = vperm.slane %v4214_v18, 0  ;;  %v4708_v46 = vperm.slane %v4214_v18, 1  ;;  %v1917_v11 = vld [vmem:[#allocation5 + $0x4] ss:$8 sm:$0x3]  ;;  %v1718_v54 = vperm.slane %v1716_v19, 0  ;;  %v4248_v3 = vmul.f32 %v2053_v12, %v4144_v5 }
 0x368   : > { %v1719_v55 = vperm.slane %v1716_v19, 1  ;;  %v1648_v60 = vperm.slane %v4223_v30, 0  ;;  %v4251_v29 = vmul.f32 %v2054_v15, %v4144_v5  ;;  %v4253_v9 = vmul.f32 %v2053_v12, %v2034_v58  ;;  %v1783_v5 = vld [vmem:[#allocation5 + $0x2] ss:$8 sm:$0x3]  ;;  %4763 = vst [vmem:[#allocation50_spill] sm:$0xff] %v4304_v17 }
 0x369   : > { %v3177_v63 = vpop.eup %3176  ;;  %v1649_v1 = vperm.slane %v4223_v30, 1  ;;  %v4259_v19 = vmul.f32 %v4706_v41, %v4149_v20  ;;  %v4264_v0 = vmul.f32 %v4708_v46, %v4149_v20  ;;  %v4266_v47 = vmul.f32 %v2054_v15, %v2034_v58  ;;  %v4274_v41 = vpop.xlane.xlu0 %1633 }
 0x36a   : > { %4761 = vst [vmem:[#allocation48_spill] sm:$0xff] %v4253_v9  ;;  %v1919_v14 = vperm.slane %v1917_v11, 0  ;;  %v3179_v13 = vpop.eup %3178  ;;  %v4269_v12 = vmul.f32 %v1718_v54, %v4131_v43  ;;  %v4272_v30 = vmul.f32 %v1719_v55, %v4131_v43  ;;  %v1644_v59 = vmul.f32 %v3177_v63, %v1619_v53  ;;  %v1984_v43 = vld [vmem:[#allocation5 + $0x5] ss:$8 sm:$0x3] }
 0x36b   : > { %4762 = vst [vmem:[#allocation49_spill] sm:$0xff] %v4266_v47  ;;  %v1920_v52 = vperm.slane %v1917_v11, 1  ;;  %v4277_v57 = vmul.f32 %v1718_v54, %v4158_v31  ;;  %v4280_v20 = vmul.f32 %v1719_v55, %v4158_v31  ;;  %v1645_v58 = vmul.f32 %v3179_v13, %v1620_v27 }
 0x36c   : > { %v1654_v15 = vmul.f32 %v1648_v60, %v4146_v6  ;;  %v1655_v46 = vmul.f32 %v1649_v1, %v4146_v6  ;;  %v1785_v22 = vperm.slane %v1783_v5, 0  ;;  %v1786_v10 = vperm.slane %v1783_v5, 1 }
 0x36d   : > { %v4285_v53 = vmul.f32 %v1919_v14, %v4133_v44  ;;  %v1523_v11 = vmul.f32 1.442695, %v1487_v23  ;;  %v1525_v63 = vmul.f32 1.442695, %v1488_v24  ;;  %v4290_v31 = vmul.f32 %v1920_v52, %v4133_v44  ;;  %v1618_v24 = vld [vmem:[#allocation2] sm:$0xff] }
 0x36e   : > { %v4287_v54 = vadd.f32 %v1654_v15, %v1644_v59  ;;  %v4292_v13 = vmul.f32 %v1919_v14, %v1900_v34  ;;  %v4294_v27 = vmul.f32 %v1920_v52, %v1900_v34  ;;  %v4296_v6 = vadd.f32 %v1655_v46, %v1645_v58  ;;  %v4306_v59 = vpop.xlane.xlu1 %1768  ;;  %v1617_v14 = vld [vmem:[#allocation2 + $0x10] sm:$0xff] }
 0x36f   : > { %v4299_v16 = vmul.f32 %v1785_v22, %v4135_v50  ;;  %v4302_v55 = vmul.f32 %v1786_v10, %v4135_v50  ;;  %3184 = vpow2.f32 %v1523_v11  ;;  %v4309_v44 = vmul.f32 %v1785_v22, %v4167_v35  ;;  %v3181_v11 = vpop.eup %3180 }
 0x370   : > { %3186 = vpow2.f32 %v1525_v63  ;;  %v1986_v52 = vperm.slane %v1984_v43, 0  ;;  %v1987_v23 = vperm.slane %v1984_v43, 1  ;;  %v4764_v34 = vrot.slane %v4176_v38, 3 }
 0x371   : > { %v4765_v50 = vrot.slane %v4188_v51, 4  ;;  %v1531_v22 = vmul.f32 1.442695, %v4219_v26  ;;  %v4325_v63 = vmul.f32 %v1786_v10, %v4167_v35  ;;  %v1652_v43 = vmul.f32 %v1648_v60, %v4126_v39  ;;  %v4340_v60 = vpop.xlane.xlu0 %1835 }
 0x372   : > { %v4313_v46 = vperm.slane %v4764_v34, 1  ;;  %v1653_v38 = vmul.f32 %v1649_v1, %v4126_v39  ;;  %v4767_v34 = vperm.slane %v4201_v4, 0  ;;  %v1642_v9 = vmul.f32 %v3181_v11, %v1617_v14 }
 0x373   : > { %v4317_v5 = vperm.slane %v4765_v50, 0  ;;  %v4766_v58 = vmov %v4765_v50  ;;  %v3183_v50 = vpop.eup %3182  ;;  %3188 = vpow2.f32 %v1531_v22  ;;  %v1533_v39 = vmul.f32 1.442695, %v4237_v48 }
 0x374   : > { %v4321_v15 = vperm.slane %v4766_v58, 1  ;;  %v4332_v47 = vmul.f32 %v4767_v34, %v4304_v17  ;;  %v1496_v51 = vmul.f32 %v4313_v46, %v4180_v45  ;;  %v1643_v10 = vmul.f32 %v3183_v50, %v1618_v24 }
 0x375   : > { %v1499_v26 = vmul.f32 %v4317_v5, %v4178_v42  ;;  %v1539_v1 = vmul.f32 1.442695, %v4241_v49  ;;  %v3185_v58 = vpop.eup %3184  ;;  %v1656_v34 = vadd.f32 %v1652_v43, %v1642_v9  ;;  %v4345_v14 = vmul.f32 %v1986_v52, %v4141_v62 }
 0x376   : > { %4768 = vst [vmem:[#allocation51_spill] sm:$0xff] %v4332_v47  ;;  %v1500_v35 = vmul.f32 %v4321_v15, %v4180_v45  ;;  %v4348_v11 = vmul.f32 %v1987_v23, %v4141_v62  ;;  %v4351_v47 = vmul.f32 %v1986_v52, %v4225_v36  ;;  %v3187_v4 = vpop.eup %3186  ;;  %v1657_v24 = vadd.f32 %v1653_v38, %v1643_v10 }
 0x377   : > { %v4354_v50 = vmul.f32 %v1987_v23, %v4225_v36  ;;  %3190 = vpow2.f32 %v1533_v39  ;;  %v1541_v48 = vmul.f32 1.442695, %v1496_v51  ;;  %v1711_v22 = vmul.f32 %v3185_v58, %v1656_v34  ;;  %v1702_v51 = vpop.xlane.xlu2 %1701 }
 0x378   : > { %v1547_v49 = vmul.f32 1.442695, %v1499_v26  ;;  %v1549_v17 = vmul.f32 1.442695, %v1500_v35  ;;  %v1445_v9 = vrot.slane %v4206_v7, 5  ;;  %v1712_v43 = vmul.f32 %v3187_v4, %v1657_v24  ;;  %v4369_v7 = vpop.xlane.xlu1 %1969 }
 0x379   : > { %4769 = vst [vmem:[#allocation52_spill] sm:$0xff] %v4354_v50  ;;  %3192 = vpow2.f32 %v1539_v1  ;;  %v4770_v62 = vperm.slane %v4214_v18, 0  ;;  %v1448_v52 = vrot.slane %v4210_v8, 6  ;;  %v1726_v38 = vadd.f32 %v4269_v12, %v1711_v22  ;;  %v3189_v4 = vpop.eup %3188 }
 0x37a   : > { %v4771_v36 = vperm.slane %v4214_v18, 1  ;;  %v4365_v10 = vperm.slane %v1445_v9, 0  ;;  %v4367_v26 = vperm.slane %v1445_v9, 1  ;;  %v1727_v35 = vadd.f32 %v4272_v30, %v1712_v43 }
 0x37b   : > { %v1856_v28 = vmul.f32 %v4770_v62, %v4137_v56  ;;  %3194 = vpow2.f32 %v1541_v48  ;;  %v4372_v39 = vperm.slane %v1448_v52, 0  ;;  %v4374_v8 = vperm.slane %v1448_v52, 1 }
 0x37c   : > { %v1857_v23 = vmul.f32 %v4771_v36, %v4137_v56  ;;  %3196 = vpow2.f32 %v1547_v49  ;;  %v1778_v12 = vmul.f32 %v3189_v4, %v1726_v38  ;;  %v1503_v56 = vmul.f32 %v4365_v10, %v4178_v42 }
 0x37d   : > { %v1504_v18 = vmul.f32 %v4367_v26, %v4180_v45  ;;  %v3191_v1 = vpop.eup %3190  ;;  %3198 = vpow2.f32 %v1549_v17  ;;  %v1507_v58 = vmul.f32 %v4372_v39, %v4178_v42  ;;  %v1508_v30 = vmul.f32 %v4374_v8, %v4180_v45  ;;  %v4390_v17 = vpop.xlane.xlu0 %2036 }
 0x37e   : > { %v1527_v48 = vmul.f32 1.442695, %v4228_v37  ;;  %v1779_v22 = vmul.f32 %v3191_v1, %v1727_v35  ;;  %v1793_v49 = vadd.f32 %v4299_v16, %v1778_v12  ;;  %v1555_v9 = vmul.f32 1.442695, %v1503_v56 }
 0x37f   : > { %v1557_v43 = vmul.f32 1.442695, %v1504_v18  ;;  %v3193_v62 = vpop.eup %3192  ;;  %v1660_v52 = vmul.f32 %v1656_v34, %v4274_v41  ;;  %v4388_v36 = vmul.f32 %v1657_v24, %v4274_v41  ;;  %v1563_v4 = vmul.f32 1.442695, %v1507_v58 }
 0x380   : > { %3200 = vpow2.f32 %v1527_v48  ;;  %v1794_v42 = vadd.f32 %v4302_v55, %v1779_v22  ;;  %v1845_v45 = vmul.f32 %v3193_v62, %v1793_v49  ;;  %v1730_v50 = vmul.f32 %v1726_v38, %v1702_v51  ;;  %v1903_v48 = vpop.xlane.xlu2 %1902  ;;  %v1637_v22 = vpop.xlane.xlu1 %1636 }
 0x381   : > { %v1529_v37 = vmul.f32 1.442695, %v4231_v40  ;;  %v3195_v1 = vpop.eup %3194  ;;  %3202 = vpow2.f32 %v1555_v9  ;;  %v1565_v16 = vmul.f32 1.442695, %v1508_v30  ;;  %v1494_v12 = vmul.f32 %v4195_v2, %v4162_v33 }
 0x382   : > { %v1497_v41 = vmul.f32 %v4199_v25, %v4160_v32  ;;  %v3197_v34 = vpop.eup %3196  ;;  %v1846_v24 = vmul.f32 %v3195_v1, %v1794_v42  ;;  %v1860_v56 = vadd.f32 %v1856_v28, %v1845_v45  ;;  %v4398_v18 = vmul.f32 %v1727_v35, %v1702_v51 }
 0x383   : > { %3204 = vpow2.f32 %v1557_v43  ;;  %v3199_v55 = vpop.eup %3198  ;;  %v4401_v38 = vmul.f32 %v1793_v49, %v4306_v59  ;;  %v1498_v40 = vmul.f32 %v4313_v46, %v4162_v33  ;;  %v1535_v58 = vmul.f32 1.442695, %v4245_v61 }
 0x384   : > { %3206 = vpow2.f32 %v1563_v4  ;;  %v1861_v2 = vadd.f32 %v1857_v23, %v1846_v24  ;;  %v1912_v30 = vmul.f32 %v3197_v34, %v1860_v56  ;;  %v1537_v25 = vmul.f32 1.442695, %v1494_v12 }
 0x385   : > { %3208 = vpow2.f32 %v1529_v37  ;;  %v4407_v45 = vmul.f32 %v1794_v42, %v4306_v59  ;;  %v1543_v51 = vmul.f32 1.442695, %v1497_v41  ;;  %v1501_v35 = vmul.f32 %v4317_v5, %v4160_v32 }
 0x386   : > { %v3201_v28 = vpop.eup %3200  ;;  %3210 = vpow2.f32 %v1565_v16  ;;  %v1913_v49 = vmul.f32 %v3199_v55, %v1861_v2  ;;  %v1927_v46 = vadd.f32 %v4285_v53, %v1912_v30  ;;  %v4414_v9 = vmul.f32 %v1860_v56, %v4340_v60  ;;  %v1705_v16 = vpop.xlane.xlu0 %1704 }
 0x387   : > { %v1713_v61 = vmul.f32 %v3201_v28, %v4287_v54  ;;  %3212 = vpow2.f32 %v1535_v58  ;;  %v3203_v23 = vpop.eup %3202  ;;  %v1545_v43 = vmul.f32 1.442695, %v1498_v40  ;;  %v1502_v42 = vmul.f32 %v4321_v15, %v4162_v33 }
 0x388   : > { %v1662_v59 = vmul.f32 %v4287_v54, %v1637_v22  ;;  %v1928_v4 = vadd.f32 %v4290_v31, %v1913_v49  ;;  %v1979_v5 = vmul.f32 %v3203_v23, %v1927_v46  ;;  %3214 = vpow2.f32 %v1537_v25 }
 0x389   : > { %v3205_v62 = vpop.eup %3204  ;;  %v1728_v37 = vadd.f32 %v4277_v57, %v1713_v61  ;;  %v4422_v1 = vmul.f32 %v1861_v2, %v4340_v60  ;;  %3216 = vpow2.f32 %v1543_v51  ;;  %v1551_v12 = vmul.f32 1.442695, %v1501_v35 }
 0x38a   : > { %v3207_v53 = vpop.eup %3206  ;;  %v1664_v41 = vadd.f32 %v1662_v59, %v1660_v52  ;;  %v1980_v24 = vmul.f32 %v3205_v62, %v1928_v4  ;;  %v1994_v15 = vadd.f32 %v4345_v14, %v1979_v5  ;;  %v1663_v56 = vmul.f32 %v4296_v6, %v1637_v22 }
 0x38b   : > { %v3209_v34 = vpop.eup %3208  ;;  %v1732_v54 = vmul.f32 %v1728_v37, %v1705_v16  ;;  %v4426_v55 = vmul.f32 %v1927_v46, %v1903_v48  ;;  %v1553_v40 = vmul.f32 1.442695, %v1502_v42  ;;  %3218 = vpow2.f32 %v1545_v43  ;;  %v1772_v46 = vpop.xlane.xlu2 %1771 }
 0x38c   : > { %v3211_v31 = vpop.eup %3210  ;;  %v1714_v57 = vmul.f32 %v3209_v34, %v4296_v6  ;;  %v1665_v58 = vrot.slane %v1664_v41, 4  ;;  %v1995_v2 = vadd.f32 %v4348_v11, %v1980_v24  ;;  %v2046_v30 = vmul.f32 %v3207_v53, %v1994_v15 }
 0x38d   : > { %v3213_v60 = vpop.eup %3212  ;;  %v1734_v25 = vadd.f32 %v1732_v54, %v1730_v50  ;;  %v4430_v52 = vmul.f32 %v1928_v4, %v1903_v48  ;;  %v1671_v61 = vadd.f32 %v1663_v56, %v4388_v36  ;;  %3220 = vpow2.f32 %v1551_v12 }
 0x38e   : > { %v1729_v14 = vadd.f32 %v4280_v20, %v1714_v57  ;;  %v1780_v28 = vmul.f32 %v3213_v60, %v1728_v37  ;;  %v1666_v51 = vadd.f32 %v1665_v58, %v1664_v41  ;;  %v3215_v22 = vpop.eup %3214  ;;  %v2047_v35 = vmul.f32 %v3211_v31, %v1995_v2 }
 0x38f   : > { %v4434_v49 = vadd.f32 %v4248_v3, %v2046_v30  ;;  %v1735_v6 = vrot.slane %v1734_v25, 4  ;;  %v3217_v23 = vpop.eup %3216  ;;  %3222 = vpow2.f32 %v1553_v40  ;;  %v4444_v36 = vmul.f32 %v1994_v15, %v4369_v7 }
 0x390   : > { %v1733_v11 = vmul.f32 %v1729_v14, %v1705_v16  ;;  %v1781_v42 = vmul.f32 %v3215_v22, %v1729_v14  ;;  %v1795_v50 = vadd.f32 %v4309_v44, %v1780_v28  ;;  %v4439_v48 = vadd.f32 %v4251_v29, %v2047_v35 }
 0x391   : > { %v1736_v20 = vadd.f32 %v1735_v6, %v1734_v25  ;;  %v1667_v43 = vrot.slane %v1666_v51, 2  ;;  %v3219_v5 = vpop.eup %3218  ;;  %v1672_v44 = vrot.slane %v1671_v61, 4  ;;  %v4455_v58 = vmul.f32 %v1995_v2, %v4369_v7 }
 0x392   : > { %v1741_v59 = vadd.f32 %v1733_v11, %v4398_v18  ;;  %v1796_v3 = vadd.f32 %v4325_v63, %v1781_v42  ;;  %v1847_v62 = vmul.f32 %v3217_v23, %v1795_v50  ;;  %v1799_v4 = vmul.f32 %v1795_v50, %v1772_v46  ;;  %v1906_v23 = vpop.xlane.xlu0 %1905 }
 0x393   : > { %v1737_v37 = vrot.slane %v1736_v20, 2  ;;  %v1668_v53 = vadd.f32 %v1667_v43, %v1666_v51  ;;  %v1673_v63 = vadd.f32 %v1672_v44, %v1671_v61  ;;  %v3221_v54 = vpop.eup %3220  ;;  %v1505_v7 = vmul.f32 %v4365_v10, %v4160_v32 }
 0x394   : > { %v1742_v16 = vrot.slane %v1741_v59, 4  ;;  %v1848_v12 = vmul.f32 %v3219_v5, %v1796_v3  ;;  %v1800_v29 = vmul.f32 %v1796_v3, %v1772_v46  ;;  %v1801_v41 = vadd.f32 %v1799_v4, %v4401_v38 }
 0x395   : > { %v1738_v34 = vadd.f32 %v1737_v37, %v1736_v20  ;;  %v4448_v24 = vadd.f32 %v4259_v19, %v1847_v62  ;;  %v1669_v18 = vrot.slane %v1668_v53, 1  ;;  %v3223_v40 = vpop.eup %3222  ;;  %v1674_v30 = vrot.slane %v1673_v63, 2 }
 0x396   : > { %v1743_v56 = vadd.f32 %v1742_v16, %v1741_v59  ;;  %v1802_v31 = vrot.slane %v1801_v41, 4  ;;  %v1808_v15 = vadd.f32 %v1800_v29, %v4407_v45  ;;  %v4452_v57 = vadd.f32 %v4264_v0, %v1848_v12 }
 0x397   : > { %v1739_v60 = vrot.slane %v1738_v34, 1  ;;  %v1914_v38 = vmul.f32 %v3221_v54, %v4448_v24  ;;  %v4772_v19 = vlaneseq  ;;  %v1670_v22 = vadd.f32 %v1669_v18, %v1668_v53  ;;  %v1839_v18 = vpop.xlane.xlu1 %1838 }
 0x398   : > { %v1744_v14 = vrot.slane %v1743_v56, 2  ;;  %v1803_v28 = vadd.f32 %v1802_v31, %v1801_v41  ;;  %v1809_v51 = vrot.slane %v1808_v15, 4  ;;  %v1915_v45 = vmul.f32 %v3223_v40, %v4452_v57  ;;  %v4775_v40 = vld [vmem:[#allocation42_spill] sm:$0xff] }
 0x399   : > { %vm4459_vm6 = vcmp.lt.s32.totalorder %v4772_v19, 256  ;;  %v1929_v0 = vadd.f32 %v4292_v13, %v1914_v38  ;;  %v1675_v35 = vadd.f32 %v1674_v30, %v1673_v63  ;;  %v1740_v11 = vadd.f32 %v1739_v60, %v1738_v34 }
 0x39a   : > { %v1745_v2 = vadd.f32 %v1744_v14, %v1743_v56  ;;  %v1804_v6 = vrot.slane %v1803_v28, 2  ;;  %v1810_v46 = vadd.f32 %v1809_v51, %v1808_v15  ;;  %v1930_v61 = vadd.f32 %v4294_v27, %v1915_v45 }
 0x39b   : > { %v1933_v42 = vmul.f32 %v1929_v0, %v1906_v23  ;;  %v1676_v50 = vrot.slane %v1675_v35, 1  ;;  %v1506_v20 = vmul.f32 %v4367_v26, %v4162_v33  ;;  %v1509_v10 = vmul.f32 %v4372_v39, %v4160_v32 }
 0x39c   : > { %v1746_v43 = vrot.slane %v1745_v2, 1  ;;  %v1805_v59 = vadd.f32 %v1804_v6, %v1803_v28  ;;  %v1811_v13 = vrot.slane %v1810_v46, 2  ;;  %v1934_v3 = vmul.f32 %v1930_v61, %v1906_v23 }
 0x39d   : > { %v1935_v62 = vadd.f32 %v1933_v42, %v4426_v55  ;;  %v1677_v4 = vadd.f32 %v1676_v50, %v1675_v35  ;;  %v1559_v5 = vmul.f32 1.442695, %v1505_v7  ;;  %v1510_v44 = vmul.f32 %v4374_v8, %v4162_v33 }
 0x39e   : > { %v1747_v37 = vadd.f32 %v1746_v43, %v1745_v2  ;;  %v1812_v27 = vadd.f32 %v1811_v13, %v1810_v46  ;;  %v1942_v53 = vadd.f32 %v1934_v3, %v4430_v52  ;;  %v1561_v12 = vmul.f32 1.442695, %v1506_v20  ;;  %v1973_v13 = vpop.xlane.xlu2 %1972 }
 0x39f   : > { %v1936_v16 = vrot.slane %v1935_v62, 4  ;;  %v1680_v26 = vrot.slane %v1677_v4, 7  ;;  %3224 = vpow2.f32 %v1559_v5  ;;  %v1806_v41 = vrot.slane %v1805_v59, 1 }
 0x3a0   : > { %v1750_v29 = vrot.slane %v1747_v37, 7  ;;  %v1813_v34 = vrot.slane %v1812_v27, 1  ;;  %v1943_v55 = vrot.slane %v1942_v53, 4  ;;  %3226 = vpow2.f32 %v1561_v12 }
 0x3a1   : > { %v1937_v63 = vadd.f32 %v1936_v16, %v1935_v62  ;;  %v1681_v39 = vsel %vm1429_vm13, %v1670_v22, %v1680_v26  ;;  %v1567_v54 = vmul.f32 1.442695, %v1509_v10  ;;  %v1569_v8 = vmul.f32 1.442695, %v1510_v44  ;;  %v4776_v10 = vld [vmem:[#allocation52_spill] sm:$0xff] }
 0x3a2   : > { %v1751_v56 = vsel %vm1429_vm13, %v1740_v11, %v1750_v29  ;;  %v1814_v52 = vadd.f32 %v1813_v34, %v1812_v27  ;;  %v1944_v31 = vadd.f32 %v1943_v55, %v1942_v53  ;;  %1687 = vst.msk [vmem:[#allocation6] ss:$8 sm:$0x3] %vm4459_vm6, %v1681_v39  ;;  %v1449_v60 = vsel %vm1013_vm4, %v4775_v40, %v4151_v21  ;;  %v4777_v29 = vld [vmem:[#allocation48_spill] sm:$0xff]  ;;  %v4778_v39 = vld [vmem:[#allocation49_spill] sm:$0xff] }
 0x3a3   : > { %1754 = vst.msk [vmem:[#allocation6 + $0x1] ss:$8 sm:$0x3] %vm4459_vm6, %v1751_v56  ;;  %v1938_v15 = vrot.slane %v1937_v63, 2  ;;  %3228 = vpow2.f32 %v1567_v54  ;;  %v1866_v38 = vmul.f32 %v4448_v24, %v1839_v18  ;;  %v1807_v30 = vadd.f32 %v1806_v41, %v1805_v59 }
 0x3a4   : > { %v1817_v19 = vrot.slane %v1814_v52, 7  ;;  %v1945_v14 = vrot.slane %v1944_v31, 2  ;;  %v1450_v28 = vrot.slane %v1449_v60, 7  ;;  %3230 = vpow2.f32 %v1569_v8  ;;  %v4780_v8 = vld [vmem:[#allocation50_spill] sm:$0xff] }
 0x3a5   : > { %v3225_v51 = vpop.eup %3224  ;;  %v1939_v45 = vadd.f32 %v1938_v15, %v1937_v63  ;;  %v1867_v22 = vmul.f32 %v4452_v57, %v1839_v18  ;;  %v1868_v35 = vadd.f32 %v1866_v38, %v4414_v9  ;;  %v4781_v15 = vld [vmem:[#allocation46_spill] sm:$0xff] }
 0x3a6   : > { %v1818_v7 = vsel %vm1429_vm13, %v1807_v30, %v1817_v19  ;;  %v1946_v2 = vadd.f32 %v1945_v14, %v1944_v31  ;;  %v1981_v6 = vmul.f32 %v3225_v51, %v1929_v0  ;;  %v1465_v46 = vperm.slane %v1450_v28, 0  ;;  %v3227_v23 = vpop.eup %3226  ;;  %v4779_v31 = vld [vmem:[#allocation43_spill] sm:$0xff]  ;;  %v4783_v19 = vld [vmem:[#allocation44_spill] sm:$0xff] }
 0x3a7   : > { %1821 = vst.msk [vmem:[#allocation6 + $0x2] ss:$8 sm:$0x3] %vm4459_vm6, %v1818_v7  ;;  %v1940_v21 = vrot.slane %v1939_v45, 1  ;;  %v1466_v24 = vperm.slane %v1450_v28, 1  ;;  %v1869_v11 = vrot.slane %v1868_v35, 4  ;;  %v1875_v42 = vadd.f32 %v1867_v22, %v4422_v1 }
 0x3a8   : > { %v1947_v50 = vrot.slane %v1946_v2, 1  ;;  %v1982_v20 = vmul.f32 %v3227_v23, %v1930_v61  ;;  %v1996_v57 = vadd.f32 %v4351_v47, %v1981_v6  ;;  %v1513_v9 = vmul.f32 %v1465_v46, %v4160_v32  ;;  %v2040_v6 = vpop.xlane.xlu1 %2039  ;;  %v2994_v23 = vld [vmem:[%s4784_s16 + $0x78] sm:$0xff] }
 0x3a9   : > { %v3229_v43 = vpop.eup %3228  ;;  %v1941_v59 = vadd.f32 %v1940_v21, %v1939_v45  ;;  %v1514_v0 = vmul.f32 %v1466_v24, %v4162_v33  ;;  %v1870_v3 = vadd.f32 %v1869_v11, %v1868_v35  ;;  %v1876_v62 = vrot.slane %v1875_v42, 4  ;;  %2359 = vmatpush.bf16.msra.mxu3 %v2994_v23  ;;  %v2982_v23 = vld [vmem:[%s4784_s16 + $0x18] sm:$0xff] }
 0x3aa   : > { %v1948_v4 = vadd.f32 %v1947_v50, %v1946_v2  ;;  %v1997_v5 = vadd.f32 %v4776_v10, %v1982_v20  ;;  %v2048_v37 = vmul.f32 %v3229_v43, %v1996_v57  ;;  %v2000_v27 = vmul.f32 %v1996_v57, %v1973_v13  ;;  %v3231_v53 = vpop.eup %3230  ;;  %v2993_v43 = vld [vmem:[%s4784_s16 + $0x70] sm:$0xff] }
 0x3ab   : > { %v1575_v1 = vmul.f32 1.442695, %v1513_v9  ;;  %v1577_v44 = vmul.f32 1.442695, %v1514_v0  ;;  %v1871_v61 = vrot.slane %v1870_v3, 2  ;;  %v1877_v16 = vadd.f32 %v1876_v62, %v1875_v42  ;;  %v2985_v9 = vld [vmem:[%s4784_s16 + $0x30] sm:$0xff] }
 0x3ac   : > { %v1951_v47 = vrot.slane %v1948_v4, 7  ;;  %v2049_v26 = vmul.f32 %v3231_v53, %v1997_v5  ;;  %v2001_v32 = vmul.f32 %v1997_v5, %v1973_v13  ;;  %v2002_v12 = vadd.f32 %v2000_v27, %v4444_v36  ;;  %v4785_v62 = vld [vmem:[#allocation47_spill] sm:$0xff] }
 0x3ad   : > { %3232 = vpow2.f32 %v1575_v1  ;;  %v2063_v33 = vadd.f32 %v4777_v29, %v2048_v37  ;;  %v1872_v41 = vadd.f32 %v1871_v61, %v1870_v3  ;;  %v1878_v34 = vrot.slane %v1877_v16, 2  ;;  %v4786_v5 = vld [vmem:[#allocation51_spill] sm:$0xff]  ;;  %2360 = vmatpush.bf16.msra.mxu3 %v2993_v43 }
 0x3ae   : > { %v1952_v55 = vsel %vm1429_vm13, %v1941_v59, %v1951_v47  ;;  %v2003_v18 = vrot.slane %v2002_v12, 4  ;;  %v2009_v63 = vadd.f32 %v2001_v32, %v4455_v58  ;;  %3234 = vpow2.f32 %v1577_v44  ;;  %v2984_v47 = vld [vmem:[%s4784_s16 + $0x28] sm:$0xff] }
 0x3af   : > { %1955 = vst.msk [vmem:[#allocation6 + $0x4] ss:$8 sm:$0x3] %vm4459_vm6, %v1952_v55  ;;  %v2064_v54 = vadd.f32 %v4778_v39, %v2049_v26  ;;  %v1873_v56 = vrot.slane %v1872_v41, 1  ;;  %v1879_v52 = vadd.f32 %v1878_v34, %v1877_v16  ;;  %v1511_v36 = vmul.f32 %v1465_v46, %v4779_v31  ;;  %v2986_v46 = vld [vmem:[%s4784_s16 + $0x38] sm:$0xff]  ;;  %v2992_v26 = vld [vmem:[%s4784_s16 + $0x68] sm:$0xff] }
 0x3b0   : > { %v4782_v40 = vperm.slane %v4781_v15, 1  ;;  %v2004_v38 = vadd.f32 %v2003_v18, %v2002_v12  ;;  %v2010_v30 = vrot.slane %v2009_v63, 4  ;;  %v1512_v14 = vmul.f32 %v1466_v24, %v4783_v19  ;;  %2346 = vmatpush.bf16.msra.mxu2 %v2986_v46  ;;  %v4787_v12 = vld [vmem:[#allocation45_spill] sm:$0xff] }
 0x3b1   : > { %v2065_v58 = vmul.f32 %v4434_v49, %v4390_v17  ;;  %v2066_v28 = vmul.f32 %v4439_v48, %v4390_v17  ;;  %v1880_v51 = vrot.slane %v1879_v52, 1  ;;  %v1571_v45 = vmul.f32 1.442695, %v1511_v36  ;;  %v4788_v34 = vld [vmem:[#allocation41_spill] sm:$0xff]  ;;  %2361 = vmatpush.bf16.msra.mxu3 %v2992_v26 }
 0x3b2   : > { %v2127_v60 = vmul.f32 %v4782_v40, %v4780_v8  ;;  %v2005_v22 = vrot.slane %v2004_v38, 2  ;;  %v2011_v35 = vadd.f32 %v2010_v30, %v2009_v63  ;;  %v1874_v7 = vadd.f32 %v1873_v56, %v1872_v41  ;;  %v2983_v19 = vld [vmem:[%s4784_s16 + $0x20] sm:$0xff] }
 0x3b3   : > { %v1573_v2 = vmul.f32 1.442695, %v1512_v14  ;;  %v3233_v21 = vpop.eup %3232  ;;  %v1881_v24 = vadd.f32 %v1880_v51, %v1879_v52  ;;  %3236 = vpow2.f32 %v1571_v45  ;;  %v2067_v11 = vmul.f32 %v2063_v33, %v2040_v6  ;;  %v2107_v52 = vpop.xlane.xlu0 %2106 }
 0x3b4   : > { %v2068_v17 = vmul.f32 %v2064_v54, %v2040_v6  ;;  %v3235_v42 = vpop.eup %3234  ;;  %v2006_v50 = vadd.f32 %v2005_v22, %v2004_v38  ;;  %v2012_v20 = vrot.slane %v2011_v35, 2  ;;  %v2115_v57 = vmul.f32 %v3233_v21, %v2063_v33  ;;  %2347 = vmatpush.bf16.msra.mxu2 %v2985_v9  ;;  %v2990_v21 = vld [vmem:[%s4784_s16 + $0x58] sm:$0xff] }
 0x3b5   : > { %3238 = vpow2.f32 %v1573_v2  ;;  %v2116_v59 = vmul.f32 %v3235_v42, %v2064_v54  ;;  %v1884_v13 = vrot.slane %v1881_v24, 7  ;;  %v2069_v0 = vadd.f32 %v2067_v11, %v2065_v58  ;;  %v2104_v58 = vpop.xlane.xlu2 %2103 }
 0x3b6   : > { %v2076_v3 = vadd.f32 %v2068_v17, %v2066_v28  ;;  %v4525_v4 = vadd.f32 1.0, %v4785_v62  ;;  %v2013_v10 = vadd.f32 %v2012_v20, %v2011_v35  ;;  %v2130_v37 = vadd.f32 %v4786_v5, %v2115_v57 }
 0x3b7   : > { %v2131_v27 = vadd.f32 %v2127_v60, %v2116_v59  ;;  %v1885_v53 = vsel %vm1429_vm13, %v1874_v7, %v1884_v13  ;;  %v2070_v1 = vrot.slane %v2069_v0, 4  ;;  %v2007_v61 = vrot.slane %v2006_v50, 1  ;;  %v2981_v59 = vld [vmem:[%s4784_s16 + $0x10] sm:$0xff] }
 0x3b8   : > { %v2077_v44 = vrot.slane %v2076_v3, 4  ;;  %v2014_v16 = vrot.slane %v2013_v10, 1  ;;  %2160 = vst [vmem:[#allocation2 + $0x18] sm:$0xff] %v2130_v37  ;;  %3240 = vrcp.f32 %v4787_v12  ;;  %v4789_v55 = vperm.slane %v4781_v15, 0  ;;  %2348 = vmatpush.bf16.msra.mxu2 %v2984_v47  ;;  %v2989_v13 = vld [vmem:[%s4784_s16 + $0x50] sm:$0xff] }
 0x3b9   : > { %v3237_v32 = vpop.eup %3236  ;;  %2161 = vst [vmem:[#allocation2 + $0x8] sm:$0xff] %v2131_v27  ;;  %v2071_v29 = vadd.f32 %v2070_v1, %v2069_v0  ;;  %3242 = vrcp.f32 %v4525_v4  ;;  %v4790_v54 = vmov %v4782_v40  ;;  %v2008_v40 = vadd.f32 %v2007_v61, %v2006_v50  ;;  %v2988_v1 = vld [vmem:[%s4784_s16 + $0x48] sm:$0xff] }
 0x3ba   : > { %v2078_v33 = vadd.f32 %v2077_v44, %v2076_v3  ;;  %v2124_v18 = vmul.f32 %v4789_v55, %v4788_v34  ;;  %v2015_v63 = vadd.f32 %v2014_v16, %v2013_v10  ;;  %1888 = vst.msk [vmem:[#allocation6 + $0x3] ss:$8 sm:$0x3] %vm4459_vm6, %v1885_v53  ;;  %v2113_v39 = vmul.f32 %v3237_v32, %v4434_v49  ;;  %v2991_v49 = vld [vmem:[%s4784_s16 + $0x60] sm:$0xff]  ;;  %v2980_v53 = vld [vmem:[%s4784_s16 + $0x8] sm:$0xff] }
 0x3bb   : > { %v3239_v41 = vpop.eup %3238  ;;  %v2125_v56 = vmul.f32 %v4790_v54, %v4788_v34  ;;  %v2072_v36 = vrot.slane %v2071_v29, 2  ;;  %v2134_v38 = vmul.f32 %v2130_v37, %v2107_v52  ;;  %v2135_v15 = vmul.f32 %v2131_v27, %v2107_v52  ;;  %2362 = vmatpush.bf16.msra.mxu3 %v2991_v49  ;;  %v2979_v32 = vld [vmem:[%s4784_s16] sm:$0xff]  ;;  %v4792_v49 = vld [vmem:[#allocation39_spill] sm:$0xff] }
 0x3bc   : > { %v2114_v31 = vmul.f32 %v3239_v41, %v4439_v48  ;;  %v2079_v8 = vrot.slane %v2078_v33, 2  ;;  %v2018_v60 = vrot.slane %v2015_v63, 7  ;;  %v2128_v30 = vadd.f32 %v2124_v18, %v2113_v39  ;;  %2349 = vmatpush.bf16.msra.mxu2 %v2983_v19 }
 0x3bd   : > { %v2073_v48 = vadd.f32 %v2072_v36, %v2071_v29  ;;  %v2987_v29 = vld [vmem:[%s4784_s16 + $0x40] sm:$0xff]  ;;  %vm2187_vm7 = vweird.f32 %v4787_v12  ;;  %v2191_v63 = vand.u32 2147483647, %v4787_v12  ;;  %v2193_v39 = vand.u32 2147483648, %v4787_v12 }
 0x3be   : > { %v2129_v14 = vadd.f32 %v2125_v56, %v2114_v31  ;;  %v2080_v28 = vadd.f32 %v2079_v8, %v2078_v33  ;;  %v2019_v51 = vsel %vm1429_vm13, %v2008_v40, %v2018_v60  ;;  %2158 = vst [vmem:[#allocation2 + $0x10] sm:$0xff] %v2128_v30  ;;  %v2132_v45 = vmul.f32 %v2128_v30, %v2104_v58  ;;  %v4554_v22 = vpop.eup %3240  ;;  %v2164_v56 = vld [vmem:[#allocation19] sm:$0x3] }
 0x3bf   : > { %2022 = vst.msk [vmem:[#allocation6 + $0x5] ss:$8 sm:$0x3] %vm4459_vm6, %v2019_v51  ;;  %v2074_v7 = vrot.slane %v2073_v48, 1  ;;  %v4558_v6 = vpop.eup %3242  ;;  %v2183_v57 = vmul.f32 %v4554_v22, %v4787_v12  ;;  %2363 = vmatpush.bf16.msra.mxu3 %v2990_v21  ;;  %vm2188_vm4 = vweird.f32 %v4554_v22  ;;  %v2208_v54 = vand.u32 2147483648, %v4525_v4  ;;  %v4795_v51 = vld [vmem:[#allocation38_spill] sm:$0xff] }
 0x3c0   : > { %v2133_v35 = vmul.f32 %v2129_v14, %v2104_v58  ;;  %v2081_v2 = vrot.slane %v2080_v28, 1  ;;  %2159 = vst [vmem:[#allocation2] sm:$0xff] %v2129_v14  ;;  %v2136_v46 = vadd.f32 %v2134_v38, %v2132_v45  ;;  %v2198_v9 = vmul.f32 %v4558_v6, %v4525_v4  ;;  %2350 = vmatpush.bf16.msra.mxu2 %v2982_v23  ;;  %vm2189_vm9 = vmor %vm2187_vm7, %vm2188_vm4 }
 0x3c1   : > { %v2075_v50 = vadd.f32 %v2074_v7, %v2073_v48  ;;  %v2184_v5 = vsub.f32 1.0, %v2183_v57  ;;  %vm2203_vm8 = vweird.f32 %v4558_v6  ;;  %vm2202_vm10 = vweird.f32 %v4525_v4  ;;  %v4794_v48 = vld [vmem:[#allocation37_spill] sm:$0xff] }
 0x3c2   : > { %v2143_v24 = vadd.f32 %v2135_v15, %v2133_v35  ;;  %v2082_v11 = vadd.f32 %v2081_v2, %v2080_v28  ;;  %v2137_v17 = vrot.slane %v2136_v46, 4  ;;  %v2199_v37 = vsub.f32 1.0, %v2198_v9  ;;  %vm2204_vm11 = vmor %vm2202_vm10, %vm2203_vm8  ;;  %v4793_v15 = vld [vmem:[#allocation40_spill] sm:$0xff] }
 0x3c3   : > { %2364 = vmatpush.bf16.msra.mxu3 %v2989_v13  ;;  %v2185_v47 = vmul.f32 %v4554_v22, %v2184_v5  ;;  %v2206_v31 = vand.u32 2147483647, %v4525_v4  ;;  %v2166_v40 = vperm.slane %v2164_v56, 0  ;;  %v2167_v12 = vperm.slane %v2164_v56, 1 }
 0x3c4   : > { %v2144_v42 = vrot.slane %v2143_v24, 4  ;;  %v2085_v20 = vrot.slane %v2082_v11, 7  ;;  %v2138_v43 = vadd.f32 %v2137_v17, %v2136_v46  ;;  %2351 = vmatpush.bf16.msra.mxu2 %v2981_v59  ;;  %v2200_v26 = vmul.f32 %v4558_v6, %v2199_v37 }
 0x3c5   : > { %v2186_v55 = vadd.f32 %v4554_v22, %v2185_v47  ;;  %v2194_v60 = vor.u32 1.1754944e-38, %v2193_v39  ;;  %v2209_v38 = vor.u32 1.1754944e-38, %v2208_v54  ;;  %vm2192_vm12 = vcmp.eq.f32.partialorder %v2191_v63, 8.507059e+37 }
 0x3c6   : > { %v2145_v0 = vadd.f32 %v2144_v42, %v2143_v24  ;;  %v2086_v3 = vsel %vm1429_vm13, %v2075_v50, %v2085_v20  ;;  %v2139_v62 = vrot.slane %v2138_v43, 2  ;;  %v2201_v18 = vadd.f32 %v4558_v6, %v2200_v26 }
 0x3c7   : > { %2089 = vst.msk [vmem:[#allocation6 + $0x6] ss:$8 sm:$0x3] %vm4459_vm6, %v2086_v3  ;;  %2365 = vmatpush.bf16.msra.mxu3 %v2988_v1  ;;  %v2190_v36 = vsel %vm2189_vm9, %v4554_v22, %v2186_v55  ;;  %vm2207_vm14 = vcmp.eq.f32.partialorder %v2206_v31, 8.507059e+37  ;;  %v2170_v4 = vmul.f32 %v2166_v40, %v4792_v49  ;;  %v2171_v25 = vmul.f32 %v2167_v12, %v4793_v15 }
 0x3c8   : > { %v2146_v10 = vrot.slane %v2145_v0, 2  ;;  %v2140_v27 = vadd.f32 %v2139_v62, %v2138_v43  ;;  %2352 = vmatpush.bf16.msra.mxu2 %v2980_v53  ;;  %v2205_v8 = vsel %vm2204_vm11, %v4558_v6, %v2201_v18  ;;  %v2195_v30 = vsel %vm2192_vm12, %v2194_v60, %v2190_v36 }
 0x3c9   : > { %v2210_v19 = vsel %vm2207_vm14, %v2209_v38, %v2205_v8  ;;  %v2212_v28 = vmul.f32 %v2195_v30, %v4794_v48 }
 0x3ca   : > { %v2147_v44 = vadd.f32 %v2146_v10, %v2145_v0  ;;  %v2141_v61 = vrot.slane %v2140_v27, 1  ;;  %v2213_v45 = vmul.f32 %v2210_v19, %v4795_v51 }
 0x3cb   : > { %2366 = vmatpush.bf16.msra.mxu3 %v2987_v29 }
 0x3cc   : > { %v2148_v16 = vrot.slane %v2147_v44, 1  ;;  %v2142_v41 = vadd.f32 %v2141_v61, %v2140_v27  ;;  %2353 = vmatpush.bf16.msra.mxu2 %v2979_v32 }
 0x3ce   : > { %v2149_v33 = vadd.f32 %v2148_v16, %v2147_v44 }
 0x3d0   : > { %v2152_v34 = vrot.slane %v2149_v33, 7 }
 0x3d2   : > { %v2153_v52 = vsel %vm1429_vm13, %v2142_v41, %v2152_v34 }
 0x3d3   : > { %2156 = vst.msk [vmem:[#allocation6 + $0x7] ss:$8 sm:$0x3] %vm4459_vm6, %v2153_v52 }
 0x3da   : > { %v2162_v14 = vld [vmem:[#allocation6] sm:$0xff]  ;;  %v2163_v58 = vld [vmem:[#allocation6 + $0x8] sm:$0xff] }
 0x3db   : > { %v2172_v22 = vadd.f32 %v2170_v4, %v2162_v14  ;;  %v2173_v35 = vadd.f32 %v2171_v25, %v2163_v58 }
 0x3dd   : > { %v2214_v7 = vmul.f32 %v2212_v28, %v2172_v22  ;;  %v2215_v2 = vmul.f32 %v2213_v45, %v2173_v35 }
 0x3df   : > { %v2216_v6 = vpack.c.bf16 %v2214_v7, %v2214_v7  ;;  %v2217_v46 = vpack.c.bf16 %v2215_v2, %v2215_v2 }
 0x3e1   : > { %2354 = vmatmul.bf16.vlgmr.msra.gmra.mxu2 %v2216_v6  ;;  %2367 = vmatmul.bf16.vlgmr.msra.gmra.mxu3 %v2217_v46 }
 0x3e2   : > { %3511 = shalt.err (!%p3508_p13)
}
 0x3e3   : > { %3024 = dma.vmem_to_hbm [thread:$0]  (%p3843_p0), %s2410_s10, 128, %s2412_s17, %s2379_s2  }
 0x3e4   : > { %s4797_s29 = sld [smem:[#allocation64_spill]]  ;;  %s2393_s4 = sshll.u32 %s671_s22, 4  ;;  %s2394_s4 = int_to_ptr.vmem [resolvable:$true] %s2393_s4 }
 0x3e5   : > { %s2374_s5 = scalar_lea.sflag [#allocation9], %s3874_s13 }
 0x3ea   : > { %s2391_s27 = scalar_lea.hbm %s4797_s29, %s2922_s23  ;;  %s3532_s17 = scalar_lea.hbm %s4797_s29, 32 }
 0x3eb   : > { %s2395_s21 = sshll.u32 %s2391_s27, 4  ;;  %s2396_s21 = int_to_ptr.hbm [resolvable:$true] %s2395_s21 }
 0x3ec   : > { %s3526_s15 = sshra.s32 %s2396_s21, 4  ;;  %s3527_s15 = int_to_ptr.hbm [resolvable:$true] %s3526_s15 }
 0x3ed   : > { %s3528_s11 = scalar_lea.hbm %s3527_s15, 8  ;;  %p3533_p7 = scmp.lt.s32.totalorder %s3527_s15, %s4797_s29 }
 0x3ee   : > { %p3529_p2 = scmp.ne.s32.totalorder %s3527_s15, %s3528_s11  ;;  %p3534_p3 = scmp.lt.s32.totalorder %s3532_s17, %s3528_s11 }
 0x3f0   : > { %p3530_p4 = pnand %p3529_p2, %p3843_p0  ;;  %p3535_p1 = por %p3534_p3, %p3533_p7 }
 0x3f2   : > { %p3531_p5 = pneg %p3530_p4 }
 0x3f4   : > { %p3536_p8 = pnand %p3535_p1, %p3531_p5 }
 0x464   : > { %v2355_v23 = vpop.f32.mrf.mxu2  ;;  %v2368_v21 = vpop.f32.mrf.mxu3 }
 0x465   : > { %v2369_v24 = vadd.f32 %v2368_v21, %v2355_v23 }
 0x467   : > { %2372 = vst [vmem:[%s671_s22] sm:$0xff] %v2369_v24 }
 0x468   : > { %3539 = shalt.err (!%p3536_p8)
}
 0x469   : > { %3023 = dma.vmem_to_hbm [thread:$0]  (%p3843_p0), %s2394_s4, 128, %s2396_s21, %s2374_s5  }
 0x46c   : > { %v2357_v11 = vpop.f32.mrf.mxu2  ;;  %v2370_v17 = vpop.f32.mrf.mxu3 }
 0x46d PF: > { %p3073_p9 = scmp.ge.s32.totalorder %s3634_s25, 2  ;;  %s2423_s13 = sand.u32 1, %s3606_s18  }
 0x46e   : > { %s2424_s8 = scalar_lea.sflag [#allocation9], %s2423_s13 }
 0x46f   : > { %p3054_p10 = pnand %p3073_p9, %p3850_p6 }
 0x471   : > { %p3055_p11 = pneg %p3054_p10 }
 0x473   : > { %3597 = dma.done.wait (%p3055_p11), %s2424_s8, 128  }
 0x474   : > { %3599 = vsyncadd (%p3055_p11), %s2424_s8, 4294967168  ;;  %s2434_s22 = scalar_lea.sflag [#allocation23], %s2423_s13 }
 0x475   : > { %3601 = dma.done.wait (%p3055_p11), %s2434_s22, 128  }
 0x476   : > { %3603 = vsyncadd (%p3055_p11), %s2434_s22, 4294967168  ;;  %s41_s25 = sadd.s32 1, %s3634_s25   ;;  %s4798_s21 = sld [smem:[#allocation33_spill]] }
 0x477   : > { %p38_p0 = scmp.ge.s32.totalorder %s41_s25, 6   ;;  %s4799_s22 = sld [smem:[#allocation34_spill]] }
 0x478   : > { %s4800_s23 = sld [smem:[#allocation35_spill]]  ;;  %s4802_s18 = smov %s3610_s19 }
 0x479   : > { %s4801_s24 = sld [smem:[#allocation36_spill]]  ;;  %s4803_s19 = smov %s3614_s20 }
 0x47a   : > { %s4804_s20 = smov %s3857_s6  ;;  %40 = sbr.rel (!%p38_p0) target bundleno = 28 (0x1c), region = 203 }
 0x47f   :  { %2440 = vsyncpa [#allocation8], 1 }
 0x480   :  { %2442 = vsyncpa [#allocation8 + $0x1], 1 }
 0x481   :  { %2443 = vsyncpa [#allocation11], 1 }
 0x482   :  { %2445 = vsyncpa [#allocation11 + $0x1], 1 }
 0x483   :  { %2446 = vsyncpa [#allocation14], 1 }
 0x484   :  { %2447 = vsyncpa [#allocation17], 1 }
 0x485   :  { %2448 = vsyncpa [#allocation20], 1 }
 0x486   :  { %2449 = vsyncpa [#allocation9], 1 }
 0x487   :  { %2451 = vsyncpa [#allocation9 + $0x1], 1 }
 0x488   :  { %2452 = vsyncpa [#allocation23], 1 }
 0x489   :  { %2454 = vsyncpa [#allocation23 + $0x1], 1 }

// kernel: tpu_custom_call.1
= control target key start
LH: loop header
LB: loop body
LE: loop exit
PB: predicated region body
PF: predicated region fallthrough
CT: control target
= control target key end

     0   :  { %s4656_s0 = inlined_call_operand.hbm [shape: f32[2,16,128], index: 0, kind: input, shape index: {}]   ;;  %s4657_s1 = inlined_call_operand.hbm [shape: f32[2,16,128], index: 1, kind: input, shape index: {}]   ;;  %s4658_s2 = inlined_call_operand.hbm [shape: f32[1,128], index: 2, kind: input, shape index: {}]   ;;  %s4659_s3 = inlined_call_operand.hbm [shape: f32[1,128], index: 3, kind: input, shape index: {}]   ;;  %s4660_s4 = inlined_call_operand.hbm [shape: bf16[128,512], index: 4, kind: input, shape index: {}]   ;;  %s4661_s5 = inlined_call_operand.vmem [shape: f32[4,256], index: 5, kind: input, shape index: {}]   ;;  %s4662_s6 = inlined_call_operand.vmem [shape: f32[1,256], index: 6, kind: input, shape index: {}]   ;;  %s4663_s7 = inlined_call_operand.vmem [shape: bf16[256,8], index: 7, kind: input, shape index: {}]   ;;  %s4664_s8 = inlined_call_operand.hbm [shape: bf16[32,256], index: 8, kind: input, shape index: {}]   ;;  %s4665_s9 = inlined_call_operand.vmem [shape: bf16[8,256], index: 9, kind: input, shape index: {}]   ;;  %s4666_s10 = inlined_call_operand.vmem [shape: f32[1,256], index: 10, kind: input, shape index: {}]   ;;  %s4667_s11 = inlined_call_operand.hbm [shape: f32[16,256], index: 11, kind: input, shape index: {}]   ;;  %s4668_s12 = inlined_call_operand.hbm [shape: f32[1,256], index: 12, kind: input, shape index: {}]   ;;  %s4669_s13 = inlined_call_operand.vmem [shape: bf16[256,128], index: 13, kind: input, shape index: {}]   ;;  %s4670_s14 = inlined_call_operand.hbm [shape: f32[2,16,128], index: 14, kind: output, shape index: {0}]   ;;  %s4671_s15 = inlined_call_operand.hbm [shape: f32[2,16,128], index: 15, kind: output, shape index: {1}]  }
   0x1   :  { %4700 = sst [smem:[#allocation48_spill]] %s4658_s2 }
   0x2   :  { %4701 = sst [smem:[#allocation49_spill]] %s4659_s3 }
   0x3   :  { %4702 = sst [smem:[#allocation50_spill]] %s4660_s4 }
   0x4   :  { %4703 = sst [smem:[#allocation51_spill]] %s4661_s5 }
   0x5   :  { %4704 = sst [smem:[#allocation52_spill]] %s4662_s6 }
   0x6   :  { %4705 = sst [smem:[#allocation53_spill]] %s4664_s8 }
   0x7   :  { %4706 = sst [smem:[#allocation54_spill]] %s4665_s9 }
   0x8   :  { %4707 = sst [smem:[#allocation55_spill]] %s4666_s10 }
   0x9   :  { %4708 = sst [smem:[#allocation56_spill]] %s4667_s11 }
   0xa   :  { %4709 = sst [smem:[#allocation57_spill]] %s4668_s12 }
   0xb   :  { %4710 = sst [smem:[#allocation58_spill]] %s4669_s13 }
   0xc   :  { %4711 = sst [smem:[#allocation59_spill]] %s4670_s14 }
   0xd   :  { %4712 = sst [smem:[#allocation60_spill]] %s4671_s15 }
   0xe   :  { %21 = vsyncpa [#allocation8], 0 }
   0xf   :  { %23 = vsyncpa [#allocation8 + $0x1], 0 }
  0x10   :  { %24 = vsyncpa [#allocation11], 0 }
  0x11   :  { %26 = vsyncpa [#allocation11 + $0x1], 0 }
  0x12   :  { %27 = vsyncpa [#allocation14], 0 }
  0x13   :  { %28 = vsyncpa [#allocation17], 0 }
  0x14   :  { %29 = vsyncpa [#allocation20], 0 }
  0x15   :  { %30 = vsyncpa [#allocation9], 0 }
  0x16   :  { %32 = vsyncpa [#allocation9 + $0x1], 0 }
  0x17   :  { %33 = vsyncpa [#allocation23], 0 }
  0x18   :  { %35 = vsyncpa [#allocation23 + $0x1], 0  ;;  %s3724_s18 = smov 0   ;;  %s3726_s19 = smov 0  }
  0x19   :  { %s3728_s20 = smov 0   ;;  %s3730_s21 = smov 0  }
  0x1a   :  { %s3732_s22 = smov 0   ;;  %s3734_s23 = smov 0  }
  0x1b   :  { %s3736_s24 = smov 0   ;;  %s3738_s25 = smov 0  }
  0x1c LB: > { %4713 = sst [smem:[#allocation32_spill]] %s3618_s22  ;;  %s3765_s26 = sadd.s32 4294967295, %s3630_s25   ;;  %s3630_s25 = sphi %s3738_s25, %s41_s25   ;;  %s3626_s24 = sphi %s3736_s24, %s4780_s24   ;;  %s3622_s23 = sphi %s3734_s23, %s4779_s23   ;;  %s3618_s22 = sphi %s3732_s22, %s4778_s22   ;;  %s3614_s21 = sphi %s3730_s21, %s4777_s21   ;;  %s3610_s20 = sphi %s3728_s20, %s4783_s20   ;;  %s3606_s19 = sphi %s3726_s19, %s4782_s19   ;;  %s3602_s18 = sphi %s3724_s18, %s4781_s18  }
  0x1d   : > { %4714 = sst [smem:[#allocation33_spill]] %s3622_s23  ;;  %p2612_p0 = scmp.ge.s32.totalorder %s3630_s25, 1 }
  0x1e   : > { %4715 = sst [smem:[#allocation34_spill]] %s3626_s24  ;;  %p76_p1 = scmp.eq.s32.totalorder %s3765_s26, 0 }
  0x1f   : > { %p422_p2 = scmp.lt.s32.totalorder %s3630_s25, 5  ;;  %s4716_s2 = sld [smem:[#allocation48_spill]] }
  0x20   : > { %s3632_s16 = smov [#allocation12]   ;;  %s4718_s3 = sld [smem:[#allocation49_spill]] }
  0x21   : > { %p3773_p3 = pnand %p2612_p0, %p422_p2  ;;  %s436_s17 = sshll.u32 %s3632_s16, 4  ;;  %s437_s17 = int_to_ptr.vmem [resolvable:$true] %s436_s17 }
  0x22   : > { %s4720_s8 = sld [smem:[#allocation53_spill]]  ;;  %s3633_s10 = smov [#allocation13]  }
  0x23   : > { %p3023_p4 = pneg %p3773_p3  ;;  %s448_s16 = sshll.u32 %s3633_s10, 4  ;;  %s449_s16 = int_to_ptr.vmem [resolvable:$true] %s448_s16 }
  0x24   : > { %s3634_s14 = smov [#allocation16]   ;;  %s4721_s4 = sld [smem:[#allocation50_spill]] }
  0x25   : > { %s434_s29 = sshll.u32 %s4716_s2, 4  ;;  %p3784_p5 = pnand %p3023_p4, %p76_p1  ;;  %s435_s29 = int_to_ptr.hbm [resolvable:$true] %s434_s29 }
  0x26   : > { %s446_s22 = sshll.u32 %s4718_s3, 4  ;;  %s482_s15 = sshll.u32 %s3634_s14, 4  ;;  %s447_s22 = int_to_ptr.hbm [resolvable:$true] %s446_s22  ;;  %s483_s15 = int_to_ptr.vmem [resolvable:$true] %s482_s15 }
  0x27   : > { %3026 = dma.hbm_to_vmem [thread:$0]  (!%p3784_p5), %s435_s29, 16, %s437_s17, [#allocation11]  }
  0x28   : > { %s480_s2 = sshll.u32 %s4720_s8, 4  ;;  %s3635_s5 = smov 128   ;;  %s481_s2 = int_to_ptr.hbm [resolvable:$true] %s480_s2 }
  0x29   : > { %3029 = dma.hbm_to_vmem [thread:$0]  (!%p3784_p5), %s447_s22, 16, %s449_s16, [#allocation14]  }
  0x2a   : > { %s457_s6 = sshll.u32 %s4721_s4, 4  ;;  %s3636_s27 = smov 8   ;;  %s458_s6 = int_to_ptr.hbm [resolvable:$true] %s457_s6 }
  0x2b   : > { %3035 = dma.hbm_to_vmem [thread:$0]  (!%p3784_p5), %s481_s2, 512, %s483_s15, [#allocation17], %s3635_s5, %s3635_s5, %s3636_s27  }
  0x2c   : > { %s3637_s10 = smov [#allocation15]   ;;  %s3638_s17 = smov 256  }
  0x2d   : > { %s459_s29 = sshll.u32 %s3637_s10, 4  ;;  %s3639_s22 = smov 16   ;;  %s460_s29 = int_to_ptr.vmem [resolvable:$true] %s459_s29 }
  0x2e   : > { %3032 = dma.hbm_to_vmem [thread:$0]  (!%p3784_p5), %s458_s6, 4096, %s460_s29, [#allocation14], %s3638_s17, %s3638_s17, %s3639_s22  }
  0x2f   : > { %s4722_s11 = sld [smem:[#allocation56_spill]]  ;;  %s3640_s2 = smov [#allocation18]  }
  0x30   : > { %s502_s5 = sshll.u32 %s3640_s2, 4  ;;  %s4723_s12 = sld [smem:[#allocation57_spill]]  ;;  %s503_s5 = int_to_ptr.vmem [resolvable:$true] %s502_s5 }
  0x31   : > { %s3641_s6 = smov [#allocation19]   ;;  %s2611_s10 = sadd.s32 4294967294, %s3630_s25  }
  0x32   : > { %s517_s27 = sshll.u32 %s3641_s6, 4  ;;  %s50_s29 = sadd.s32 1, %s3622_s23  ;;  %s518_s27 = int_to_ptr.vmem [resolvable:$true] %s517_s27 }
  0x33   : > { %p51_p6 = scmp.ge.s32.totalorder %s50_s29, 2  ;;  %s53_s28 = sadd.s32 1, %s3626_s24 }
  0x34   : > { %s62_s16 = sadd.s32 1, %s3610_s20  ;;  %p69_p7 = scmp.ne.s32.totalorder %s3610_s20, %s3606_s19 }
  0x35   : > { %s500_s3 = sshll.u32 %s4722_s11, 4  ;;  %s4785_s29 = smov (%p51_p6, %s50_s29), 0  ;;  %s501_s3 = int_to_ptr.hbm [resolvable:$true] %s500_s3 }
  0x36   : > { %s515_s15 = sshll.u32 %s4723_s12, 4  ;;  %4724 = sst [smem:[#allocation35_spill]] %s4785_s29  ;;  %s516_s15 = int_to_ptr.hbm [resolvable:$true] %s515_s15 }
  0x37   : > { %3038 = dma.hbm_to_vmem [thread:$0]  (!%p3784_p5), %s501_s3, 512, %s503_s5, [#allocation17], %s3638_s17, %s3638_s17, %s3639_s22  }
  0x38   : > { %3041 = dma.hbm_to_vmem [thread:$0]  (!%p3784_p5), %s516_s15, 32, %s518_s27, [#allocation20]  }
  0x39   : > { %s4787_s28 = smov (!%p51_p6, %s53_s28), %s3626_s24  ;;  %s58_s17 = ssub.s32 %s3622_s23, %s4785_s29 }
  0x3a   : > { %p70_p8 = scmp.eq.s32.totalorder %s3630_s25, 0  ;;  %p55_p9 = scmp.ge.s32.totalorder %s4787_s28, 2 }
  0x3b   : > { %p75_p10 = scmp.ne.s32.totalorder %s3606_s19, %s3602_s18  ;;  %p381_p12 = scmp.eq.s32.totalorder %s3765_s26, 3 }
  0x3c   : > { %p3826_p11 = por %p70_p8, %p69_p7  ;;  %s4789_s28 = smov (%p55_p9, %s4787_s28), 0 }
  0x3d   : > { %4726 = sst [smem:[#allocation36_spill]] %s4789_s28  ;;  %p3835_p13 = por %p76_p1, %p75_p10 }
  0x3e   : > { %p3839_p0 = por %p381_p12, %p69_p7  ;;  %s57_s2 = ssub.s32 %s3626_s24, %s4789_s28 }
  0x3f   : > { %p387_p2 = scmp.eq.s32.totalorder %s2611_s10, 3  ;;  %s59_s5 = sor.u32 %s58_s17, %s57_s2 }
  0x40   : > { %p3062_p4 = scmp.lt.s32.totalorder %s3630_s25, 4  ;;  %p60_p5 = scmp.eq.s32.totalorder %s59_s5, 0 }
  0x41   : > { %p3846_p6 = por %p387_p2, %p75_p10  ;;  %s531_s14 = sand.u32 1, %s3610_s20  }
  0x42   : > { %s2621_s15 = sshll.u32 %s3626_s24, 1  ;;  %s2620_s27 = sshll.u32 %s531_s14, 3 }
  0x43   : > { %s3853_s6 = scalar_select %p60_p5, %s3610_s20, %s62_s16  }
  0x44   : > { %s539_s4 = sadd.s32 %s3622_s23, %s2621_s15  ;;  %s535_s11 = scalar_lea.vmem [#allocation7], %s2620_s27 }
  0x45   : > { %s2622_s8 = sshll.u32 %s539_s4, 3  ;;  %s545_s12 = sshll.u32 %s535_s11, 4  ;;  %s546_s12 = int_to_ptr.vmem [resolvable:$true] %s545_s12 }
  0x46   : > { %s541_s17 = scalar_lea.hbm %s4656_s0, %s2622_s8  ;;  %p3043_p7 = pnand %p3062_p4, %p3826_p11 }
  0x47   : > { %s543_s2 = sshll.u32 %s541_s17, 4  ;;  %s562_s16 = scalar_lea.hbm %s4657_s1, %s2622_s8  ;;  %s544_s2 = int_to_ptr.hbm [resolvable:$true] %s543_s2 }
  0x48   : > { %s532_s24 = scalar_lea.sflag [#allocation8], %s531_s14  ;;  %s552_s15 = sand.u32 1, %s3630_s25  }
  0x49   : > { %3045 = dma.hbm_to_vmem [thread:$0]  (!%p3043_p7), %s544_s2, 128, %s546_s12, %s532_s24  }
  0x4a   : > { %s564_s4 = sshll.u32 %s562_s16, 4  ;;  %s556_s11 = scalar_lea.vmem [#allocation10], %s2620_s27  ;;  %s565_s4 = int_to_ptr.hbm [resolvable:$true] %s564_s4 }
  0x4b   : > { %s566_s23 = sshll.u32 %s556_s11, 4  ;;  %s553_s28 = scalar_lea.sflag [#allocation11], %s552_s15  ;;  %s567_s23 = int_to_ptr.vmem [resolvable:$true] %s566_s23 }
  0x4c   : > { %3048 = dma.hbm_to_vmem [thread:$0]  (!%p3043_p7), %s565_s4, 128, %s567_s23, %s553_s28  }
  0x4d   : > { %575 = sbr.rel (%p3773_p3) target bundleno = 1137 (0x471), region = 76 }
  0x52   : > { %s3870_s13 = sand.u32 1, %s3606_s19  }
  0x53   : > { %s3873_s8 = sshll.u32 %s3870_s13, 3  ;;  %s578_s12 = scalar_lea.sflag [#allocation8], %s3870_s13 }
  0x54   : > { %s581_s24 = scalar_lea.vmem [#allocation7], %s3873_s8 }
  0x55   : > { %3569 = dma.done.wait (%p3835_p13), %s578_s12, 128  }
  0x56   : > { %3571 = vsyncadd (%p3835_p13), %s578_s12, 4294967168  ;;  %s587_s23 = sand.u32 1, %s3765_s26   ;;  %s591_s29 = scalar_lea.vmem [#allocation10], %s3873_s8 }
  0x57   : > { %s588_s30 = scalar_lea.sflag [#allocation11], %s587_s23 }
  0x58   : > { %3573 = dma.done.wait (%p3835_p13), %s588_s30, 128  }
  0x59   : > { %3575 = vsyncadd (%p3835_p13), %s588_s30, 4294967168 }
  0x5a   : > { %3577 = dma.done.wait (%p76_p1), [#allocation11], 16  }
  0x5b   : > { %3579 = vsyncadd (%p76_p1), [#allocation11], 4294967280 }
  0x5c   : > { %3581 = dma.done.wait (%p76_p1), [#allocation14], 4112  }
  0x5d   : > { %3583 = vsyncadd (%p76_p1), [#allocation14], 4294963184 }
  0x5e   : > { %3585 = dma.done.wait (%p76_p1), [#allocation17], 1024  }
  0x5f   : > { %3587 = vsyncadd (%p76_p1), [#allocation17], 4294966272 }
  0x60   : > { %3589 = dma.done.wait (%p76_p1), [#allocation20], 32  }
  0x61   : > { %3591 = vsyncadd (%p76_p1), [#allocation20], 4294967264  ;;  %s671_s22 = scalar_lea.vmem [#allocation21], %s3873_s8  ;;  %s678_s14 = scalar_lea.vmem [#allocation22], %s3873_s8 }
  0x62   : > { %p2637_p3 = scmp.ne.s32.totalorder %s3614_s21, 0 }
  0x64   : > { %683 = sbr.rel (%p2637_p3) target bundleno = 112 (0x70), region = 112 }
  0x69   : > { %v3642_v0 = vmov 0.0  }
  0x6a   : > { %684 = vst [vmem:[#allocation2 + $0x10] sm:$0xff] %v3642_v0 }
  0x6b   : > { %685 = vst [vmem:[#allocation2] sm:$0xff] %v3642_v0 }
  0x6c   : > { %686 = vst [vmem:[#allocation2 + $0x18] sm:$0xff] %v3642_v0 }
  0x6d   : > { %687 = vst [vmem:[#allocation2 + $0x8] sm:$0xff] %v3642_v0 }
  0x6e   : > { %688 = vst [vmem:[#allocation3] sm:$0x7] %v3642_v0 }
  0x6f   : > { %689 = vst [vmem:[#allocation3 + $0x18] sm:$0x7] %v3642_v0 }
  0x70 PF: > { %v690_v1 = vld [vmem:[%s581_s24] sm:$0xff]  ;;  %v691_v2 = vld [vmem:[%s591_s29] sm:$0xff]  ;;  %v3643_v4 = vmov 128.0   ;;  %s4730_s28 = sld [smem:[#allocation51_spill]]  ;;  %vm1013_vm4 = vcmask 1046528   ;;  %vm1039_vm5 = vcmask 1045504  }
  0x71   : > { %v692_v3 = vadd.f32 %v691_v2, %v690_v1  ;;  %3148 = vrcp.f32 %v3643_v4  ;;  %v2752_v5 = vld [vmem:[#allocation15 + $0xe0] sm:$0xf]  ;;  %v2953_v6 = vld [vmem:[#allocation15 + $0xec] sm:$0xf0]  ;;  %v2951_v7 = vld [vmem:[#allocation15 + $0xe4] sm:$0xf] }
  0x72   : > { %v2753_v8 = vor.u32 %v2953_v6, %v2752_v5  ;;  %v2754_v9 = vld [vmem:[#allocation15 + $0xf0] sm:$0xf0]  ;;  %v2760_v10 = vld [vmem:[#allocation15 + $0xe8] sm:$0xf]  ;;  %v2954_v11 = vld [vmem:[#allocation15 + $0xf4] sm:$0xf0] }
  0x73   : > { %694 = vadd.xlane.f32.xlu0 %v692_v3  ;;  %693 = vst [vmem:[%s678_s14] sm:$0xff] %v692_v3  ;;  %v2757_v12 = vor.u32 %v2951_v7, %v2754_v9  ;;  %v2761_v13 = vor.u32 %v2954_v11, %v2760_v10  ;;  %v2952_v14 = vld [vmem:[#allocation15 + $0xec] sm:$0xf]  ;;  %v2762_v15 = vld [vmem:[#allocation15 + $0xf8] sm:$0xf0]  ;;  %v2736_v27 = vld [vmem:[#allocation15 + $0xc0] sm:$0xf] }
  0x74   : > { %924 = vmatpush.bf16.msra.mxu0 %v2753_v8  ;;  %v2765_v16 = vor.u32 %v2952_v14, %v2762_v15  ;;  %v2949_v28 = vld [vmem:[#allocation15 + $0xcc] sm:$0xf0]  ;;  %v2947_v29 = vld [vmem:[#allocation15 + $0xc4] sm:$0xf]  ;;  %v2738_v31 = vld [vmem:[#allocation15 + $0xd0] sm:$0xf0] }
  0x75   : > { %937 = vmatpush.bf16.msra.mxu1 %v2757_v12  ;;  %950 = vmatpush.bf16.msra.mxu2 %v2761_v13  ;;  %v2737_v30 = vor.u32 %v2949_v28, %v2736_v27  ;;  %v2744_v32 = vld [vmem:[#allocation15 + $0xc8] sm:$0xf]  ;;  %v2950_v33 = vld [vmem:[#allocation15 + $0xd4] sm:$0xf0]  ;;  %v2741_v34 = vor.u32 %v2947_v29, %v2738_v31  ;;  %v2948_v36 = vld [vmem:[#allocation15 + $0xcc] sm:$0xf] }
  0x76   : > { %963 = vmatpush.bf16.msra.mxu3 %v2765_v16  ;;  %v2745_v35 = vor.u32 %v2950_v33, %v2744_v32  ;;  %v2746_v37 = vld [vmem:[#allocation15 + $0xd8] sm:$0xf0]  ;;  %v2720_v39 = vld [vmem:[#allocation15 + $0xa0] sm:$0xf]  ;;  %v2945_v40 = vld [vmem:[#allocation15 + $0xac] sm:$0xf0] }
  0x77   : > { %v3149_v17 = vpop.eup %3148  ;;  %v2749_v38 = vor.u32 %v2948_v36, %v2746_v37  ;;  %v2943_v41 = vld [vmem:[#allocation15 + $0xa4] sm:$0xf]  ;;  %v2721_v42 = vor.u32 %v2945_v40, %v2720_v39  ;;  %v2722_v43 = vld [vmem:[#allocation15 + $0xb0] sm:$0xf0]  ;;  %v2728_v44 = vld [vmem:[#allocation15 + $0xa8] sm:$0xf] }
  0x78   : > { %v697_v18 = vmul.f32 128.0, %v3149_v17  ;;  %vm701_vm0 = vweird.f32 %v3149_v17  ;;  %925 = vmatpush.bf16.msra.mxu0 %v2737_v30  ;;  %v2946_v45 = vld [vmem:[#allocation15 + $0xb4] sm:$0xf0]  ;;  %v2725_v46 = vor.u32 %v2943_v41, %v2722_v43  ;;  %v2944_v48 = vld [vmem:[#allocation15 + $0xac] sm:$0xf]  ;;  %s4733_s4 = sld [smem:[#allocation52_spill]] }
  0x79   : > { %938 = vmatpush.bf16.msra.mxu1 %v2741_v34  ;;  %951 = vmatpush.bf16.msra.mxu2 %v2745_v35  ;;  %v2729_v47 = vor.u32 %v2946_v45, %v2728_v44  ;;  %v2730_v49 = vld [vmem:[#allocation15 + $0xb8] sm:$0xf0]  ;;  %v2704_v51 = vld [vmem:[#allocation15 + $0x80] sm:$0xf]  ;;  %v2941_v52 = vld [vmem:[#allocation15 + $0x8c] sm:$0xf0] }
  0x7a   : > { %v698_v19 = vsub.f32 1.0, %v697_v18  ;;  %964 = vmatpush.bf16.msra.mxu3 %v2749_v38  ;;  %v2733_v50 = vor.u32 %v2944_v48, %v2730_v49  ;;  %v2939_v53 = vld [vmem:[#allocation15 + $0x84] sm:$0xf]  ;;  %v2705_v54 = vor.u32 %v2941_v52, %v2704_v51  ;;  %v2706_v55 = vld [vmem:[#allocation15 + $0x90] sm:$0xf0]  ;;  %vm1065_vm6 = vcmask 1044480  }
  0x7b   : > { %v2712_v56 = vld [vmem:[#allocation15 + $0x88] sm:$0xf]  ;;  %v2942_v57 = vld [vmem:[#allocation15 + $0x94] sm:$0xf0]  ;;  %v2709_v58 = vor.u32 %v2939_v53, %v2706_v55  ;;  %v2940_v60 = vld [vmem:[#allocation15 + $0x8c] sm:$0xf] }
  0x7c   : > { %v699_v20 = vmul.f32 %v3149_v17, %v698_v19  ;;  %926 = vmatpush.bf16.msra.mxu0 %v2721_v42  ;;  %v2713_v59 = vor.u32 %v2942_v57, %v2712_v56  ;;  %v2714_v61 = vld [vmem:[#allocation15 + $0x98] sm:$0xf0]  ;;  %v2688_v63 = vld [vmem:[#allocation15 + $0x60] sm:$0xf]  ;;  %v2937_v0 = vld [vmem:[#allocation15 + $0x6c] sm:$0xf0] }
  0x7d   : > { %939 = vmatpush.bf16.msra.mxu1 %v2725_v46  ;;  %952 = vmatpush.bf16.msra.mxu2 %v2729_v47  ;;  %v2717_v62 = vor.u32 %v2940_v60, %v2714_v61  ;;  %v2935_v1 = vld [vmem:[#allocation15 + $0x64] sm:$0xf]  ;;  %v2689_v2 = vor.u32 %v2937_v0, %v2688_v63  ;;  %v2696_v4 = vld [vmem:[#allocation15 + $0x68] sm:$0xf]  ;;  %v2938_v5 = vld [vmem:[#allocation15 + $0x74] sm:$0xf0] }
  0x7e   : > { %v700_v21 = vadd.f32 %v3149_v17, %v699_v20  ;;  %965 = vmatpush.bf16.msra.mxu3 %v2733_v50  ;;  %v2697_v7 = vor.u32 %v2938_v5, %v2696_v4  ;;  %v2936_v8 = vld [vmem:[#allocation15 + $0x6c] sm:$0xf]  ;;  %v2698_v9 = vld [vmem:[#allocation15 + $0x78] sm:$0xf0]  ;;  %v2672_v11 = vld [vmem:[#allocation15 + $0x40] sm:$0xf] }
  0x7f   : > { %v2701_v10 = vor.u32 %v2936_v8, %v2698_v9  ;;  %v2933_v12 = vld [vmem:[#allocation15 + $0x4c] sm:$0xf0]  ;;  %v2931_v13 = vld [vmem:[#allocation15 + $0x44] sm:$0xf]  ;;  %v2674_v15 = vld [vmem:[#allocation15 + $0x50] sm:$0xf0] }
  0x80   : > { %v3908_v22 = vsel %vm701_vm0, %v3149_v17, %v700_v21  ;;  %927 = vmatpush.bf16.msra.mxu0 %v2705_v54  ;;  %v2673_v14 = vor.u32 %v2933_v12, %v2672_v11  ;;  %v2680_v16 = vld [vmem:[#allocation15 + $0x48] sm:$0xf]  ;;  %v2934_v17 = vld [vmem:[#allocation15 + $0x54] sm:$0xf0]  ;;  %v2677_v18 = vor.u32 %v2931_v13, %v2674_v15  ;;  %v2932_v20 = vld [vmem:[#allocation15 + $0x4c] sm:$0xf] }
  0x81   : > { %940 = vmatpush.bf16.msra.mxu1 %v2709_v58  ;;  %953 = vmatpush.bf16.msra.mxu2 %v2713_v59  ;;  %v2681_v19 = vor.u32 %v2934_v17, %v2680_v16  ;;  %v2682_v21 = vld [vmem:[#allocation15 + $0x58] sm:$0xf0]  ;;  %v2927_v27 = vld [vmem:[#allocation15 + $0x24] sm:$0xf]  ;;  %v2658_v29 = vld [vmem:[#allocation15 + $0x30] sm:$0xf0] }
  0x82   : > { %966 = vmatpush.bf16.msra.mxu3 %v2717_v62  ;;  %v2664_v30 = vld [vmem:[#allocation15 + $0x28] sm:$0xf]  ;;  %v2930_v31 = vld [vmem:[#allocation15 + $0x34] sm:$0xf0]  ;;  %v2661_v32 = vor.u32 %v2927_v27, %v2658_v29  ;;  %v2928_v34 = vld [vmem:[#allocation15 + $0x2c] sm:$0xf] }
  0x83   : > { %v2665_v33 = vor.u32 %v2930_v31, %v2664_v30  ;;  %v2666_v35 = vld [vmem:[#allocation15 + $0x38] sm:$0xf0]  ;;  %v2640_v36 = vld [vmem:[#allocation15] sm:$0xf]  ;;  %v2925_v38 = vld [vmem:[#allocation15 + $0xc] sm:$0xf0] }
  0x84   : > { %928 = vmatpush.bf16.msra.mxu0 %v2689_v2  ;;  %v2669_v37 = vor.u32 %v2928_v34, %v2666_v35  ;;  %v2923_v39 = vld [vmem:[#allocation15 + $0x4] sm:$0xf]  ;;  %v2642_v40 = vld [vmem:[#allocation15 + $0x10] sm:$0xf0]  ;;  %v2641_v41 = vor.u32 %v2925_v38, %v2640_v36  ;;  %v2648_v43 = vld [vmem:[#allocation15 + $0x8] sm:$0xf] }
  0x85   : > { %954 = vmatpush.bf16.msra.mxu2 %v2697_v7  ;;  %v2645_v42 = vor.u32 %v2923_v39, %v2642_v40  ;;  %v2926_v44 = vld [vmem:[#allocation15 + $0x14] sm:$0xf0]  ;;  %v2924_v45 = vld [vmem:[#allocation15 + $0xc] sm:$0xf]  ;;  %v2650_v47 = vld [vmem:[#allocation15 + $0x18] sm:$0xf0] }
  0x86   : > { %967 = vmatpush.bf16.msra.mxu3 %v2701_v10  ;;  %v2649_v46 = vor.u32 %v2926_v44, %v2648_v43  ;;  %v2653_v48 = vor.u32 %v2924_v45, %v2650_v47  ;;  %v3146_v58 = vld [vmem:[#allocation12] ss:$0 sm:$0xff]  ;;  %v3147_v61 = vld [vmem:[#allocation13] ss:$0 sm:$0xff]  ;;  %v2973_v4 = vld [vmem:[%s4663_s7 + $0x70] sm:$0xff]  ;;  %s4734_s26 = sld [smem:[#allocation54_spill]] }
  0x87   : > { %v2766_v7 = vld [vmem:[%s4730_s28 + $0x1] ss:$4 sm:$0x3]  ;;  %v2767_v8 = vld [vmem:[%s4730_s28 + $0x2] ss:$4 sm:$0x3] }
  0x88   : > { %929 = vmatpush.bf16.msra.mxu0 %v2673_v14  ;;  %v2964_v9 = vld [vmem:[%s4663_s7 + $0x28] sm:$0xff]  ;;  %v3944_v11 = vld [vmem:[%s4730_s28 + $0x3] ss:$4 sm:$0x3]  ;;  %v1001_v17 = vperm.slane %v2766_v7, 0  ;;  %v1002_v29 = vperm.slane %v2766_v7, 1 }
  0x89   : > { %955 = vmatpush.bf16.msra.mxu2 %v2681_v19  ;;  %v2972_v10 = vld [vmem:[%s4663_s7 + $0x68] sm:$0xff]  ;;  %v990_v12 = vld [vmem:[%s4730_s28] ss:$4 sm:$0x3]  ;;  %v1054_v34 = vperm.slane %v3944_v11, 1  ;;  %v2961_v40 = vld [vmem:[%s4663_s7 + $0x10] sm:$0xff] }
  0x8a   : > { %v2963_v15 = vld [vmem:[%s4663_s7 + $0x20] sm:$0xff]  ;;  %v992_v27 = vperm.slane %v990_v12, 0  ;;  %v2969_v43 = vld [vmem:[%s4663_s7 + $0x50] sm:$0xff]  ;;  %vm1361_vm14 = vcmask 1043456   ;;  %s4737_s17 = sld [smem:[#allocation55_spill]]  ;;  %s2405_s10 = sshll.u32 %s678_s14, 4  ;;  %s2406_s10 = int_to_ptr.vmem [resolvable:$true] %s2405_s10 }
  0x8b   : > { %v2971_v16 = vld [vmem:[%s4663_s7 + $0x60] sm:$0xff]  ;;  %s4762_s16 = sld [smem:[#allocation58_spill]]  ;;  %s2375_s2 = scalar_lea.sflag [#allocation23], %s3870_s13 }
  0x8c   : > { %s4770_s11 = sld [smem:[#allocation32_spill]] }
  0x8d   : > { %956 = vmatpush.bf16.msra.mxu2 %v2665_v33  ;;  %v1028_v33 = vperm.slane %v2767_v8, 1 }
  0x91   : > { %957 = vmatpush.bf16.msra.mxu2 %v2649_v46 }
  0x92   : > { %s2917_s12 = sshll.u32 %s4770_s11, 1 }
  0x93   : > { %s2385_s24 = sadd.s32 %s3614_s21, %s2917_s12 }
  0x94   : > { %s2918_s23 = sshll.u32 %s2385_s24, 3 }
  0xe6   : > { %v695_v23 = vpop.xlane.xlu0 %694 }
  0xe7   : > { %v703_v24 = vmul.f32 %v3908_v22, %v695_v23  ;;  %v2685_v23 = vor.u32 %v2932_v20, %v2682_v21  ;;  %v1053_v21 = vperm.slane %v3944_v11, 0 }
  0xe9   : > { %v3911_v25 = vsub.f32 %v692_v3, %v703_v24  ;;  %v2690_v3 = vld [vmem:[#allocation15 + $0x70] sm:$0xf0]  ;;  %v2656_v24 = vld [vmem:[#allocation15 + $0x20] sm:$0xf]  ;;  %968 = vmatpush.bf16.msra.mxu3 %v2685_v23 }
  0xea   : > { %v2693_v6 = vor.u32 %v2935_v1, %v2690_v3  ;;  %v2974_v1 = vld [vmem:[%s4663_s7 + $0x78] sm:$0xff]  ;;  %v2965_v3 = vld [vmem:[%s4663_s7 + $0x30] sm:$0xff] }
  0xeb   : > { %v705_v26 = vmul.f32 %v3911_v25, %v3911_v25  ;;  %v2962_v23 = vld [vmem:[%s4663_s7 + $0x18] sm:$0xff] }
  0xec   : > { %941 = vmatpush.bf16.msra.mxu1 %v2693_v6 }
  0xed   : > { %706 = vadd.xlane.f32.xlu0 %v705_v26  ;;  %v2929_v26 = vld [vmem:[#allocation15 + $0x2c] sm:$0xf0]  ;;  %969 = vmatpush.bf16.msra.mxu3 %v2669_v37 }
  0xee   : > { %v2657_v28 = vor.u32 %v2929_v26, %v2656_v24  ;;  %v2970_v24 = vld [vmem:[%s4663_s7 + $0x58] sm:$0xff] }
  0xf0   : > { %942 = vmatpush.bf16.msra.mxu1 %v2677_v18  ;;  %930 = vmatpush.bf16.msra.mxu0 %v2657_v28  ;;  %v1027_v18 = vperm.slane %v2767_v8, 0  ;;  %v993_v28 = vperm.slane %v990_v12, 1 }
  0xf1   : > { %970 = vmatpush.bf16.msra.mxu3 %v2653_v48 }
  0xf4   : > { %943 = vmatpush.bf16.msra.mxu1 %v2661_v32  ;;  %931 = vmatpush.bf16.msra.mxu0 %v2641_v41 }
  0xf5   : > { %1331 = vmatpush.bf16.msrb.mxu3 %v2974_v1 }
  0xf8   : > { %944 = vmatpush.bf16.msra.mxu1 %v2645_v42 }
  0xf9   : > { %1332 = vmatpush.bf16.msrb.mxu3 %v2973_v4 }
  0xfd   : > { %1333 = vmatpush.bf16.msrb.mxu3 %v2972_v10  ;;  %v2967_v10 = vld [vmem:[%s4663_s7 + $0x40] sm:$0xff] }
 0x101   : > { %1334 = vmatpush.bf16.msrb.mxu3 %v2971_v16 }
 0x105   : > { %1335 = vmatpush.bf16.msrb.mxu3 %v2970_v24 }
 0x109   : > { %1336 = vmatpush.bf16.msrb.mxu3 %v2969_v43 }
 0x160   : > { %v707_v49 = vpop.xlane.xlu0 %706 }
 0x161   : > { %v708_v50 = vmul.f32 %v707_v49, %v3908_v22  ;;  %v2966_v22 = vld [vmem:[%s4663_s7 + $0x38] sm:$0xff] }
 0x162   : > { %1318 = vmatpush.bf16.msrb.mxu2 %v2966_v22  ;;  %v1076_v22 = vld [vmem:[%s4733_s4] sm:$0x3] }
 0x163   : > { %v709_v51 = vadd.f32 1e-05, %v708_v50  ;;  %v1078_v8 = vperm.slane %v1076_v22, 0 }
 0x165   : > { %3150 = vrsqrt.f32 %v709_v51  ;;  %vm716_vm2 = vweird.f32 %v709_v51 }
 0x166   : > { %1319 = vmatpush.bf16.msrb.mxu2 %v2965_v3 }
 0x16a   : > { %1320 = vmatpush.bf16.msrb.mxu2 %v2964_v9  ;;  %v2959_v9 = vld [vmem:[%s4663_s7] sm:$0xff] }
 0x16b   : > { %v3151_v52 = vpop.eup %3150 }
 0x16c   : > { %v711_v53 = vmul.f32 %v3151_v52, %v709_v51  ;;  %vm717_vm1 = vweird.f32 %v3151_v52 }
 0x16d   : > { %vm718_vm3 = vmor %vm716_vm2, %vm717_vm1 }
 0x16e   : > { %v712_v54 = vmul.f32 %v3151_v52, %v711_v53  ;;  %1321 = vmatpush.bf16.msrb.mxu2 %v2963_v15 }
 0x170   : > { %v713_v55 = vmul.f32 0.5, %v712_v54 }
 0x172   : > { %v714_v56 = vsub.f32 1.5, %v713_v55  ;;  %1322 = vmatpush.bf16.msrb.mxu2 %v2962_v23 }
 0x174   : > { %v715_v57 = vmul.f32 %v3151_v52, %v714_v56 }
 0x176   : > { %v719_v59 = vsel %vm718_vm3, %v3151_v52, %v715_v57  ;;  %1323 = vmatpush.bf16.msrb.mxu2 %v2961_v40  ;;  %vm1357_vm3 = vcmask 64512  }
 0x177   : > { %v720_v60 = vmul.f32 %v719_v59, %v3911_v25 }
 0x179   : > { %v725_v62 = vmul.f32 %v3146_v58, %v720_v60 }
 0x17b   : > { %v730_v63 = vadd.f32 %v3147_v61, %v725_v62  ;;  %v2960_v62 = vld [vmem:[%s4663_s7 + $0x8] sm:$0xff] }
 0x17c   : > { %1324 = vmatpush.bf16.msrb.mxu2 %v2960_v62  ;;  %v2956_v62 = vld [vmem:[#allocation16 + $0x4] sm:$0xf0] }
 0x17d   : > { %v731_v0 = vpack.c.bf16 %v730_v63, %v730_v63  ;;  %v2968_v63 = vld [vmem:[%s4663_s7 + $0x48] sm:$0xff] }
 0x17e   : > { %1337 = vmatpush.bf16.msrb.mxu3 %v2968_v63 }
 0x17f   : > { %932 = vmatmul.bf16.vlgmr.msra.gmra.mxu0 %v731_v0  ;;  %945 = vmatmul.bf16.vlgmr.msra.gmra.mxu1 %v731_v0 }
 0x180   : > { %958 = vmatmul.bf16.vlgmr.msra.gmra.mxu2 %v731_v0  ;;  %971 = vmatmul.bf16.vlgmr.msra.gmra.mxu3 %v731_v0 }
 0x181   : > { %1325 = vmatpush.bf16.msrb.mxu2 %v2959_v9  ;;  %v4680_v9 = vlaneseq }
 0x182   : > { %1338 = vmatpush.bf16.msrb.mxu3 %v2967_v10 }
 0x1fc   : > { %v933_v2 = vpop.f32.mrf.mxu0  ;;  %v946_v25 = vpop.f32.mrf.mxu1 }
 0x1fd   : > { %v978_v5 = vrot.slane %v933_v2, 5  ;;  %v979_v6 = vrot.slane %v946_v25, 5 }
 0x1ff   : > { %982 = vst [vmem:[#allocation3] sm:$0xf8] %v978_v5 }
 0x200   : > { %984 = vst [vmem:[#allocation3 + $0x8] sm:$0x7] %v978_v5 }
 0x201   : > { %983 = vst [vmem:[#allocation3 + $0x18] sm:$0xf8] %v979_v6 }
 0x202   : > { %985 = vst [vmem:[#allocation3 + $0x10] sm:$0x7] %v979_v6 }
 0x203   : > { %v3949_v13 = vpop.f32.mrf.mxu2  ;;  %v3951_v14 = vpop.f32.mrf.mxu3 }
 0x204   : > { %4731 = vst [vmem:[#allocation37_spill] sm:$0xff] %v3949_v13  ;;  %v935_v19 = vpop.f32.mrf.mxu0  ;;  %v948_v20 = vpop.f32.mrf.mxu1 }
 0x205   : > { %4732 = vst [vmem:[#allocation38_spill] sm:$0xff] %v3951_v14 }
 0x206   : > { %v986_v26 = vld [vmem:[#allocation3] sm:$0xff] }
 0x207   : > { %v988_v30 = vld [vmem:[#allocation3 + $0x8] sm:$0x7]  ;;  %v1005_v31 = vmul.f32 %v1001_v17, %v986_v26  ;;  %v1031_v32 = vmul.f32 %v1027_v18, %v986_v26  ;;  %v1057_v37 = vmul.f32 %v1053_v21, %v986_v26  ;;  %v996_v44 = vmul.f32 %v992_v27, %v986_v26 }
 0x208   : > { %v1007_v35 = vmul.f32 %v1001_v17, %v988_v30  ;;  %v1033_v36 = vmul.f32 %v1027_v18, %v988_v30  ;;  %v1059_v38 = vmul.f32 %v1053_v21, %v988_v30  ;;  %1124 = vst [vmem:[#allocation3] sm:$0x7] %v988_v30  ;;  %v987_v39 = vld [vmem:[#allocation3 + $0x18] sm:$0xff]  ;;  %v1079_v17 = vperm.slane %v1076_v22, 1 }
 0x209   : > { %v1014_v41 = vrot.slane %v1005_v31, 1  ;;  %v989_v42 = vld [vmem:[#allocation3 + $0x10] sm:$0x7]  ;;  %v1040_v46 = vrot.slane %v1031_v32, 2  ;;  %v1006_v50 = vmul.f32 %v1002_v29, %v987_v39  ;;  %v1032_v52 = vmul.f32 %v1028_v33, %v987_v39 }
 0x20a   : > { %v1015_v45 = vrot.slane %v1007_v35, 1  ;;  %v1041_v47 = vrot.slane %v1033_v36, 2  ;;  %1125 = vst [vmem:[#allocation3 + $0x18] sm:$0x7] %v989_v42  ;;  %v1008_v51 = vmul.f32 %v1002_v29, %v989_v42  ;;  %v1034_v53 = vmul.f32 %v1028_v33, %v989_v42 }
 0x20b   : > { %v961_v48 = vpop.f32.mrf.mxu2  ;;  %v974_v49 = vpop.f32.mrf.mxu3  ;;  %v1066_v55 = vrot.slane %v1057_v37, 3  ;;  %v1067_v56 = vrot.slane %v1059_v38, 3  ;;  %v1058_v57 = vmul.f32 %v1054_v34, %v987_v39  ;;  %v997_v59 = vmul.f32 %v993_v28, %v987_v39 }
 0x20c   : > { %v1016_v54 = vsel %vm1013_vm4, %v1014_v41, %v1015_v45  ;;  %v1017_v60 = vrot.slane %v1006_v50, 1  ;;  %v1018_v61 = vrot.slane %v1008_v51, 1  ;;  %v1042_v0 = vsel %vm1039_vm5, %v1040_v46, %v1041_v47  ;;  %v1345_v47 = vld [vmem:[%s4734_s26] sm:$0xff]  ;;  %s4775_s26 = sld [smem:[#allocation60_spill]] }
 0x20d   : > { %v1022_v58 = vadd.f32 %v1016_v54, %v996_v44  ;;  %v1043_v1 = vrot.slane %v1032_v52, 2  ;;  %v1044_v2 = vrot.slane %v1034_v53, 2  ;;  %v1060_v25 = vmul.f32 %v1054_v34, %v989_v42 }
 0x20e   : > { %v1019_v4 = vsel %vm1013_vm4, %v1017_v60, %v1018_v61  ;;  %v1069_v6 = vrot.slane %v1058_v57, 3  ;;  %v1068_v11 = vsel %vm1065_vm6, %v1066_v55, %v1067_v56  ;;  %v1353_v50 = vunpack.c.l.b16 %v1345_v47  ;;  %v2771_v61 = vld [vmem:[#allocation16] sm:$0xf] }
 0x20f   : > { %v1048_v3 = vadd.f32 %v1042_v0, %v1022_v58  ;;  %v1023_v5 = vadd.f32 %v1019_v4, %v997_v59  ;;  %v1070_v7 = vrot.slane %v1060_v25, 3  ;;  %v1045_v12 = vsel %vm1039_vm5, %v1043_v1, %v1044_v2  ;;  %v2955_v1 = vld [vmem:[#allocation16 + $0x4] sm:$0xf]  ;;  %v2773_v2 = vld [vmem:[#allocation16 + $0x8] sm:$0xf0] }
 0x210   : > { %v1354_v51 = vunpack.c.h.b16 %v1345_v47  ;;  %v1355_v55 = vpack.c.b16 %v1353_v50, %v1353_v50  ;;  %v2772_v22 = vor.u32 %v2956_v62, %v2771_v61  ;;  %v2776_v25 = vor.u32 %v2955_v1, %v2773_v2  ;;  %v2958_v4 = vld [vmem:[#allocation16 + $0x14] sm:$0xf0] }
 0x211   : > { %v1074_v15 = vadd.f32 %v1068_v11, %v1048_v3  ;;  %v1049_v16 = vadd.f32 %v1045_v12, %v1023_v5  ;;  %v1071_v18 = vsel %vm1065_vm6, %v1069_v6, %v1070_v7  ;;  %v2779_v3 = vld [vmem:[#allocation16 + $0x10] sm:$0xf]  ;;  %v2957_v6 = vld [vmem:[#allocation16 + $0x14] sm:$0xf]  ;;  %v2781_v7 = vld [vmem:[#allocation16 + $0x18] sm:$0xf0] }
 0x212   : > { %v1356_v56 = vpack.c.b16 %v1354_v51, %v1354_v51  ;;  %v1363_v60 = vsel %vm1361_vm14, %v1355_v55, 0  ;;  %v2780_v5 = vor.u32 %v2958_v4, %v2779_v3  ;;  %v4004_v11 = vand.u32 127, %v4680_v9  ;;  %s2403_s27 = scalar_lea.hbm %s4775_s26, %s2918_s23  ;;  %s3500_s11 = scalar_lea.hbm %s4775_s26, 32 }
 0x213   : > { %v1082_v19 = vadd.f32 %v1078_v8, %v1074_v15  ;;  %v1075_v20 = vadd.f32 %v1071_v18, %v1049_v16  ;;  %v2784_v8 = vor.u32 %v2957_v6, %v2781_v7 }
 0x214   : > { %v1366_v0 = vsel %vm1361_vm14, %v1356_v56, 0  ;;  %vm1764_vm0 = vcmp.eq.s32.totalorder %v4004_v11, 2  ;;  %vm1699_vm1 = vcmp.eq.s32.totalorder %v4004_v11, 1  ;;  %vm1630_vm2 = vcmp.eq.s32.totalorder %v4004_v11, 0 }
 0x215   : > { %v1084_v21 = vsub.f32 0.0, %v1082_v19  ;;  %v1083_v23 = vadd.f32 %v1079_v17, %v1075_v20  ;;  %vm1959_vm4 = vcmp.eq.s32.totalorder %v4004_v11, 5  ;;  %vm1829_vm5 = vcmp.eq.s32.totalorder %v4004_v11, 3 }
 0x216   : > { %vm1894_vm6 = vcmp.eq.s32.totalorder %v4004_v11, 4 }
 0x217   : > { %v1086_v24 = vmul.f32 1.442695, %v1084_v21  ;;  %v1085_v26 = vsub.f32 0.0, %v1083_v23 }
 0x219   : > { %3152 = vpow2.f32 %v1086_v24  ;;  %v1088_v27 = vmul.f32 1.442695, %v1085_v26 }
 0x21b   : > { %3154 = vpow2.f32 %v1088_v27 }
 0x21f   : > { %v3153_v28 = vpop.eup %3152 }
 0x220   : > { %v1090_v29 = vadd.f32 1.0, %v3153_v28 }
 0x221   : > { %v3155_v30 = vpop.eup %3154 }
 0x222   : > { %3156 = vrcp.f32 %v1090_v29  ;;  %v1091_v31 = vadd.f32 1.0, %v3155_v30  ;;  %v1103_v36 = vand.u32 2147483648, %v1090_v29  ;;  %v1101_v39 = vand.u32 2147483647, %v1090_v29 }
 0x223   : > { %vm1097_vm8 = vweird.f32 %v1090_v29 }
 0x224   : > { %3158 = vrcp.f32 %v1091_v31  ;;  %v1118_v42 = vand.u32 2147483648, %v1091_v31  ;;  %v1104_v43 = vor.u32 1.1754944e-38, %v1103_v36  ;;  %v1116_v45 = vand.u32 2147483647, %v1091_v31 }
 0x225   : > { %vm1102_vm11 = vcmp.eq.f32.partialorder %v1101_v39, 8.507059e+37  ;;  %vm1112_vm12 = vweird.f32 %v1091_v31 }
 0x226   : > { %v1119_v53 = vor.u32 1.1754944e-38, %v1118_v42  ;;  %vm1117_vm15 = vcmp.eq.f32.partialorder %v1116_v45, 8.507059e+37 }
 0x228   : > { %v3157_v32 = vpop.eup %3156 }
 0x229   : > { %v1093_v33 = vmul.f32 %v3157_v32, %v1090_v29  ;;  %vm1098_vm7 = vweird.f32 %v3157_v32 }
 0x22a   : > { %v3159_v34 = vpop.eup %3158  ;;  %vm1099_vm9 = vmor %vm1097_vm8, %vm1098_vm7  ;;  %vm2024_vm7 = vcmp.eq.s32.totalorder %v4004_v11, 6  ;;  %vm2089_vm8 = vcmp.eq.s32.totalorder %v4004_v11, 7 }
 0x22b   : > { %v1094_v35 = vsub.f32 1.0, %v1093_v33  ;;  %v1108_v37 = vmul.f32 %v3159_v34, %v1091_v31  ;;  %vm1113_vm10 = vweird.f32 %v3159_v34 }
 0x22c   : > { %vm1114_vm13 = vmor %vm1112_vm12, %vm1113_vm10 }
 0x22d   : > { %v1095_v38 = vmul.f32 %v3157_v32, %v1094_v35  ;;  %v1109_v40 = vsub.f32 1.0, %v1108_v37 }
 0x22f   : > { %v1096_v41 = vadd.f32 %v3157_v32, %v1095_v38  ;;  %v1110_v44 = vmul.f32 %v3159_v34, %v1109_v40 }
 0x231   : > { %v1100_v46 = vsel %vm1099_vm9, %v3157_v32, %v1096_v41  ;;  %v1111_v49 = vadd.f32 %v3159_v34, %v1110_v44 }
 0x232   : > { %v1105_v48 = vsel %vm1102_vm11, %v1104_v43, %v1100_v46 }
 0x233   : > { %v3995_v52 = vmul.f32 %v1105_v48, %v1082_v19  ;;  %v1115_v54 = vsel %vm1114_vm13, %v3159_v34, %v1111_v49  ;;  %vm1690_vm13 = vcmask 1040384  }
 0x234   : > { %v1120_v58 = vsel %vm1117_vm15, %v1119_v53, %v1115_v54 }
 0x235   : > { %4735 = vst [vmem:[#allocation39_spill] sm:$0xff] %v3995_v52  ;;  %v1126_v57 = vpack.c.bf16 %v3995_v52, %v3995_v52  ;;  %v3999_v59 = vmul.f32 %v1120_v58, %v1083_v23 }
 0x237   : > { %4736 = vst [vmem:[#allocation40_spill] sm:$0xff] %v3999_v59  ;;  %1159 = vmatpush.bf16.xpose.msrb.mxu0 %v1126_v57  ;;  %1326 = vmatmul.bf16.vlgmr.msrb.gmra.mxu2 %v1126_v57  ;;  %v1127_v63 = vpack.c.bf16 %v3999_v59, %v3999_v59 }
 0x239   : > { %1178 = vmatpush.bf16.xpose.msrb.mxu1 %v1127_v63  ;;  %1339 = vmatmul.bf16.vlgmr.msrb.gmra.mxu3 %v1127_v63 }
 0x23e   : > { %1160 = vmatmul.bf16.vlgmr.msrb.gmra.mxu0 %v2772_v22 }
 0x23f   : > { %1375 = vmatpush.bf16.msra.mxu0 %v1363_v60 }
 0x240   : > { %1179 = vmatmul.bf16.vlgmr.msrb.gmra.mxu1 %v2776_v25 }
 0x241   : > { %1388 = vmatpush.bf16.msra.mxu1 %v1366_v0 }
 0x24e   : > { %1165 = vmatmul.bf16.gmra.mxu0 %v2780_v5 }
 0x250   : > { %1184 = vmatmul.bf16.gmra.mxu1 %v2784_v8 }
 0x2ba   : > { %v1327_v10 = vpop.f32.mrf.mxu2 }
 0x2bb   : > { %v1161_v12 = vpop.f32.mrf.mxu0 }
 0x2bc   : > { %v1340_v15 = vpop.f32.mrf.mxu3 }
 0x2bd   : > { %v1341_v16 = vadd.f32 %v1340_v15, %v1327_v10  ;;  %v1180_v17 = vpop.f32.mrf.mxu1 }
 0x2be   : > { %v1181_v18 = vadd.f32 %v1180_v17, %v1161_v12 }
 0x2bf   : > { %v1344_v19 = vpack.c.bf16 %v1341_v16, %v1341_v16 }
 0x2c0   : > { %v1765_v20 = vsel %vm1764_vm0, %v1181_v18, 0.0  ;;  %v1700_v21 = vsel %vm1699_vm1, %v1181_v18, 0.0  ;;  %v1631_v23 = vsel %vm1630_vm2, %v1181_v18, 0.0  ;;  %v1960_v31 = vsel %vm1959_vm4, %v1181_v18, 0.0 }
 0x2c1   : > { %2849 = vmatmul.msk.bf16.vlgmr.msra.gmra.mxu0 %vm1357_vm3, %v1344_v19  ;;  %2850 = vmatmul.msk.bf16.vlgmr.msra.gmra.mxu1 %vm1357_vm3, %v1344_v19  ;;  %v1769_v24 = vsel %vm1357_vm3, %v1765_v20, 0.0  ;;  %v1704_v26 = vsel %vm1357_vm3, %v1700_v21, 0.0  ;;  %v1635_v27 = vsel %vm1357_vm3, %v1631_v23, 0.0  ;;  %v1830_v32 = vsel %vm1829_vm5, %v1181_v18, 0.0 }
 0x2c2   : > { %v1329_v28 = vpop.f32.mrf.mxu2  ;;  %1770 = vadd.xlane.f32.xlu0 %v1769_v24  ;;  %1705 = vadd.xlane.f32.xlu2 %v1704_v26  ;;  %v1895_v34 = vsel %vm1894_vm6, %v1181_v18, 0.0  ;;  %v1964_v35 = vsel %vm1357_vm3, %v1960_v31, 0.0  ;;  %v1834_v36 = vsel %vm1357_vm3, %v1830_v32, 0.0  ;;  %v2025_v41 = vsel %vm2024_vm7, %v1181_v18, 0.0 }
 0x2c3   : > { %1636 = vadd.xlane.f32.xlu1 %v1635_v27  ;;  %v1163_v29 = vpop.f32.mrf.mxu0  ;;  %v1899_v37 = vsel %vm1357_vm3, %v1895_v34, 0.0  ;;  %v2090_v43 = vsel %vm2089_vm8, %v1181_v18, 0.0  ;;  %v2029_v44 = vsel %vm1357_vm3, %v2025_v41, 0.0 }
 0x2c4   : > { %v1342_v30 = vpop.f32.mrf.mxu3  ;;  %v2094_v46 = vsel %vm1357_vm3, %v2090_v43, 0.0 }
 0x2c5   : > { %v1182_v33 = vpop.f32.mrf.mxu1 }
 0x2c6   : > { %v1183_v38 = vadd.f32 %v1182_v33, %v1163_v29 }
 0x2c8   : > { %v1831_v42 = vsel %vm1829_vm5, %v1183_v38, 0.0  ;;  %v2026_v49 = vsel %vm2024_vm7, %v1183_v38, 0.0  ;;  %v1701_v50 = vsel %vm1699_vm1, %v1183_v38, 0.0  ;;  %v1632_v53 = vsel %vm1630_vm2, %v1183_v38, 0.0 }
 0x2c9   : > { %v1837_v45 = vsel %vm1357_vm3, %v1831_v42, 0.0  ;;  %v2032_v57 = vsel %vm1357_vm3, %v2026_v49, 0.0  ;;  %v1707_v58 = vsel %vm1357_vm3, %v1701_v50, 0.0  ;;  %v1638_v62 = vsel %vm1357_vm3, %v1632_v53, 0.0 }
 0x2ca   : > { %1965 = vadd.xlane.f32.xlu0 %v1964_v35  ;;  %1835 = vadd.xlane.f32.xlu2 %v1834_v36  ;;  %v1896_v4 = vsel %vm1894_vm6, %v1183_v38, 0.0  ;;  %v1766_v5 = vsel %vm1764_vm0, %v1183_v38, 0.0  ;;  %v2091_v12 = vsel %vm2089_vm8, %v1183_v38, 0.0  ;;  %v1961_v15 = vsel %vm1959_vm4, %v1183_v38, 0.0 }
 0x2cb   : > { %1900 = vadd.xlane.f32.xlu1 %v1899_v37  ;;  %v1166_v39 = vpop.f32.mrf.mxu0  ;;  %v1902_v7 = vsel %vm1357_vm3, %v1896_v4, 0.0  ;;  %v1772_v8 = vsel %vm1357_vm3, %v1766_v5, 0.0  ;;  %v2097_v17 = vsel %vm1357_vm3, %v2091_v12, 0.0  ;;  %v1967_v18 = vsel %vm1357_vm3, %v1961_v15, 0.0 }
 0x2cd   : > { %v1185_v40 = vpop.f32.mrf.mxu1 }
 0x2ce   : > { %v4049_v54 = vadd.f32 %v1185_v40, %v1166_v39  ;;  %v1346_v39 = vld [vmem:[%s4737_s17] sm:$0x3]  ;;  %s2407_s17 = sshll.u32 %s2403_s27, 4  ;;  %s2408_s17 = int_to_ptr.hbm [resolvable:$true] %s2407_s17 }
 0x2cf   : > { %v1348_v41 = vperm.slane %v1346_v39, 0  ;;  %v1349_v42 = vperm.slane %v1346_v39, 1  ;;  %v4165_v39 = vld [vmem:[#allocation18 + $0x8] sm:$0xff]  ;;  %s3494_s5 = sshra.s32 %s2408_s17, 4  ;;  %s3495_s5 = int_to_ptr.hbm [resolvable:$true] %s3494_s5 }
 0x2d0   : > { %v1633_v3 = vsel %vm1630_vm2, %v4049_v54, 0.0  ;;  %v1832_v10 = vsel %vm1829_vm5, %v4049_v54, 0.0  ;;  %v1702_v19 = vsel %vm1699_vm1, %v4049_v54, 0.0  ;;  %v2027_v20 = vsel %vm2024_vm7, %v4049_v54, 0.0  ;;  %s3496_s15 = scalar_lea.hbm %s3495_s5, 8  ;;  %p3501_p10 = scmp.lt.s32.totalorder %s3495_s5, %s4775_s26 }
 0x2d1   : > { %v1641_v6 = vsel %vm1357_vm3, %v1633_v3, 0.0  ;;  %v1840_v16 = vsel %vm1357_vm3, %v1832_v10, 0.0  ;;  %v1767_v21 = vsel %vm1764_vm0, %v4049_v54, 0.0  ;;  %v1710_v23 = vsel %vm1357_vm3, %v1702_v19, 0.0  ;;  %p3497_p1 = scmp.ne.s32.totalorder %s3495_s5, %s3496_s15  ;;  %p3502_p11 = scmp.lt.s32.totalorder %s3500_s11, %s3496_s15 }
 0x2d2   : > { %2030 = vadd.xlane.f32.xlu2 %v2029_v44  ;;  %1838 = vadd.xlane.f32.xlu0 %v1837_v45  ;;  %v2035_v24 = vsel %vm1357_vm3, %v2027_v20, 0.0  ;;  %v1775_v26 = vsel %vm1357_vm3, %v1767_v21, 0.0  ;;  %v1897_v27 = vsel %vm1894_vm6, %v4049_v54, 0.0  ;;  %v1962_v29 = vsel %vm1959_vm4, %v4049_v54, 0.0 }
 0x2d3   : > { %2095 = vadd.xlane.f32.xlu1 %v2094_v46  ;;  %v1168_v47 = vpop.f32.mrf.mxu0  ;;  %v1905_v30 = vsel %vm1357_vm3, %v1897_v27, 0.0  ;;  %v1970_v32 = vsel %vm1357_vm3, %v1962_v29, 0.0  ;;  %v2092_v37 = vsel %vm2089_vm8, %v4049_v54, 0.0  ;;  %p3498_p8 = pnand %p3497_p1, %p3839_p0  ;;  %p3503_p12 = por %p3502_p11, %p3501_p10 }
 0x2d4   : > { %v2100_v38 = vsel %vm1357_vm3, %v2092_v37, 0.0 }
 0x2d5   : > { %v1187_v48 = vpop.f32.mrf.mxu1  ;;  %p3499_p9 = pneg %p3498_p8 }
 0x2d6   : > { %v1188_v51 = vadd.f32 %v1187_v48, %v1168_v47 }
 0x2d7   : > { %p3504_p13 = pnand %p3503_p12, %p3499_p9 }
 0x2d8   : > { %v1768_v55 = vsel %vm1764_vm0, %v1188_v51, 0.0  ;;  %v1634_v56 = vsel %vm1630_vm2, %v1188_v51, 0.0  ;;  %v1963_v63 = vsel %vm1959_vm4, %v1188_v51, 0.0  ;;  %v1833_v0 = vsel %vm1829_vm5, %v1188_v51, 0.0 }
 0x2d9   : > { %v1778_v60 = vsel %vm1357_vm3, %v1768_v55, 0.0  ;;  %v1644_v61 = vsel %vm1357_vm3, %v1634_v56, 0.0  ;;  %v2028_v22 = vsel %vm2024_vm7, %v1188_v51, 0.0  ;;  %v1973_v1 = vsel %vm1357_vm3, %v1963_v63, 0.0 }
 0x2da   : > { %2033 = vadd.xlane.f32.xlu0 %v2032_v57  ;;  %1708 = vadd.xlane.f32.xlu2 %v1707_v58  ;;  %v1843_v2 = vsel %vm1357_vm3, %v1833_v0, 0.0  ;;  %v2038_v25 = vsel %vm1357_vm3, %v2028_v22, 0.0  ;;  %v1703_v28 = vsel %vm1699_vm1, %v1188_v51, 0.0  ;;  %v1898_v33 = vsel %vm1894_vm6, %v1188_v51, 0.0 }
 0x2db   : > { %1639 = vadd.xlane.f32.xlu1 %v1638_v62  ;;  %v1713_v31 = vsel %vm1357_vm3, %v1703_v28, 0.0  ;;  %v1908_v34 = vsel %vm1357_vm3, %v1898_v33, 0.0  ;;  %v2093_v35 = vsel %vm2089_vm8, %v1188_v51, 0.0  ;;  %v2170_v62 = vsub.f32 0.0, %v3949_v13 }
 0x2dc   : > { %v2103_v36 = vsel %vm1357_vm3, %v2093_v35, 0.0  ;;  %v2171_v22 = vsub.f32 0.0, %v3951_v14  ;;  %v4157_v35 = vld [vmem:[#allocation18 + $0x10] sm:$0xff] }
 0x2de   : > { %v2174_v5 = vmul.f32 1.442695, %v2171_v22 }
 0x2e2   : > { %1903 = vadd.xlane.f32.xlu2 %v1902_v7  ;;  %1642 = vadd.xlane.f32.xlu0 %v1641_v6 }
 0x2e3   : > { %1773 = vadd.xlane.f32.xlu1 %v1772_v8 }
 0x2ea   : > { %2098 = vadd.xlane.f32.xlu2 %v2097_v17  ;;  %1841 = vadd.xlane.f32.xlu0 %v1840_v16 }
 0x2eb   : > { %1968 = vadd.xlane.f32.xlu1 %v1967_v18 }
 0x2f2   : > { %1711 = vadd.xlane.f32.xlu2 %v1710_v23  ;;  %2036 = vadd.xlane.f32.xlu0 %v2035_v24 }
 0x2f3   : > { %1776 = vadd.xlane.f32.xlu1 %v1775_v26 }
 0x2fa   : > { %1906 = vadd.xlane.f32.xlu2 %v1905_v30  ;;  %1714 = vadd.xlane.f32.xlu0 %v1713_v31 }
 0x2fb   : > { %1971 = vadd.xlane.f32.xlu1 %v1970_v32 }
 0x302   : > { %1779 = vadd.xlane.f32.xlu2 %v1778_v60  ;;  %1909 = vadd.xlane.f32.xlu0 %v1908_v34 }
 0x303   : > { %1645 = vadd.xlane.f32.xlu1 %v1644_v61 }
 0x30a   : > { %1974 = vadd.xlane.f32.xlu2 %v1973_v1  ;;  %2104 = vadd.xlane.f32.xlu0 %v2103_v36  ;;  %v4159_v36 = vld [vmem:[#allocation18 + $0x18] sm:$0xff] }
 0x30b   : > { %1844 = vadd.xlane.f32.xlu1 %v1843_v2 }
 0x312   : > { %2101 = vadd.xlane.f32.xlu2 %v2100_v38  ;;  %v4163_v38 = vld [vmem:[#allocation18] sm:$0xff] }
 0x313   : > { %2039 = vadd.xlane.f32.xlu1 %v2038_v25  ;;  %v2172_v25 = vmul.f32 1.442695, %v2170_v62 }
 0x335   : > { %v4129_v53 = vpop.xlane.xlu2 %1705  ;;  %v4131_v58 = vpop.xlane.xlu0 %1770 }
 0x336   : > { %v4125_v40 = vpop.xlane.xlu1 %1636 }
 0x33d   : > { %v4137_v1 = vpop.xlane.xlu2 %1835  ;;  %v4139_v17 = vpop.xlane.xlu0 %1965 }
 0x33e   : > { %v1377_v43 = vpop.f32.mrf.mxu0  ;;  %v1390_v45 = vpop.f32.mrf.mxu1 }
 0x33f   : > { %v1378_v44 = vadd.f32 %v1377_v43, %v1348_v41  ;;  %v1391_v46 = vadd.f32 %v1390_v45, %v1349_v42  ;;  %v4127_v49 = vpop.xlane.xlu1 %1900 }
 0x341   : > { %v1396_v47 = vmin.f32 %v1378_v44, 20.0  ;;  %v1397_v48 = vmin.f32 %v1391_v46, 20.0  ;;  %vm1394_vm10 = vcmp.gt.f32.partialorder %v1378_v44, 20.0  ;;  %vm1395_vm12 = vcmp.gt.f32.partialorder %v1391_v46, 20.0 }
 0x343   : > { %v1398_v11 = vmul.f32 1.442695, %v1396_v47  ;;  %v1400_v50 = vmul.f32 1.442695, %v1397_v48 }
 0x345   : > { %3160 = vpow2.f32 %v1398_v11  ;;  %v4143_v24 = vpop.xlane.xlu2 %2030  ;;  %v4151_v32 = vpop.xlane.xlu0 %1838 }
 0x346   : > { %3162 = vpow2.f32 %v1400_v50  ;;  %v1379_v51 = vpop.f32.mrf.mxu0  ;;  %v1392_v54 = vpop.f32.mrf.mxu1 }
 0x347   : > { %v4134_v0 = vpop.xlane.xlu1 %2095 }
 0x348   : > { %4738 = vst [vmem:[#allocation41_spill] sm:$0xff] %v4134_v0 }
 0x34b   : > { %v3161_v55 = vpop.eup %3160 }
 0x34c   : > { %v3163_v56 = vpop.eup %3162  ;;  %v1402_v57 = vadd.f32 1.0, %v3161_v55  ;;  %v1405_v60 = vmul.f32 -0.5, %v3161_v55  ;;  %v1408_v3 = vand.u32 2147483647, %v3161_v55 }
 0x34d   : > { %v1411_v61 = vadd.f32 1.0, %v3163_v56  ;;  %v1414_v63 = vmul.f32 -0.5, %v3163_v56  ;;  %v1417_v6 = vand.u32 2147483647, %v3163_v56  ;;  %v4177_v47 = vpop.xlane.xlu2 %1708 }
 0x34e   : > { %3164 = vlog2.f32 %v1402_v57  ;;  %v1406_v2 = vadd.f32 1.0, %v1405_v60  ;;  %vm1409_vm9 = vcmp.lt.f32.partialorder %v1408_v3, 0.0004427343 }
 0x34f   : > { %3166 = vlog2.f32 %v1411_v61  ;;  %v1415_v4 = vadd.f32 1.0, %v1414_v63  ;;  %vm1418_vm11 = vcmp.lt.f32.partialorder %v1417_v6, 0.0004427343  ;;  %v4141_v21 = vpop.xlane.xlu1 %1639 }
 0x350   : > { %v1407_v12 = vmul.f32 %v3161_v55, %v1406_v2  ;;  %3168 = vpow2.f32 %v2172_v25 }
 0x351   : > { %v1416_v16 = vmul.f32 %v3163_v56, %v1415_v4  ;;  %3170 = vpow2.f32 %v2174_v5 }
 0x354   : > { %v3165_v7 = vpop.eup %3164 }
 0x355   : > { %v3167_v8 = vpop.eup %3166  ;;  %v1404_v10 = vmul.f32 0.6931472, %v3165_v7 }
 0x356   : > { %v1413_v15 = vmul.f32 0.6931472, %v3167_v8  ;;  %v3169_v26 = vpop.eup %3168 }
 0x357   : > { %v1410_v18 = vsel %vm1409_vm9, %v1407_v12, %v1404_v10  ;;  %v3171_v27 = vpop.eup %3170  ;;  %v4145_v28 = vadd.f32 1.0, %v3169_v26  ;;  %v4161_v37 = vpop.xlane.xlu1 %1773 }
 0x358   : > { %v1420_v19 = vsel %vm1394_vm10, %v1378_v44, %v1410_v18  ;;  %v1419_v20 = vsel %vm1418_vm11, %v1416_v16, %v1413_v15  ;;  %v4147_v29 = vadd.f32 1.0, %v3171_v27  ;;  %v2034_v16 = vpop.xlane.xlu0 %2033 }
 0x359   : > { %1426 = vst [vmem:[#allocation5] sm:$0xff] %v1420_v19  ;;  %v1421_v23 = vsel %vm1395_vm12, %v1391_v46, %v1419_v20  ;;  %v1620_v44 = vmul.f32 %v1420_v19, %v3995_v52 }
 0x35a   : > { %1427 = vst [vmem:[#allocation5 + $0x8] sm:$0xff] %v1421_v23  ;;  %v1621_v43 = vmul.f32 %v1421_v23, %v3999_v59 }
 0x35b   : > { %4739 = vst [vmem:[#allocation42_spill] sm:$0xff] %v4145_v28 }
 0x35c   : > { %4740 = vst [vmem:[#allocation43_spill] sm:$0xff] %v4147_v29  ;;  %v1627_v29 = vld [vmem:[#allocation2] sm:$0xff] }
 0x35f   : > { %v4209_v23 = vpop.xlane.xlu1 %1968 }
 0x361   : > { %v1428_v30 = vld [vmem:[#allocation5] ss:$8 sm:$0x3]  ;;  %v4149_v31 = vld [vmem:[#allocation5 + $0x1] ss:$8 sm:$0x3] }
 0x362   : > { %v4153_v33 = vld [vmem:[#allocation5 + $0x2] ss:$8 sm:$0x3]  ;;  %v4155_v34 = vld [vmem:[#allocation5 + $0x3] ss:$8 sm:$0x3] }
 0x363   : > { %v4167_v41 = vld [vmem:[#allocation5 + $0x4] ss:$8 sm:$0x3]  ;;  %v4169_v42 = vld [vmem:[#allocation5 + $0x5] ss:$8 sm:$0x3] }
 0x364   : > { %v4173_v45 = vld [vmem:[#allocation5 + $0x6] ss:$8 sm:$0x3]  ;;  %v4175_v46 = vld [vmem:[#allocation5 + $0x7] ss:$8 sm:$0x3] }
 0x365   : > { %1623 = vst [vmem:[#allocation5 + $0x8] sm:$0xff] %v1621_v43  ;;  %v1430_v48 = vperm.slane %v1428_v30, 0  ;;  %v1431_v11 = vperm.slane %v1428_v30, 1  ;;  %v1453_v50 = vperm.slane %v4149_v31, 0  ;;  %v1454_v51 = vperm.slane %v4149_v31, 1 }
 0x366   : > { %1622 = vst [vmem:[#allocation5] sm:$0xff] %v1620_v44  ;;  %v1477_v54 = vperm.slane %v4153_v33, 0  ;;  %v1478_v55 = vperm.slane %v4153_v33, 1  ;;  %v4684_v56 = vperm.slane %v4155_v34, 0  ;;  %v4683_v57 = vperm.slane %v4155_v34, 1 }
 0x367   : > { %v1436_v60 = vmul.f32 %v1430_v48, %v4157_v35  ;;  %v1437_v61 = vmul.f32 %v1431_v11, %v4159_v36  ;;  %v1434_v62 = vmul.f32 %v1430_v48, %v4163_v38  ;;  %v1435_v63 = vmul.f32 %v1431_v11, %v4165_v39 }
 0x368   : > { %v1457_v22 = vmul.f32 %v1453_v50, %v4163_v38  ;;  %v1458_v2 = vmul.f32 %v1454_v51, %v4165_v39  ;;  %v1481_v25 = vmul.f32 %v1477_v54, %v4163_v38  ;;  %v1482_v3 = vmul.f32 %v1478_v55, %v4165_v39 }
 0x369   : > { %v1442_v4 = vmul.f32 1.442695, %v1436_v60  ;;  %v1444_v5 = vmul.f32 1.442695, %v1437_v61  ;;  %v1438_v6 = vmul.f32 1.442695, %v1434_v62  ;;  %v1505_v7 = vmul.f32 %v4684_v56, %v4163_v38  ;;  %v1904_v62 = vpop.xlane.xlu2 %1903 }
 0x36a   : > { %v1440_v8 = vmul.f32 1.442695, %v1435_v63  ;;  %v4196_v10 = vmul.f32 1.442695, %v1457_v22  ;;  %v4198_v12 = vmul.f32 1.442695, %v1458_v2  ;;  %v1506_v15 = vmul.f32 %v4683_v57, %v4165_v39 }
 0x36b   : > { %3172 = vpow2.f32 %v1442_v4  ;;  %v4203_v18 = vmul.f32 1.442695, %v1481_v25  ;;  %v4205_v19 = vmul.f32 1.442695, %v1482_v3  ;;  %v4207_v20 = vmul.f32 1.442695, %v1505_v7 }
 0x36c   : > { %3174 = vpow2.f32 %v1444_v5  ;;  %v4211_v26 = vmul.f32 1.442695, %v1506_v15  ;;  %v4681_v27 = vperm.slane %v4167_v41, 0  ;;  %v4682_v30 = vperm.slane %v4167_v41, 1  ;;  %v1628_v25 = vld [vmem:[#allocation2 + $0x18] sm:$0xff]  ;;  %v1629_v3 = vld [vmem:[#allocation2 + $0x8] sm:$0xff] }
 0x36d   : > { %v2049_v31 = vld [vmem:[#allocation5 + $0x6] ss:$8 sm:$0x3]  ;;  %v4215_v33 = vld [vmem:[#allocation5 + $0x7] ss:$8 sm:$0x3]  ;;  %3176 = vpow2.f32 %v1438_v6  ;;  %v4222_v63 = vmul.f32 %v1453_v50, %v4157_v35  ;;  %v4225_v22 = vmul.f32 %v1454_v51, %v4159_v36  ;;  %v4228_v2 = vmul.f32 %v1477_v54, %v4157_v35 }
 0x36e   : > { %4741 = vst [vmem:[#allocation44_spill] sm:$0xff] %v4215_v33  ;;  %v2051_v43 = vperm.slane %v2049_v31, 0  ;;  %v2052_v44 = vperm.slane %v2049_v31, 1  ;;  %v4219_v60 = vld [vmem:[#allocation5 + $0x3] ss:$8 sm:$0x3]  ;;  %3178 = vpow2.f32 %v1440_v8  ;;  %v1529_v5 = vmul.f32 %v4681_v27, %v4163_v38 }
 0x36f   : > { %v1724_v61 = vld [vmem:[#allocation5 + $0x1] ss:$8 sm:$0x3]  ;;  %v1655_v4 = vld [vmem:[#allocation5] ss:$8 sm:$0x3]  ;;  %v4236_v6 = vmul.f32 %v4682_v30, %v4165_v39  ;;  %v4239_v50 = vmul.f32 %v1478_v55, %v4159_v36  ;;  %3180 = vpow2.f32 %v4196_v10 }
 0x370   : > { %v4242_v54 = vmul.f32 %v2051_v43, %v4143_v24  ;;  %v4245_v7 = vmul.f32 %v2052_v44, %v4143_v24  ;;  %v4689_v8 = vperm.slane %v4219_v60, 0  ;;  %v4690_v15 = vperm.slane %v4219_v60, 1  ;;  %v1919_v56 = vld [vmem:[#allocation5 + $0x4] ss:$8 sm:$0x3] }
 0x371   : > { %v3173_v51 = vpop.eup %3172  ;;  %v4249_v9 = vmul.f32 %v2051_v43, %v2034_v16  ;;  %v1726_v27 = vperm.slane %v1724_v61, 0  ;;  %v1727_v30 = vperm.slane %v1724_v61, 1  ;;  %v1657_v57 = vperm.slane %v1655_v4, 0  ;;  %v1789_v59 = vld [vmem:[#allocation5 + $0x2] ss:$8 sm:$0x3]  ;;  %v2099_v10 = vpop.xlane.xlu2 %2098 }
 0x372   : > { %v3175_v31 = vpop.eup %3174  ;;  %v4251_v11 = vmul.f32 %v2052_v44, %v2034_v16  ;;  %v1653_v48 = vmul.f32 %v3173_v51, %v1628_v25  ;;  %v1658_v13 = vperm.slane %v1655_v4, 1  ;;  %v4256_v24 = vmul.f32 %v4689_v8, %v4151_v32  ;;  %v1626_v16 = vld [vmem:[#allocation2 + $0x10] sm:$0xff]  ;;  %v1643_v51 = vpop.xlane.xlu0 %1642 }
 0x373   : > { %4742 = vst [vmem:[#allocation45_spill] sm:$0xff] %v4249_v9  ;;  %v3177_v55 = vpop.eup %3176  ;;  %v1654_v14 = vmul.f32 %v3175_v31, %v1629_v3  ;;  %v4261_v43 = vmul.f32 %v4690_v15, %v4151_v32  ;;  %v1730_v61 = vmul.f32 %v1726_v27, %v4129_v53  ;;  %v4265_v52 = vmul.f32 %v1727_v30, %v4129_v53  ;;  %v4275_v53 = vpop.xlane.xlu1 %1776 }
 0x374   : > { %4743 = vst [vmem:[#allocation46_spill] sm:$0xff] %v4251_v11  ;;  %v1663_v44 = vmul.f32 %v1657_v57, %v4141_v21  ;;  %v1664_v25 = vmul.f32 %v1658_v13, %v4141_v21  ;;  %v1921_v3 = vperm.slane %v1919_v56, 0  ;;  %v1922_v4 = vperm.slane %v1919_v56, 1  ;;  %v3179_v31 = vpop.eup %3178 }
 0x375   : > { %v4270_v8 = vmul.f32 %v1726_v27, %v4177_v47  ;;  %v4273_v32 = vmul.f32 %v1727_v30, %v4177_v47  ;;  %v1791_v15 = vperm.slane %v1789_v59, 0  ;;  %v1792_v0 = vperm.slane %v1789_v59, 1  ;;  %v1984_v59 = vld [vmem:[#allocation5 + $0x5] ss:$8 sm:$0x3] }
 0x376   : > { %v4277_v28 = vadd.f32 %v1663_v44, %v1653_v48  ;;  %v4279_v11 = vadd.f32 %v1664_v25, %v1654_v14  ;;  %v1651_v21 = vmul.f32 %v3177_v55, %v1626_v16  ;;  %v4283_v56 = vmul.f32 %v1921_v3, %v4127_v49 }
 0x377   : > { %v4286_v27 = vmul.f32 %v1922_v4, %v4127_v49  ;;  %v4288_v47 = vmul.f32 %v1921_v3, %v1904_v62  ;;  %v4290_v30 = vmul.f32 %v1922_v4, %v1904_v62  ;;  %v1795_v9 = vmul.f32 %v1791_v15, %v4131_v58 }
 0x378   : > { %v1796_v48 = vmul.f32 %v1792_v0, %v4131_v58  ;;  %3182 = vpow2.f32 %v4198_v12  ;;  %v1652_v14 = vmul.f32 %v3179_v31, %v1627_v29  ;;  %v4296_v55 = vmul.f32 %v1791_v15, %v4161_v37 }
 0x379   : > { %v4299_v16 = vmul.f32 %v1792_v0, %v4161_v37  ;;  %v1661_v49 = vmul.f32 %v1657_v57, %v4125_v40  ;;  %v1662_v62 = vmul.f32 %v1658_v13, %v4125_v40  ;;  %v4744_v44 = vperm.slane %v4215_v33, 0  ;;  %v3181_v37 = vpop.eup %3180 }
 0x37a   : > { %v1986_v3 = vperm.slane %v1984_v59, 0  ;;  %v1987_v58 = vperm.slane %v1984_v59, 1  ;;  %3184 = vpow2.f32 %v4203_v18  ;;  %v4745_v15 = vperm.slane %v4215_v33, 1 }
 0x37b   : > { %v4305_v25 = vmul.f32 %v4744_v44, %v2099_v10  ;;  %v1665_v29 = vadd.f32 %v1661_v49, %v1651_v21  ;;  %v1666_v12 = vadd.f32 %v1662_v62, %v1652_v14  ;;  %v1533_v0 = vmul.f32 1.442695, %v1529_v5 }
 0x37c   : > { %v4310_v4 = vmul.f32 %v4745_v15, %v2099_v10  ;;  %v4313_v57 = vmul.f32 %v1986_v3, %v4139_v17  ;;  %v4316_v13 = vmul.f32 %v1987_v58, %v4139_v17  ;;  %3186 = vpow2.f32 %v4205_v19  ;;  %v4331_v17 = vpop.xlane.xlu0 %1841 }
 0x37d   : > { %v1535_v40 = vmul.f32 1.442695, %v4236_v6  ;;  %v1720_v31 = vmul.f32 %v3181_v37, %v1665_v29  ;;  %v4321_v18 = vmul.f32 %v1986_v3, %v4209_v23  ;;  %v4324_v21 = vmul.f32 %v1987_v58, %v4209_v23 }
 0x37e   : > { %4746 = vst [vmem:[#allocation47_spill] sm:$0xff] %v4310_v4  ;;  %3188 = vpow2.f32 %v4207_v20  ;;  %v3183_v5 = vpop.eup %3182  ;;  %v4327_v59 = vmul.f32 %v1665_v29, %v1643_v51  ;;  %v4329_v14 = vmul.f32 %v1666_v12, %v1643_v51  ;;  %v4695_v19 = vperm.slane %v4169_v42, 0  ;;  %v4339_v20 = vpop.xlane.xlu1 %1971 }
 0x37f   : > { %3190 = vpow2.f32 %v4211_v26  ;;  %v1721_v6 = vmul.f32 %v3183_v5, %v1666_v12  ;;  %v1734_v10 = vadd.f32 %v1730_v61, %v1720_v31  ;;  %v4747_v49 = vperm.slane %v4219_v60, 0 }
 0x380   : > { %v4694_v62 = vperm.slane %v4169_v42, 1  ;;  %v3185_v44 = vpop.eup %3184  ;;  %v4748_v51 = vperm.slane %v4219_v60, 1  ;;  %v1553_v26 = vmul.f32 %v4695_v19, %v4163_v38  ;;  %v4698_v58 = vperm.slane %v4173_v45, 0  ;;  %v1712_v60 = vpop.xlane.xlu2 %1711 }
 0x381   : > { %v1860_v23 = vmul.f32 %v4747_v49, %v4137_v1  ;;  %v4699_v61 = vperm.slane %v4173_v45, 1  ;;  %v1735_v29 = vadd.f32 %v4265_v52, %v1721_v6  ;;  %3192 = vpow2.f32 %v1533_v0 }
 0x382   : > { %v1861_v3 = vmul.f32 %v4748_v51, %v4137_v1  ;;  %v1785_v12 = vmul.f32 %v3185_v44, %v1734_v10  ;;  %v1554_v15 = vmul.f32 %v4694_v62, %v4165_v39  ;;  %v3187_v37 = vpop.eup %3186  ;;  %3194 = vpow2.f32 %v1535_v40 }
 0x383   : > { %v1557_v1 = vmul.f32 1.442695, %v1553_v26  ;;  %v1577_v31 = vmul.f32 %v4698_v58, %v4163_v38  ;;  %v1578_v5 = vmul.f32 %v4699_v61, %v4165_v39  ;;  %v1786_v52 = vmul.f32 %v3187_v37, %v1735_v29 }
 0x384   : > { %v3189_v49 = vpop.eup %3188  ;;  %v1799_v0 = vadd.f32 %v1795_v9, %v1785_v12  ;;  %v4359_v6 = vmul.f32 %v1734_v10, %v1712_v60  ;;  %v1559_v44 = vmul.f32 1.442695, %v1554_v15  ;;  %v1465_v26 = vmul.f32 1.442695, %v4222_v63 }
 0x385   : > { %v3191_v51 = vpop.eup %3190  ;;  %3196 = vpow2.f32 %v1557_v1  ;;  %v1581_v62 = vmul.f32 1.442695, %v1577_v31  ;;  %v1583_v40 = vmul.f32 1.442695, %v1578_v5  ;;  %v1800_v19 = vadd.f32 %v1796_v48, %v1786_v52  ;;  %v4372_v48 = vpop.xlane.xlu0 %2036 }
 0x386   : > { %v1850_v33 = vmul.f32 %v3189_v49, %v1799_v0  ;;  %3198 = vpow2.f32 %v1559_v44  ;;  %v1467_v58 = vmul.f32 1.442695, %v4225_v22  ;;  %v4364_v4 = vmul.f32 %v1799_v0, %v4275_v53 }
 0x387   : > { %v4366_v61 = vmul.f32 %v1735_v29, %v1712_v60  ;;  %3200 = vpow2.f32 %v1581_v62  ;;  %v1489_v9 = vmul.f32 1.442695, %v4228_v2  ;;  %v3193_v10 = vpop.eup %3192  ;;  %v1851_v12 = vmul.f32 %v3191_v51, %v1800_v19 }
 0x388   : > { %v1864_v15 = vadd.f32 %v1860_v23, %v1850_v33  ;;  %v4370_v37 = vmul.f32 %v1800_v19, %v4275_v53  ;;  %3202 = vpow2.f32 %v1583_v40  ;;  %v3195_v63 = vpop.eup %3194  ;;  %v1491_v22 = vmul.f32 1.442695, %v4239_v50  ;;  %v1646_v19 = vpop.xlane.xlu1 %1645 }
 0x389   : > { %3204 = vpow2.f32 %v1465_v26  ;;  %v4749_v29 = vperm.slane %v4155_v34, 0  ;;  %v4750_v2 = vperm.slane %v4155_v34, 1  ;;  %v1865_v1 = vadd.f32 %v1861_v3, %v1851_v12  ;;  %v1907_v51 = vpop.xlane.xlu2 %1906 }
 0x38a   : > { %v4382_v33 = vmul.f32 %v1864_v15, %v4331_v17  ;;  %v1915_v53 = vmul.f32 %v3193_v10, %v1864_v15  ;;  %3206 = vpow2.f32 %v1467_v58  ;;  %v4751_v50 = vperm.slane %v4167_v41, 0 }
 0x38b   : > { %v1507_v60 = vmul.f32 %v4749_v29, %v4157_v35  ;;  %v1508_v62 = vmul.f32 %v4750_v2, %v4159_v36  ;;  %v3197_v23 = vpop.eup %3196  ;;  %3208 = vpow2.f32 %v1489_v9  ;;  %v4388_v0 = vmul.f32 %v1865_v1, %v4331_v17 }
 0x38c   : > { %v1531_v49 = vmul.f32 %v4751_v50, %v4157_v35  ;;  %v3199_v52 = vpop.eup %3198  ;;  %v1916_v34 = vmul.f32 %v3195_v63, %v1865_v1  ;;  %v1929_v3 = vadd.f32 %v4283_v56, %v1915_v53  ;;  %3210 = vpow2.f32 %v1491_v22 }
 0x38d   : > { %v1513_v31 = vmul.f32 1.442695, %v1507_v60  ;;  %v1515_v5 = vmul.f32 1.442695, %v1508_v62  ;;  %v3201_v44 = vpop.eup %3200  ;;  %v4752_v58 = vperm.slane %v4167_v41, 1  ;;  %v1671_v9 = vmul.f32 %v4277_v28, %v1646_v19 }
 0x38e   : > { %v1537_v26 = vmul.f32 1.442695, %v1531_v49  ;;  %v3203_v10 = vpop.eup %3202  ;;  %v1930_v12 = vadd.f32 %v4286_v27, %v1916_v34  ;;  %v1980_v15 = vmul.f32 %v3197_v23, %v1929_v3  ;;  %v4396_v17 = vmul.f32 %v1929_v3, %v1907_v51 }
 0x38f   : > { %3212 = vpow2.f32 %v1513_v31  ;;  %v1532_v40 = vmul.f32 %v4752_v58, %v4159_v36  ;;  %v3205_v63 = vpop.eup %3204  ;;  %v1672_v22 = vmul.f32 %v4279_v11, %v1646_v19  ;;  %v1673_v29 = vadd.f32 %v1671_v9, %v4327_v59 }
 0x390   : > { %3214 = vpow2.f32 %v1515_v5  ;;  %v3207_v60 = vpop.eup %3206  ;;  %v1981_v41 = vmul.f32 %v3199_v52, %v1930_v12  ;;  %v1994_v2 = vadd.f32 %v4313_v57, %v1980_v15  ;;  %v4401_v62 = vmul.f32 %v1930_v12, %v1907_v51 }
 0x391   : > { %3216 = vpow2.f32 %v1537_v26  ;;  %v1539_v56 = vmul.f32 1.442695, %v1532_v40  ;;  %v1722_v1 = vmul.f32 %v3205_v63, %v4277_v28  ;;  %v3209_v27 = vpop.eup %3208  ;;  %v1723_v53 = vmul.f32 %v3207_v60, %v4279_v11  ;;  %v1715_v28 = vpop.xlane.xlu0 %1714 }
 0x392   : > { %v1674_v23 = vrot.slane %v1673_v29, 4  ;;  %v1680_v31 = vadd.f32 %v1672_v22, %v4329_v14  ;;  %v3211_v5 = vpop.eup %3210  ;;  %v1995_v19 = vadd.f32 %v4316_v13, %v1981_v41  ;;  %v2045_v50 = vmul.f32 %v3201_v44, %v1994_v2 }
 0x393   : > { %3218 = vpow2.f32 %v1539_v56  ;;  %v4408_v59 = vmul.f32 %v1994_v2, %v4339_v20  ;;  %v1736_v57 = vadd.f32 %v4270_v8, %v1722_v1  ;;  %v1737_v52 = vadd.f32 %v4273_v32, %v1723_v53  ;;  %v1780_v1 = vpop.xlane.xlu2 %1779 }
 0x394   : > { %v1675_v34 = vadd.f32 %v1674_v23, %v1673_v29  ;;  %v1681_v3 = vrot.slane %v1680_v31, 4  ;;  %v4753_v11 = vperm.slane %v4169_v42, 0  ;;  %v2046_v58 = vmul.f32 %v3203_v10, %v1995_v19 }
 0x395   : > { %v3213_v49 = vpop.eup %3212  ;;  %v4416_v13 = vadd.f32 %v4242_v54, %v2045_v50  ;;  %v4419_v44 = vmul.f32 %v1995_v19, %v4339_v20  ;;  %v1740_v40 = vmul.f32 %v1736_v57, %v1715_v28  ;;  %v1741_v26 = vmul.f32 %v1737_v52, %v1715_v28 }
 0x396   : > { %v1555_v51 = vmul.f32 %v4753_v11, %v4157_v35  ;;  %v3215_v14 = vpop.eup %3214  ;;  %v1787_v9 = vmul.f32 %v3209_v27, %v1736_v57  ;;  %v1788_v32 = vmul.f32 %v3211_v5, %v1737_v52  ;;  %v1676_v12 = vrot.slane %v1675_v34, 2 }
 0x397   : > { %v3217_v8 = vpop.eup %3216  ;;  %v4422_v15 = vadd.f32 %v4245_v7, %v2046_v58  ;;  %v4426_v63 = vmul.f32 %v4416_v13, %v4372_v48  ;;  %v1742_v10 = vadd.f32 %v1740_v40, %v4359_v6  ;;  %v1682_v54 = vadd.f32 %v1681_v3, %v1680_v31 }
 0x398   : > { %v1749_v20 = vadd.f32 %v1741_v26, %v4366_v61  ;;  %v1801_v22 = vadd.f32 %v4296_v55, %v1787_v9  ;;  %v1802_v29 = vadd.f32 %v4299_v16, %v1788_v32  ;;  %v1677_v60 = vadd.f32 %v1676_v12, %v1675_v34 }
 0x399   : > { %v3219_v56 = vpop.eup %3218  ;;  %v4434_v7 = vmul.f32 %v4422_v15, %v4372_v48  ;;  %v4754_v41 = vlaneseq  ;;  %v1743_v6 = vrot.slane %v1742_v10, 4  ;;  %v1683_v27 = vrot.slane %v1682_v54, 2 }
 0x39a   : > { %v4757_v61 = vperm.slane %v4169_v42, 1  ;;  %v1750_v55 = vrot.slane %v1749_v20, 4  ;;  %v1852_v23 = vmul.f32 %v3213_v49, %v1801_v22  ;;  %v1853_v16 = vmul.f32 %v3215_v14, %v1802_v29 }
 0x39b   : > { %vm4437_vm14 = vcmp.lt.s32.totalorder %v4754_v41, 256  ;;  %v1805_v31 = vmul.f32 %v1801_v22, %v1780_v1  ;;  %v1744_v5 = vadd.f32 %v1743_v6, %v1742_v10  ;;  %v1806_v19 = vmul.f32 %v1802_v29, %v1780_v1  ;;  %v1910_v22 = vpop.xlane.xlu0 %1909 }
 0x39c   : > { %v1556_v53 = vmul.f32 %v4757_v61, %v4159_v36  ;;  %v1678_v48 = vrot.slane %v1677_v60, 1  ;;  %v1684_v50 = vadd.f32 %v1683_v27, %v1682_v54  ;;  %v1751_v57 = vadd.f32 %v1750_v55, %v1749_v20 }
 0x39d   : > { %v1807_v52 = vadd.f32 %v1805_v31, %v4364_v4  ;;  %v4446_v28 = vadd.f32 %v4256_v24, %v1852_v23  ;;  %v4449_v34 = vadd.f32 %v4261_v43, %v1853_v16  ;;  %v1745_v3 = vrot.slane %v1744_v5, 2 }
 0x39e   : > { %v1814_v42 = vadd.f32 %v1806_v19, %v4370_v37  ;;  %v1679_v11 = vadd.f32 %v1678_v48, %v1677_v60  ;;  %v1685_v49 = vrot.slane %v1684_v50, 1  ;;  %v1752_v14 = vrot.slane %v1751_v57, 2 }
 0x39f   : > { %v1808_v58 = vrot.slane %v1807_v52, 4  ;;  %v1917_v40 = vmul.f32 %v3217_v8, %v4446_v28  ;;  %v1918_v26 = vmul.f32 %v3219_v56, %v4449_v34  ;;  %v1746_v9 = vadd.f32 %v1745_v3, %v1744_v5 }
 0x3a0   : > { %v1815_v32 = vrot.slane %v1814_v42, 4  ;;  %v1686_v4 = vadd.f32 %v1685_v49, %v1684_v50  ;;  %v1561_v12 = vmul.f32 1.442695, %v1555_v51  ;;  %v1753_v24 = vadd.f32 %v1752_v14, %v1751_v57 }
 0x3a1   : > { %v1809_v10 = vadd.f32 %v1808_v58, %v1807_v52  ;;  %v1931_v43 = vadd.f32 %v4288_v47, %v1917_v40  ;;  %v1932_v54 = vadd.f32 %v4290_v30, %v1918_v26  ;;  %v1747_v20 = vrot.slane %v1746_v9, 1  ;;  %v1845_v40 = vpop.xlane.xlu1 %1844 }
 0x3a2   : > { %v1816_v37 = vadd.f32 %v1815_v32, %v1814_v42  ;;  %v1689_v29 = vrot.slane %v1686_v4, 7  ;;  %3220 = vpow2.f32 %v1561_v12  ;;  %v1754_v60 = vrot.slane %v1753_v24, 1 }
 0x3a3   : > { %v1810_v41 = vrot.slane %v1809_v10, 2  ;;  %v1935_v8 = vmul.f32 %v1931_v43, %v1910_v22  ;;  %v1936_v6 = vmul.f32 %v1932_v54, %v1910_v22  ;;  %v1748_v56 = vadd.f32 %v1747_v20, %v1746_v9 }
 0x3a4   : > { %v1817_v1 = vrot.slane %v1816_v37, 2  ;;  %v1691_v27 = vsel %vm1690_vm13, %v1679_v11, %v1689_v29  ;;  %v1563_v51 = vmul.f32 1.442695, %v1556_v53  ;;  %v1755_v61 = vadd.f32 %v1754_v60, %v1753_v24 }
 0x3a5   : > { %v1811_v55 = vadd.f32 %v1810_v41, %v1809_v10  ;;  %v1937_v47 = vadd.f32 %v1935_v8, %v4396_v17  ;;  %v1944_v30 = vadd.f32 %v1936_v6, %v4401_v62  ;;  %1697 = vst.msk [vmem:[#allocation6] ss:$8 sm:$0x3] %vm4437_vm14, %v1691_v27  ;;  %v4758_v16 = vperm.slane %v4173_v45, 0  ;;  %v1975_v8 = vpop.xlane.xlu2 %1974 }
 0x3a6   : > { %v1818_v23 = vadd.f32 %v1817_v1, %v1816_v37  ;;  %3222 = vpow2.f32 %v1563_v51  ;;  %v4759_v5 = vperm.slane %v4173_v45, 1  ;;  %v1758_v53 = vrot.slane %v1755_v61, 7 }
 0x3a7   : > { %v1579_v31 = vmul.f32 %v4758_v16, %v4157_v35  ;;  %v1812_v48 = vrot.slane %v1811_v55, 1  ;;  %v1938_v50 = vrot.slane %v1937_v47, 4  ;;  %v1945_v57 = vrot.slane %v1944_v30, 4 }
 0x3a8   : > { %v1580_v19 = vmul.f32 %v4759_v5, %v4159_v36  ;;  %v3221_v17 = vpop.eup %3220  ;;  %v1819_v52 = vrot.slane %v1818_v23, 1  ;;  %v1597_v42 = vperm.slane %v4175_v46, 0  ;;  %v1759_v11 = vsel %vm1690_vm13, %v1748_v56, %v1758_v53  ;;  %v4760_v53 = vld [vmem:[#allocation45_spill] sm:$0xff] }
 0x3a9   : > { %v1585_v62 = vmul.f32 1.442695, %v1579_v31  ;;  %v1813_v49 = vadd.f32 %v1812_v48, %v1811_v55  ;;  %v1939_v14 = vadd.f32 %v1938_v50, %v1937_v47  ;;  %v1946_v58 = vadd.f32 %v1945_v57, %v1944_v30  ;;  %1762 = vst.msk [vmem:[#allocation6 + $0x1] ss:$8 sm:$0x3] %vm4437_vm14, %v1759_v11 }
 0x3aa   : > { %v1587_v3 = vmul.f32 1.442695, %v1580_v19  ;;  %v1820_v45 = vadd.f32 %v1819_v52, %v1818_v23  ;;  %v1982_v26 = vmul.f32 %v3221_v17, %v1931_v43  ;;  %v1598_v9 = vperm.slane %v4175_v46, 1 }
 0x3ab   : > { %3224 = vpow2.f32 %v1585_v62  ;;  %v1940_v32 = vrot.slane %v1939_v14, 2  ;;  %v1947_v4 = vrot.slane %v1946_v58, 2  ;;  %v1603_v12 = vmul.f32 %v1597_v42, %v4157_v35 }
 0x3ac   : > { %3226 = vpow2.f32 %v1587_v3  ;;  %v3223_v24 = vpop.eup %3222  ;;  %v1823_v10 = vrot.slane %v1820_v45, 7  ;;  %v1996_v20 = vadd.f32 %v4321_v18, %v1982_v26  ;;  %v1604_v37 = vmul.f32 %v1598_v9, %v4159_v36 }
 0x3ad   : > { %v1870_v22 = vmul.f32 %v4446_v28, %v1845_v40  ;;  %v1941_v29 = vadd.f32 %v1940_v32, %v1939_v14  ;;  %v1948_v60 = vadd.f32 %v1947_v4, %v1946_v58  ;;  %v1983_v41 = vmul.f32 %v3223_v24, %v1932_v54  ;;  %v2982_v32 = vld [vmem:[%s4762_s16 + $0x38] sm:$0xff] }
 0x3ae   : > { %v1609_v43 = vmul.f32 1.442695, %v1603_v12  ;;  %v1824_v46 = vsel %vm1690_vm13, %v1813_v49, %v1823_v10  ;;  %v2000_v6 = vmul.f32 %v1996_v20, %v1975_v8  ;;  %v1611_v56 = vmul.f32 1.442695, %v1604_v37  ;;  %v2040_v10 = vpop.xlane.xlu1 %2039  ;;  %v4763_v37 = vld [vmem:[#allocation47_spill] sm:$0xff]  ;;  %2342 = vmatpush.bf16.msra.mxu2 %v2982_v32 }
 0x3af   : > { %v1871_v1 = vmul.f32 %v4449_v34, %v1845_v40  ;;  %1827 = vst.msk [vmem:[#allocation6 + $0x2] ss:$8 sm:$0x3] %vm4437_vm14, %v1824_v46  ;;  %v1942_v35 = vrot.slane %v1941_v29, 1  ;;  %v1949_v18 = vrot.slane %v1948_v60, 1  ;;  %v1997_v36 = vadd.f32 %v4324_v21, %v1983_v41  ;;  %v2989_v41 = vld [vmem:[%s4762_s16 + $0x70] sm:$0xff] }
 0x3b0   : > { %3228 = vpow2.f32 %v1609_v43  ;;  %v2002_v27 = vadd.f32 %v2000_v6, %v4408_v59  ;;  %v1872_v54 = vadd.f32 %v1870_v22, %v4382_v33  ;;  %v1601_v59 = vmul.f32 %v1597_v42, %v4163_v38  ;;  %v4761_v33 = vld [vmem:[#allocation46_spill] sm:$0xff] }
 0x3b1   : > { %v3225_v28 = vpop.eup %3224  ;;  %3230 = vpow2.f32 %v1611_v56  ;;  %v1879_v51 = vadd.f32 %v1871_v1, %v4388_v0  ;;  %v1943_v55 = vadd.f32 %v1942_v35, %v1941_v29  ;;  %v1950_v47 = vadd.f32 %v1949_v18, %v1948_v60  ;;  %v2981_v60 = vld [vmem:[%s4762_s16 + $0x30] sm:$0xff] }
 0x3b2   : > { %v3227_v61 = vpop.eup %3226  ;;  %v2047_v34 = vmul.f32 %v3225_v28, %v1996_v20  ;;  %v2001_v30 = vmul.f32 %v1997_v36, %v1975_v8  ;;  %v2003_v16 = vrot.slane %v2002_v27, 4  ;;  %v1873_v31 = vrot.slane %v1872_v54, 4  ;;  %v4764_v43 = vld [vmem:[#allocation42_spill] sm:$0xff]  ;;  %v4765_v1 = vld [vmem:[#allocation43_spill] sm:$0xff]  ;;  %2343 = vmatpush.bf16.msra.mxu2 %v2981_v60 }
 0x3b3   : > { %v2048_v23 = vmul.f32 %v3227_v61, %v1997_v36  ;;  %v1880_v5 = vrot.slane %v1879_v51, 4  ;;  %v1953_v19 = vrot.slane %v1950_v47, 7  ;;  %v1602_v11 = vmul.f32 %v1598_v9, %v4165_v39  ;;  %v2990_v39 = vld [vmem:[%s4762_s16 + $0x78] sm:$0xff]  ;;  %v2988_v61 = vld [vmem:[%s4762_s16 + $0x68] sm:$0xff] }
 0x3b4   : > { %v2009_v21 = vadd.f32 %v2001_v30, %v4419_v44  ;;  %v2061_v48 = vadd.f32 %v4760_v53, %v2047_v34  ;;  %v2004_v50 = vadd.f32 %v2003_v16, %v2002_v27  ;;  %v1874_v0 = vadd.f32 %v1873_v31, %v1872_v54  ;;  %2355 = vmatpush.bf16.msra.mxu3 %v2990_v39  ;;  %v2978_v39 = vld [vmem:[%s4762_s16 + $0x18] sm:$0xff] }
 0x3b5   : > { %v2062_v57 = vadd.f32 %v4761_v33, %v2048_v23  ;;  %v1881_v17 = vadd.f32 %v1880_v5, %v1879_v51  ;;  %v1954_v62 = vsel %vm1690_vm13, %v1943_v55, %v1953_v19  ;;  %v1605_v49 = vmul.f32 1.442695, %v1601_v59  ;;  %v2980_v51 = vld [vmem:[%s4762_s16 + $0x28] sm:$0xff]  ;;  %v4767_v55 = vld [vmem:[#allocation44_spill] sm:$0xff] }
 0x3b6   : > { %v3229_v52 = vpop.eup %3228  ;;  %v2010_v3 = vrot.slane %v2009_v21, 4  ;;  %1957 = vst.msk [vmem:[#allocation6 + $0x4] ss:$8 sm:$0x3] %vm4437_vm14, %v1954_v62  ;;  %v2005_v44 = vrot.slane %v2004_v50, 2  ;;  %v1875_v40 = vrot.slane %v1874_v0, 2  ;;  %v2065_v29 = vmul.f32 %v2061_v48, %v2040_v10  ;;  %v2102_v62 = vpop.xlane.xlu2 %2101  ;;  %2344 = vmatpush.bf16.msra.mxu2 %v2980_v51 }
 0x3b7   : > { %v3231_v14 = vpop.eup %3230  ;;  %v2112_v58 = vmul.f32 %v3229_v52, %v2061_v48  ;;  %v1882_v38 = vrot.slane %v1881_v17, 2  ;;  %3232 = vpow2.f32 %v1605_v49  ;;  %v1607_v26 = vmul.f32 1.442695, %v1602_v11  ;;  %v2984_v51 = vld [vmem:[%s4762_s16 + $0x48] sm:$0xff] }
 0x3b8   : > { %v2011_v42 = vadd.f32 %v2010_v3, %v2009_v21  ;;  %v2113_v45 = vmul.f32 %v3231_v14, %v2062_v57  ;;  %v2006_v9 = vadd.f32 %v2005_v44, %v2004_v50  ;;  %v1876_v12 = vadd.f32 %v1875_v40, %v1874_v0  ;;  %2356 = vmatpush.bf16.msra.mxu3 %v2989_v41  ;;  %v2105_v21 = vpop.xlane.xlu0 %2104  ;;  %v2979_v0 = vld [vmem:[%s4762_s16 + $0x20] sm:$0xff]  ;;  %v2977_v41 = vld [vmem:[%s4762_s16 + $0x10] sm:$0xff] }
 0x3b9   : > { %v2126_v4 = vadd.f32 %v4305_v25, %v2112_v58  ;;  %v1883_v24 = vadd.f32 %v1882_v38, %v1881_v17  ;;  %3234 = vpow2.f32 %v1607_v26  ;;  %v2066_v6 = vmul.f32 %v2062_v57, %v2040_v10 }
 0x3ba   : > { %v2012_v20 = vrot.slane %v2011_v42, 2  ;;  %v2127_v22 = vadd.f32 %v4763_v37, %v2113_v45  ;;  %v1877_v25 = vrot.slane %v1876_v12, 1  ;;  %3236 = vrcp.f32 %v4764_v43  ;;  %2345 = vmatpush.bf16.msra.mxu2 %v2979_v0 }
 0x3bb   : > { %2156 = vst [vmem:[#allocation2 + $0x18] sm:$0xff] %v2126_v4  ;;  %v1884_v8 = vrot.slane %v1883_v24, 1  ;;  %v2067_v56 = vadd.f32 %v2065_v29, %v4426_v63  ;;  %3238 = vrcp.f32 %v4765_v1  ;;  %v2007_v36 = vrot.slane %v2006_v9, 1  ;;  %v4766_v63 = vld [vmem:[#allocation41_spill] sm:$0xff] }
 0x3bc   : > { %v2013_v46 = vadd.f32 %v2012_v20, %v2011_v42  ;;  %2157 = vst [vmem:[#allocation2 + $0x8] sm:$0xff] %v2127_v22  ;;  %v2074_v54 = vadd.f32 %v2066_v6, %v4434_v7  ;;  %v4768_v47 = vperm.slane %v4767_v55, 0  ;;  %v1878_v30 = vadd.f32 %v1877_v25, %v1876_v12  ;;  %2357 = vmatpush.bf16.msra.mxu3 %v2988_v61  ;;  %v2985_v25 = vld [vmem:[%s4762_s16 + $0x50] sm:$0xff] }
 0x3bd   : > { %v1885_v35 = vadd.f32 %v1884_v8, %v1883_v24  ;;  %v3233_v18 = vpop.eup %3232  ;;  %v2068_v27 = vrot.slane %v2067_v56, 4  ;;  %v4769_v7 = vperm.slane %v4767_v55, 1  ;;  %v2130_v59 = vmul.f32 %v2126_v4, %v2105_v21 }
 0x3be   : > { %v2014_v28 = vrot.slane %v2013_v46, 1  ;;  %v2120_v34 = vmul.f32 %v4768_v47, %v4766_v63  ;;  %v2110_v16 = vmul.f32 %v3233_v18, %v4416_v13  ;;  %v2075_v48 = vrot.slane %v2074_v54, 4  ;;  %2346 = vmatpush.bf16.msra.mxu2 %v2978_v39 }
 0x3bf   : > { %v1888_v23 = vrot.slane %v1885_v35, 7  ;;  %v3235_v31 = vpop.eup %3234  ;;  %v2121_v5 = vmul.f32 %v4769_v7, %v4766_v63  ;;  %v2069_v53 = vadd.f32 %v2068_v27, %v2067_v56  ;;  %v2008_v17 = vadd.f32 %v2007_v36, %v2006_v9  ;;  %v2986_v9 = vld [vmem:[%s4762_s16 + $0x58] sm:$0xff] }
 0x3c0   : > { %v2015_v19 = vadd.f32 %v2014_v28, %v2013_v46  ;;  %v2111_v33 = vmul.f32 %v3235_v31, %v4422_v15  ;;  %v2124_v57 = vadd.f32 %v2120_v34, %v2110_v16  ;;  %v4528_v13 = vpop.eup %3236  ;;  %v2076_v11 = vadd.f32 %v2075_v48, %v2074_v54  ;;  %v2987_v15 = vld [vmem:[%s4762_s16 + $0x60] sm:$0xff]  ;;  %v2976_v54 = vld [vmem:[%s4762_s16 + $0x8] sm:$0xff] }
 0x3c1   : > { %v1889_v50 = vsel %vm1690_vm13, %v1878_v30, %v1888_v23  ;;  %v2070_v3 = vrot.slane %v2069_v53, 2  ;;  %v4535_v49 = vpop.eup %3238  ;;  %v2131_v14 = vmul.f32 %v2127_v22, %v2105_v21  ;;  %2358 = vmatpush.bf16.msra.mxu3 %v2987_v15  ;;  %v2179_v22 = vmul.f32 %v4528_v13, %v4764_v43  ;;  %v2975_v30 = vld [vmem:[%s4762_s16] sm:$0xff]  ;;  %v4771_v15 = vld [vmem:[#allocation39_spill] sm:$0xff] }
 0x3c2   : > { %v2018_v52 = vrot.slane %v2015_v19, 7  ;;  %1892 = vst.msk [vmem:[#allocation6 + $0x3] ss:$8 sm:$0x3] %vm4437_vm14, %v1889_v50  ;;  %v2125_v44 = vadd.f32 %v2121_v5, %v2111_v33  ;;  %v2128_v58 = vmul.f32 %v2124_v57, %v2102_v62  ;;  %v2077_v42 = vrot.slane %v2076_v11, 2  ;;  %2347 = vmatpush.bf16.msra.mxu2 %v2977_v41  ;;  %v2983_v23 = vld [vmem:[%s4762_s16 + $0x40] sm:$0xff] }
 0x3c3   : > { %2154 = vst [vmem:[#allocation2 + $0x10] sm:$0xff] %v2124_v57  ;;  %v2071_v38 = vadd.f32 %v2070_v3, %v2069_v53  ;;  %v2194_v29 = vmul.f32 %v4535_v49, %v4765_v1  ;;  %v2180_v36 = vsub.f32 1.0, %v2179_v22  ;;  %vm2184_vm15 = vweird.f32 %v4528_v13 }
 0x3c4   : > { %v2019_v40 = vsel %vm1690_vm13, %v2008_v17, %v2018_v52  ;;  %v2129_v45 = vmul.f32 %v2125_v44, %v2102_v62  ;;  %v2132_v26 = vadd.f32 %v2130_v59, %v2128_v58  ;;  %2155 = vst [vmem:[#allocation2] sm:$0xff] %v2125_v44  ;;  %v2078_v32 = vadd.f32 %v2077_v42, %v2076_v11  ;;  %v2160_v59 = vld [vmem:[#allocation19] sm:$0x3] }
 0x3c5   : > { %2022 = vst.msk [vmem:[#allocation6 + $0x5] ss:$8 sm:$0x3] %vm4437_vm14, %v2019_v40  ;;  %v2072_v24 = vrot.slane %v2071_v38, 1  ;;  %2359 = vmatpush.bf16.msra.mxu3 %v2986_v9  ;;  %v2195_v28 = vsub.f32 1.0, %v2194_v29  ;;  %v2181_v47 = vmul.f32 %v4528_v13, %v2180_v36  ;;  %vm2183_vm0 = vweird.f32 %v4764_v43 }
 0x3c6   : > { %v2133_v4 = vrot.slane %v2132_v26, 4  ;;  %v2139_v12 = vadd.f32 %v2131_v14, %v2129_v45  ;;  %v2079_v10 = vrot.slane %v2078_v32, 1  ;;  %2348 = vmatpush.bf16.msra.mxu2 %v2976_v54  ;;  %vm2199_vm1 = vweird.f32 %v4535_v49  ;;  %vm2185_vm2 = vmor %vm2183_vm0, %vm2184_vm15  ;;  %v4772_v14 = vld [vmem:[#allocation40_spill] sm:$0xff] }
 0x3c7   : > { %v2073_v6 = vadd.f32 %v2072_v24, %v2071_v38  ;;  %v2196_v34 = vmul.f32 %v4535_v49, %v2195_v28  ;;  %v2182_v5 = vadd.f32 %v4528_v13, %v2181_v47  ;;  %v2187_v21 = vand.u32 2147483647, %v4764_v43 }
 0x3c8   : > { %v2134_v20 = vadd.f32 %v2133_v4, %v2132_v26  ;;  %v2140_v37 = vrot.slane %v2139_v12, 4  ;;  %v2080_v60 = vadd.f32 %v2079_v10, %v2078_v32  ;;  %v2189_v53 = vand.u32 2147483648, %v4764_v43 }
 0x3c9   : > { %2360 = vmatpush.bf16.msra.mxu3 %v2985_v25  ;;  %v2197_v19 = vadd.f32 %v4535_v49, %v2196_v34  ;;  %v2204_v48 = vand.u32 2147483648, %v4765_v1  ;;  %vm2198_vm3 = vweird.f32 %v4765_v1  ;;  %v2202_v33 = vand.u32 2147483647, %v4765_v1 }
 0x3ca   : > { %v2135_v8 = vrot.slane %v2134_v20, 2  ;;  %v2141_v46 = vadd.f32 %v2140_v37, %v2139_v12  ;;  %v2083_v56 = vrot.slane %v2080_v60, 7  ;;  %2349 = vmatpush.bf16.msra.mxu2 %v2975_v30  ;;  %vm2200_vm4 = vmor %vm2198_vm3, %vm2199_vm1  ;;  %v2186_v57 = vsel %vm2185_vm2, %v4528_v13, %v2182_v5  ;;  %v4773_v13 = vld [vmem:[#allocation37_spill] sm:$0xff] }
 0x3cb   : > { %v2201_v0 = vsel %vm2200_vm4, %v4535_v49, %v2197_v19  ;;  %v2162_v17 = vperm.slane %v2160_v59, 0  ;;  %v2163_v43 = vperm.slane %v2160_v59, 1  ;;  %v2190_v52 = vor.u32 1.1754944e-38, %v2189_v53  ;;  %v4774_v49 = vld [vmem:[#allocation38_spill] sm:$0xff] }
 0x3cc   : > { %v2136_v35 = vadd.f32 %v2135_v8, %v2134_v20  ;;  %v2142_v18 = vrot.slane %v2141_v46, 2  ;;  %v2084_v27 = vsel %vm1690_vm13, %v2073_v6, %v2083_v56  ;;  %v2205_v62 = vor.u32 1.1754944e-38, %v2204_v48 }
 0x3cd   : > { %2087 = vst.msk [vmem:[#allocation6 + $0x6] ss:$8 sm:$0x3] %vm4437_vm14, %v2084_v27  ;;  %2361 = vmatpush.bf16.msra.mxu3 %v2984_v51  ;;  %vm2188_vm5 = vcmp.eq.f32.partialorder %v2187_v21, 8.507059e+37  ;;  %vm2203_vm6 = vcmp.eq.f32.partialorder %v2202_v33, 8.507059e+37  ;;  %v2166_v1 = vmul.f32 %v2162_v17, %v4771_v15  ;;  %v2167_v2 = vmul.f32 %v2163_v43, %v4772_v14 }
 0x3ce   : > { %v2143_v61 = vadd.f32 %v2142_v18, %v2141_v46  ;;  %v2137_v63 = vrot.slane %v2136_v35, 1  ;;  %v2191_v3 = vsel %vm2188_vm5, %v2190_v52, %v2186_v57  ;;  %v2206_v11 = vsel %vm2203_vm6, %v2205_v62, %v2201_v0 }
 0x3cf   : > { %v2208_v40 = vmul.f32 %v2191_v3, %v4773_v13  ;;  %v2209_v38 = vmul.f32 %v2206_v11, %v4774_v49 }
 0x3d0   : > { %v2144_v55 = vrot.slane %v2143_v61, 1  ;;  %v2138_v31 = vadd.f32 %v2137_v63, %v2136_v35 }
 0x3d1   : > { %2362 = vmatpush.bf16.msra.mxu3 %v2983_v23 }
 0x3d2   : > { %v2145_v16 = vadd.f32 %v2144_v55, %v2143_v61 }
 0x3d4   : > { %v2148_v7 = vrot.slane %v2145_v16, 7 }
 0x3d6   : > { %v2149_v50 = vsel %vm1690_vm13, %v2138_v31, %v2148_v7 }
 0x3d7   : > { %2152 = vst.msk [vmem:[#allocation6 + $0x7] ss:$8 sm:$0x3] %vm4437_vm14, %v2149_v50 }
 0x3de   : > { %v2158_v44 = vld [vmem:[#allocation6] sm:$0xff]  ;;  %v2159_v58 = vld [vmem:[#allocation6 + $0x8] sm:$0xff] }
 0x3df   : > { %v2168_v42 = vadd.f32 %v2166_v1, %v2158_v44  ;;  %v2169_v45 = vadd.f32 %v2167_v2, %v2159_v58 }
 0x3e1   : > { %v2210_v26 = vmul.f32 %v2208_v40, %v2168_v42  ;;  %v2211_v32 = vmul.f32 %v2209_v38, %v2169_v45 }
 0x3e3   : > { %v2212_v39 = vpack.c.bf16 %v2210_v26, %v2210_v26  ;;  %v2213_v9 = vpack.c.bf16 %v2211_v32, %v2211_v32 }
 0x3e5   : > { %2350 = vmatmul.bf16.vlgmr.msra.gmra.mxu2 %v2212_v39  ;;  %2363 = vmatmul.bf16.vlgmr.msra.gmra.mxu3 %v2213_v9 }
 0x3e6   : > { %3507 = shalt.err (!%p3504_p13)
}
 0x3e7   : > { %3020 = dma.vmem_to_hbm [thread:$0]  (%p3839_p0), %s2406_s10, 128, %s2408_s17, %s2375_s2  }
 0x3e8   : > { %s4776_s29 = sld [smem:[#allocation59_spill]]  ;;  %s2389_s4 = sshll.u32 %s671_s22, 4  ;;  %s2390_s4 = int_to_ptr.vmem [resolvable:$true] %s2389_s4 }
 0x3e9   : > { %s2370_s5 = scalar_lea.sflag [#allocation9], %s3870_s13 }
 0x3ee   : > { %s2387_s27 = scalar_lea.hbm %s4776_s29, %s2918_s23  ;;  %s3528_s17 = scalar_lea.hbm %s4776_s29, 32 }
 0x3ef   : > { %s2391_s21 = sshll.u32 %s2387_s27, 4  ;;  %s2392_s21 = int_to_ptr.hbm [resolvable:$true] %s2391_s21 }
 0x3f0   : > { %s3522_s15 = sshra.s32 %s2392_s21, 4  ;;  %s3523_s15 = int_to_ptr.hbm [resolvable:$true] %s3522_s15 }
 0x3f1   : > { %s3524_s11 = scalar_lea.hbm %s3523_s15, 8  ;;  %p3529_p7 = scmp.lt.s32.totalorder %s3523_s15, %s4776_s29 }
 0x3f2   : > { %p3525_p2 = scmp.ne.s32.totalorder %s3523_s15, %s3524_s11  ;;  %p3530_p3 = scmp.lt.s32.totalorder %s3528_s17, %s3524_s11 }
 0x3f4   : > { %p3526_p4 = pnand %p3525_p2, %p3839_p0  ;;  %p3531_p1 = por %p3530_p3, %p3529_p7 }
 0x3f6   : > { %p3527_p5 = pneg %p3526_p4 }
 0x3f8   : > { %p3532_p8 = pnand %p3531_p1, %p3527_p5 }
 0x468   : > { %v2351_v4 = vpop.f32.mrf.mxu2  ;;  %v2364_v12 = vpop.f32.mrf.mxu3 }
 0x469   : > { %v2365_v24 = vadd.f32 %v2364_v12, %v2351_v4 }
 0x46b   : > { %2368 = vst [vmem:[%s671_s22] sm:$0xff] %v2365_v24 }
 0x46c   : > { %3535 = shalt.err (!%p3532_p8)
}
 0x46d   : > { %3019 = dma.vmem_to_hbm [thread:$0]  (%p3839_p0), %s2390_s4, 128, %s2392_s21, %s2370_s5  }
 0x470   : > { %v2353_v10 = vpop.f32.mrf.mxu2  ;;  %v2366_v20 = vpop.f32.mrf.mxu3 }
 0x471 PF: > { %p3069_p9 = scmp.ge.s32.totalorder %s3630_s25, 2  ;;  %s2419_s13 = sand.u32 1, %s3602_s18  }
 0x472   : > { %s2420_s8 = scalar_lea.sflag [#allocation9], %s2419_s13 }
 0x473   : > { %p3050_p10 = pnand %p3069_p9, %p3846_p6 }
 0x475   : > { %p3051_p11 = pneg %p3050_p10 }
 0x477   : > { %3593 = dma.done.wait (%p3051_p11), %s2420_s8, 128  }
 0x478   : > { %3595 = vsyncadd (%p3051_p11), %s2420_s8, 4294967168  ;;  %s2430_s22 = scalar_lea.sflag [#allocation23], %s2419_s13 }
 0x479   : > { %3597 = dma.done.wait (%p3051_p11), %s2430_s22, 128  }
 0x47a   : > { %3599 = vsyncadd (%p3051_p11), %s2430_s22, 4294967168  ;;  %s41_s25 = sadd.s32 1, %s3630_s25   ;;  %s4777_s21 = sld [smem:[#allocation33_spill]] }
 0x47b   : > { %p38_p0 = scmp.ge.s32.totalorder %s41_s25, 6   ;;  %s4778_s22 = sld [smem:[#allocation34_spill]] }
 0x47c   : > { %s4779_s23 = sld [smem:[#allocation35_spill]]  ;;  %s4781_s18 = smov %s3606_s19 }
 0x47d   : > { %s4780_s24 = sld [smem:[#allocation36_spill]]  ;;  %s4782_s19 = smov %s3610_s20 }
 0x47e   : > { %s4783_s20 = smov %s3853_s6  ;;  %40 = sbr.rel (!%p38_p0) target bundleno = 28 (0x1c), region = 203 }
 0x483   :  { %2436 = vsyncpa [#allocation8], 1 }
 0x484   :  { %2438 = vsyncpa [#allocation8 + $0x1], 1 }
 0x485   :  { %2439 = vsyncpa [#allocation11], 1 }
 0x486   :  { %2441 = vsyncpa [#allocation11 + $0x1], 1 }
 0x487   :  { %2442 = vsyncpa [#allocation14], 1 }
 0x488   :  { %2443 = vsyncpa [#allocation17], 1 }
 0x489   :  { %2444 = vsyncpa [#allocation20], 1 }
 0x48a   :  { %2445 = vsyncpa [#allocation9], 1 }
 0x48b   :  { %2447 = vsyncpa [#allocation9 + $0x1], 1 }
 0x48c   :  { %2448 = vsyncpa [#allocation23], 1 }
 0x48d   :  { %2450 = vsyncpa [#allocation23 + $0x1], 1 }

</bundles_post_ra>
